<compile_context>
chip_gen: v7x
topology: tpu7x:2x2x1
jax: 0.10.0
libtpu: 0.0.40
codegen_flags: <defaults>
</compile_context>

<pallas_src>
import math

import jax
import jax.numpy as jnp
from jax.experimental import pallas as pl
from jax.experimental.pallas import tpu as pltpu

Z_SIZE = 16
NHML = 16
NHPL = 16
CONV_CHANNELS = (32, 64, 128, 256)
CONV_KSIZES = (4, 4, 3, 2)
CONV_STRIDES = (2, 2, 2, 2)
ACTION_MAP = {0: 2, 1: 3}


# ----------------------------------------------------------------------------
# In-kernel building blocks
# ----------------------------------------------------------------------------

def _conv_relu_layer(in_ref, out_ref, w_ref, b_ref, w_in, o_hw, k, stride):
    """Valid conv (square spatial) + bias + ReLU, fully inside the kernel.

    in_ref : (H_in*W_in, IC) f32 VMEM ref, row-major (W minor).
    out_ref: (OH*OW, OC)     f32 VMEM ref.
    w_ref  : (K*K, IC, OC)   bf16 VMEM ref (tap-major im2col weights).
    b_ref  : (1, OC)         f32.

    Per output row `oh`: accumulate K*K tap GEMMs over contiguous chunks of
    length L = stride*(OW-1)+1 starting at (stride*oh+i)*W_in + j, then select
    the stride-s rows with one (OW, L) 0/1 matmul — no strided loads needed.
    """
    oc = w_ref.shape[-1]
    L = stride * (o_hw - 1) + 1
    row_id = jax.lax.broadcasted_iota(jnp.int32, (o_hw, L), 0)
    col_id = jax.lax.broadcasted_iota(jnp.int32, (o_hw, L), 1)
    sel = (col_id == stride * row_id).astype(jnp.float32)          # (OW, L)
    bias = b_ref[...]                                              # (1, OC)

    def row_body(oh, carry):
        acc = jnp.zeros((L, oc), jnp.float32)
        for i in range(k):
            for j in range(k):
                start = (stride * oh + i) * w_in + j
                chunk = in_ref[pl.ds(start, L), :].astype(jnp.bfloat16)   # (L, IC)
                acc = acc + jnp.dot(chunk, w_ref[i * k + j],
                                    preferred_element_type=jnp.float32)
        row = jnp.dot(sel, acc, preferred_element_type=jnp.float32) + bias
        out_ref[pl.ds(oh * o_hw, o_hw), :] = jnp.maximum(row, 0.0)
        return carry

    if o_hw <= 4:                       # tiny layers: compile-time unroll
        for oh in range(o_hw):
            row_body(oh, 0)
    else:
        jax.lax.fori_loop(0, o_hw, row_body, 0)


def _lstm_gates(gates, c_old, h):
    """PyTorch nn.LSTMCell gate order (i, f, g, o)."""
    i = jax.nn.sigmoid(gates[:, 0 * h:1 * h])
    f = jax.nn.sigmoid(gates[:, 1 * h:2 * h])
    g = jnp.tanh(gates[:, 2 * h:3 * h])
    o = jax.nn.sigmoid(gates[:, 3 * h:4 * h])
    c_new = f * c_old + i * g
    h_new = o * jnp.tanh(c_new)
    return h_new, c_new


def _make_kernel(plan, num_outputs):
    """plan: tuple of (W_in, OW, K, stride) per conv layer (square spatial)."""

    def kernel(x_ref,
               w1_ref, b1_ref, w2_ref, b2_ref, w3_ref, b3_ref, w4_ref, b4_ref,
               wz_ref, bz_ref,
               wpih_ref, wphh_ref, bp_ref,
               wmih_ref, wmhh_ref, bm_ref,
               wc_ref, bc_ref, wa_ref, ba_ref,
               state_ref,
               out_ref,
               a1_ref, a2_ref, a3_ref, a4_ref):
        # ---- encoder: conv1..conv4 (+ReLU), activations stay in VMEM scratch ----
        layers = ((x_ref, a1_ref, w1_ref, b1_ref),
                  (a1_ref, a2_ref, w2_ref, b2_ref),
                  (a2_ref, a3_ref, w3_ref, b3_ref),
                  (a3_ref, a4_ref, w4_ref, b4_ref))
        for (in_r, out_r, w_r, b_r), (w_in, o_hw, k, s) in zip(layers, plan):
            _conv_relu_layer(in_r, out_r, w_r, b_r, w_in, o_hw, k, s)

        # ---- z_fc: PyTorch flattens (C,H,W); handled by the packed (hw, c, z) weight ----
        z = bz_ref[...]                                            # (1, Z)
        for hw in range(4):
            z = z + jnp.dot(a4_ref[hw:hw + 1, :].astype(jnp.bfloat16), wz_ref[hw],
                            preferred_element_type=jnp.float32)

        # ---- recurrent state (rows: h_policy, c_policy, h_model, c_model) ----
        h_p = state_ref[0:1, :]
        c_p = state_ref[1:2, :]
        h_m = state_ref[2:3, :]
        c_m = state_ref[3:4, :]

        # ---- policy LSTM: input = [z, h_model]  (concat folded into weight slices) ----
        gates_p = (jnp.dot(z, wpih_ref[0:Z_SIZE, :], preferred_element_type=jnp.float32)
                   + jnp.dot(h_m, wpih_ref[Z_SIZE:Z_SIZE + NHML, :],
                             preferred_element_type=jnp.float32)
                   + jnp.dot(h_p, wphh_ref[...], preferred_element_type=jnp.float32)
                   + bp_ref[...])
        h_p_new, c_p_new = _lstm_gates(gates_p, c_p, NHPL)

        # ---- critic / actor head, softmax, log-softmax, entropy ----
        v = jnp.dot(h_p_new, wc_ref[...], preferred_element_type=jnp.float32) + bc_ref[...]
        logit = (jnp.dot(h_p_new, wa_ref[...], preferred_element_type=jnp.float32)
                 + ba_ref[...])
        mx = jnp.max(logit, axis=-1, keepdims=True)
        ex = jnp.exp(logit - mx)
        ssum = jnp.sum(ex, axis=-1, keepdims=True)
        prob = ex * pl.reciprocal(ssum, approx=True)
        logp = (logit - mx) - jnp.log(ssum)                        # log(softmax(logit))
        entropy = -jnp.sum(logp * prob, axis=-1, keepdims=True)

        # ---- action selection (deterministic argmax, first index on ties) ----
        # TODO(synk): torch.multinomial sampling (training branch) is stochastic; we use
        #             the deterministic argmax (eval branch, prob.max(1)) for reproducibility.
        col = jax.lax.broadcasted_iota(jnp.int32, (1, num_outputs), 1).astype(jnp.float32)
        pmax = jnp.max(prob, axis=-1, keepdims=True)
        cand = jnp.where(prob >= pmax, col, float(num_outputs))
        sample_f = jnp.min(cand, axis=-1, keepdims=True)           # (1, 1) float index
        onehot = (col == sample_f).astype(jnp.float32)             # (1, num_outputs)
        log_prob_action = jnp.sum(onehot * logp, axis=-1, keepdims=True)

        # ---- model LSTM: input = [z, action_onehot] ----
        gates_m = (jnp.dot(z, wmih_ref[0:Z_SIZE, :], preferred_element_type=jnp.float32)
                   + jnp.dot(onehot, wmih_ref[Z_SIZE:Z_SIZE + num_outputs, :],
                             preferred_element_type=jnp.float32)
                   + jnp.dot(h_m, wmhh_ref[...], preferred_element_type=jnp.float32)
                   + bm_ref[...])
        h_m_new, c_m_new = _lstm_gates(gates_m, c_m, NHML)

        # ---- pack everything into one lane-dense (8, 128) output slab ----
        out_ref[...] = jnp.zeros_like(out_ref)
        out_ref[0:1, 0:Z_SIZE] = z
        out_ref[1:2, 0:NHPL] = h_p_new
        out_ref[2:3, 0:NHPL] = c_p_new
        out_ref[3:4, 0:NHML] = h_m_new
        out_ref[4:5, 0:NHML] = c_m_new
        out_ref[5:6, 0:1] = v
        out_ref[5:6, 1:2] = entropy
        out_ref[5:6, 2:3] = log_prob_action
        out_ref[5:6, 3:4] = sample_f
        out_ref[5:6, 4:4 + num_outputs] = prob
        out_ref[5:6, 4 + num_outputs:4 + 2 * num_outputs] = logp

    return kernel


# ----------------------------------------------------------------------------
# Parameter init + one-time packing into kernel layouts
# ----------------------------------------------------------------------------

def _uniform(key, shape, fan_in):
    bound = 1.0 / math.sqrt(fan_in)
    return jax.random.uniform(key, shape, jnp.float32, -bound, bound)


def pack_params(raw):
    """PyTorch-layout params -> kernel layouts (done ONCE, off the hot path)."""
    p = {}
    for idx in range(1, 5):
        w = raw[f"conv{idx}_w"]                                   # (OC, IC, KH, KW)
        oc, ic, kh, kw = w.shape
        # tap-major (KH*KW, IC, OC): tap t = i*KW + j  <->  w[:, :, i, j].T
        p[f"w{idx}"] = (jnp.transpose(w, (2, 3, 1, 0))
                        .reshape(kh * kw, ic, oc).astype(jnp.bfloat16))
        p[f"b{idx}"] = raw[f"conv{idx}_b"].reshape(1, oc).astype(jnp.float32)
    # z_fc: PyTorch flattens (C=256, H=2, W=2) as c*4 + h*2 + w; conv4 scratch is (hw, c).
    wz = raw["z_fc_w"].reshape(Z_SIZE, 256, 4)                    # [z, c, hw]
    p["wz"] = jnp.transpose(wz, (2, 1, 0)).astype(jnp.bfloat16)   # (4, 256, Z)
    p["bz"] = raw["z_fc_b"].reshape(1, Z_SIZE).astype(jnp.float32)
    p["wp_ih"] = raw["plstm_w_ih"].T.astype(jnp.float32)          # (Z+NHML, 4*NHPL)
    p["wp_hh"] = raw["plstm_w_hh"].T.astype(jnp.float32)          # (NHPL, 4*NHPL)
    p["bp"] = (raw["plstm_b_ih"] + raw["plstm_b_hh"]).reshape(1, -1).astype(jnp.float32)
    p["wm_ih"] = raw["mlstm_w_ih"].T.astype(jnp.float32)          # (Z+A, 4*NHML)
    p["wm_hh"] = raw["mlstm_w_hh"].T.astype(jnp.float32)
    p["bm"] = (raw["mlstm_b_ih"] + raw["mlstm_b_hh"]).reshape(1, -1).astype(jnp.float32)
    p["wc"] = raw["critic_w"].T.astype(jnp.float32)               # (NHPL, 1)
    p["bc"] = raw["critic_b"].reshape(1, 1).astype(jnp.float32)
    p["wa"] = raw["actor_w"].T.astype(jnp.float32)                # (NHPL, A)
    p["ba"] = raw["actor_b"].reshape(1, -1).astype(jnp.float32)
    return p


def init_params(key, num_inputs, num_outputs):
    keys = jax.random.split(key, 24)
    k = iter(keys)
    raw = {}
    ic = num_inputs
    for idx, (oc, ks) in enumerate(zip(CONV_CHANNELS, CONV_KSIZES), start=1):
        fan = ic * ks * ks
        raw[f"conv{idx}_w"] = _uniform(next(k), (oc, ic, ks, ks), fan)
        raw[f"conv{idx}_b"] = _uniform(next(k), (oc,), fan)
        ic = oc
    raw["z_fc_w"] = _uniform(next(k), (Z_SIZE, 256 * 2 * 2), 256 * 2 * 2)
    raw["z_fc_b"] = _uniform(next(k), (Z_SIZE,), 256 * 2 * 2)
    raw["plstm_w_ih"] = _uniform(next(k), (4 * NHPL, Z_SIZE + NHML), NHPL)
    raw["plstm_w_hh"] = _uniform(next(k), (4 * NHPL, NHPL), NHPL)
    raw["plstm_b_ih"] = _uniform(next(k), (4 * NHPL,), NHPL)
    raw["plstm_b_hh"] = _uniform(next(k), (4 * NHPL,), NHPL)
    raw["mlstm_w_ih"] = _uniform(next(k), (4 * NHML, Z_SIZE + num_outputs), NHML)
    raw["mlstm_w_hh"] = _uniform(next(k), (4 * NHML, NHML), NHML)
    raw["mlstm_b_ih"] = _uniform(next(k), (4 * NHML,), NHML)
    raw["mlstm_b_hh"] = _uniform(next(k), (4 * NHML,), NHML)
    raw["critic_w"] = _uniform(next(k), (1, NHPL), NHPL)
    raw["critic_b"] = _uniform(next(k), (1,), NHPL)
    raw["actor_w"] = _uniform(next(k), (num_outputs, NHPL), NHPL)
    raw["actor_b"] = _uniform(next(k), (num_outputs,), NHPL)
    return pack_params(raw)


def reset_hidden_layer():
    """Packed recurrent state; rows = (h_policy, c_policy, h_model, c_model)."""
    return jnp.zeros((4, NHPL), jnp.float32)


def _conv_plan(hw_in):
    plan = []
    h = hw_in
    for k, s in zip(CONV_KSIZES, CONV_STRIDES):
        oh = (h - k) // s + 1
        plan.append((h, oh, k, s))
        h = oh
    if h != 2:
        raise ValueError("encoder must produce a 2x2 feature map (z_fc expects 256*2*2)")
    return tuple(plan)


# ----------------------------------------------------------------------------
# Forward pass: ONE fused pallas_call per step
# ----------------------------------------------------------------------------

@jax.jit
def forward(params, inputs_nchw, state):
    n, c, h, w = inputs_nchw.shape
    assert n == 1 and h == w, "module keeps batch-1 recurrent state and square inputs"
    plan = _conv_plan(h)
    num_outputs = params["wa"].shape[1]

    # NCHW -> NHWC -> (H*W, C): channels on the lane axis, spatial row-major.
    x = jnp.transpose(inputs_nchw.astype(jnp.float32), (0, 2, 3, 1)).reshape(h * w, c)

    scratch = [pltpu.VMEM((o_hw * o_hw, oc), jnp.float32)
               for (w_in, o_hw, kk, ss), oc in zip(plan, CONV_CHANNELS)]

    out = pl.pallas_call(
        _make_kernel(plan, num_outputs),
        out_shape=jax.ShapeDtypeStruct((8, 128), jnp.float32),
        in_specs=[pl.BlockSpec(memory_space=pltpu.MemorySpace.VMEM)] * 22,
        out_specs=pl.BlockSpec(memory_space=pltpu.MemorySpace.VMEM),
        scratch_shapes=scratch,
    )(x,
      params["w1"], params["b1"], params["w2"], params["b2"],
      params["w3"], params["b3"], params["w4"], params["b4"],
      params["wz"], params["bz"],
      params["wp_ih"], params["wp_hh"], params["bp"],
      params["wm_ih"], params["wm_hh"], params["bm"],
      params["wc"], params["bc"], params["wa"], params["ba"],
      state)

    new_state = out[1:5, 0:NHPL]                        # (4, 16) packed recurrent state
    sample_num = out[5:6, 3:4].astype(jnp.int32)        # (1, 1)
    aux = {
        "z": out[0:1, 0:Z_SIZE],
        "v": out[5:6, 0:1],
        "entropy": out[5:6, 1:2],
        "log_prob_action": out[5:6, 2:3],
        "prob": out[5:6, 4:4 + num_outputs],
        "log_prob": out[5:6, 4 + num_outputs:4 + 2 * num_outputs],
        # TODO(synk): pred_loss_f / is_new_pred_loss stateful bookkeeping lives in the
        #             training loop; the first-call branch yields 0.
        "pred_loss": jnp.float32(0.0),
    }
    return sample_num, new_state, aux


# ----------------------------------------------------------------------------
# Main
# ----------------------------------------------------------------------------

if __name__ == "__main__":
    num_inputs = 3     # input image channels
    num_outputs = 2    # len(action_map)
    # 42x42 is the smallest standard input that yields the 2x2x256 encoder output
    # required by z_fc (256*2*2 -> 16); batch must be 1 (batch-1 recurrent state).
    key = jax.random.PRNGKey(0)
    k_param, k_input = jax.random.split(key)

    params = init_params(k_param, num_inputs, num_outputs)
    state = reset_hidden_layer()
    inputs = jax.random.uniform(k_input, (1, num_inputs, 42, 42), jnp.float32)

    # two recurrent steps to exercise state threading through the fused kernel
    for _ in range(2):
        sample_num, state, aux = forward(params, inputs, state)
    jax.block_until_ready((sample_num, state, aux))

    action = ACTION_MAP[int(sample_num[0, 0])]
    assert aux["z"].shape == (1, Z_SIZE)
    assert aux["v"].shape == (1, 1)
    assert aux["prob"].shape == (1, num_outputs)
    assert state.shape == (4, NHPL)
    assert action in (2, 3)
    assert bool(jnp.all(jnp.isfinite(aux["prob"])))
    assert abs(float(jnp.sum(aux["prob"])) - 1.0) < 1e-2   # approx reciprocal in softmax

    print("KERNEL_OK")
</pallas_src>

<mosaic_0001>
module attributes {stable_mosaic.version = 11 : i64} {
  func.func @kernel(%arg0: memref<1764x3xf32, #tpu.memory_space<vmem>>, %arg1: memref<16x3x32xbf16, #tpu.memory_space<vmem>>, %arg2: memref<1x32xf32, #tpu.memory_space<vmem>>, %arg3: memref<16x32x64xbf16, #tpu.memory_space<vmem>>, %arg4: memref<1x64xf32, #tpu.memory_space<vmem>>, %arg5: memref<9x64x128xbf16, #tpu.memory_space<vmem>>, %arg6: memref<1x128xf32, #tpu.memory_space<vmem>>, %arg7: memref<4x128x256xbf16, #tpu.memory_space<vmem>>, %arg8: memref<1x256xf32, #tpu.memory_space<vmem>>, %arg9: memref<4x256x16xbf16, #tpu.memory_space<vmem>>, %arg10: memref<1x16xf32, #tpu.memory_space<vmem>>, %arg11: memref<32x64xf32, #tpu.memory_space<vmem>>, %arg12: memref<16x64xf32, #tpu.memory_space<vmem>>, %arg13: memref<1x64xf32, #tpu.memory_space<vmem>>, %arg14: memref<18x64xf32, #tpu.memory_space<vmem>>, %arg15: memref<16x64xf32, #tpu.memory_space<vmem>>, %arg16: memref<1x64xf32, #tpu.memory_space<vmem>>, %arg17: memref<16x1xf32, #tpu.memory_space<vmem>>, %arg18: memref<1x1xf32, #tpu.memory_space<vmem>>, %arg19: memref<16x2xf32, #tpu.memory_space<vmem>>, %arg20: memref<1x2xf32, #tpu.memory_space<vmem>>, %arg21: memref<4x16xf32, #tpu.memory_space<vmem>>, %arg22: memref<8x128xf32, #tpu.memory_space<vmem>>, %arg23: memref<400x32xf32, #tpu.memory_space<vmem>>, %arg24: memref<81x64xf32, #tpu.memory_space<vmem>>, %arg25: memref<16x128xf32, #tpu.memory_space<vmem>>, %arg26: memref<4x256xf32, #tpu.memory_space<vmem>>) attributes {dimension_semantics = [], scalar_prefetch = 0 : i64, scratch_operands = 4 : i64, tpu.core_type = #tpu.core_type<tc>} {
    %0 = tpu.iota {dimensions = array<i32: 0>} : vector<20x39xi32>
    %1 = tpu.iota {dimensions = array<i32: 1>} : vector<20x39xi32>
    %c2_i32 = arith.constant 2 : i32
    %2 = vector.broadcast %c2_i32 : i32 to vector<20x39xi32>
    %3 = arith.muli %2, %0 : vector<20x39xi32>
    %4 = arith.cmpi eq, %1, %3 : vector<20x39xi32>
    %5 = arith.extui %4 : vector<20x39xi1> to vector<20x39xi32>
    %6 = arith.sitofp %5 : vector<20x39xi32> to vector<20x39xf32>
    %c0 = arith.constant 0 : index
    %c0_0 = arith.constant 0 : index
    %7 = vector.load %arg2[%c0, %c0_0] : memref<1x32xf32, #tpu.memory_space<vmem>>, vector<1x32xf32>
    %c0_i32 = arith.constant 0 : i32
    %c20_i32 = arith.constant 20 : i32
    %8 = arith.addi %c0_i32, %c20_i32 : i32
    %c1_i32 = arith.constant 1 : i32
    scf.for %arg27 = %c0_i32 to %8 step %c1_i32  : i32 {
      %cst_377 = arith.constant 0.000000e+00 : f32
      %497 = vector.broadcast %cst_377 : f32 to vector<39x32xf32>
      %c2_i32_378 = arith.constant 2 : i32
      %498 = arith.muli %c2_i32_378, %arg27 : i32
      %c0_i32_379 = arith.constant 0 : i32
      %499 = arith.addi %498, %c0_i32_379 : i32
      %c42_i32 = arith.constant 42 : i32
      %500 = arith.muli %499, %c42_i32 : i32
      %c0_i32_380 = arith.constant 0 : i32
      %501 = arith.addi %500, %c0_i32_380 : i32
      %502 = arith.index_cast %501 : i32 to index
      %c0_381 = arith.constant 0 : index
      %503 = vector.load %arg0[%502, %c0_381] : memref<1764x3xf32, #tpu.memory_space<vmem>>, vector<39x3xf32>
      %504 = arith.truncf %503 : vector<39x3xf32> to vector<39x3xbf16>
      %c0_382 = arith.constant 0 : index
      %c0_383 = arith.constant 0 : index
      %c0_384 = arith.constant 0 : index
      %505 = vector.load %arg1[%c0_382, %c0_383, %c0_384] : memref<16x3x32xbf16, #tpu.memory_space<vmem>>, vector<1x3x32xbf16>
      %506 = vector.shape_cast %505 : vector<1x3x32xbf16> to vector<3x32xbf16>
      %cst_385 = arith.constant dense<0.000000e+00> : vector<39x32xf32>
      %507 = tpu.matmul %504, %506, %cst_385 {dimension_numbers = #tpu.dot_dimension_numbers<[1], [0], [0], [1], [0, 0, 1, 1], [], []>} : vector<39x3xbf16>, vector<3x32xbf16>, vector<39x32xf32> -> vector<39x32xf32>
      %508 = arith.addf %497, %507 : vector<39x32xf32>
      %c2_i32_386 = arith.constant 2 : i32
      %509 = arith.muli %c2_i32_386, %arg27 : i32
      %c0_i32_387 = arith.constant 0 : i32
      %510 = arith.addi %509, %c0_i32_387 : i32
      %c42_i32_388 = arith.constant 42 : i32
      %511 = arith.muli %510, %c42_i32_388 : i32
      %c1_i32_389 = arith.constant 1 : i32
      %512 = arith.addi %511, %c1_i32_389 : i32
      %513 = arith.index_cast %512 : i32 to index
      %c0_390 = arith.constant 0 : index
      %514 = vector.load %arg0[%513, %c0_390] : memref<1764x3xf32, #tpu.memory_space<vmem>>, vector<39x3xf32>
      %515 = arith.truncf %514 : vector<39x3xf32> to vector<39x3xbf16>
      %c1_391 = arith.constant 1 : index
      %c0_392 = arith.constant 0 : index
      %c0_393 = arith.constant 0 : index
      %516 = vector.load %arg1[%c1_391, %c0_392, %c0_393] : memref<16x3x32xbf16, #tpu.memory_space<vmem>>, vector<1x3x32xbf16>
      %517 = vector.shape_cast %516 : vector<1x3x32xbf16> to vector<3x32xbf16>
      %cst_394 = arith.constant dense<0.000000e+00> : vector<39x32xf32>
      %518 = tpu.matmul %515, %517, %cst_394 {dimension_numbers = #tpu.dot_dimension_numbers<[1], [0], [0], [1], [0, 0, 1, 1], [], []>} : vector<39x3xbf16>, vector<3x32xbf16>, vector<39x32xf32> -> vector<39x32xf32>
      %519 = arith.addf %508, %518 : vector<39x32xf32>
      %c2_i32_395 = arith.constant 2 : i32
      %520 = arith.muli %c2_i32_395, %arg27 : i32
      %c0_i32_396 = arith.constant 0 : i32
      %521 = arith.addi %520, %c0_i32_396 : i32
      %c42_i32_397 = arith.constant 42 : i32
      %522 = arith.muli %521, %c42_i32_397 : i32
      %c2_i32_398 = arith.constant 2 : i32
      %523 = arith.addi %522, %c2_i32_398 : i32
      %524 = arith.index_cast %523 : i32 to index
      %c0_399 = arith.constant 0 : index
      %525 = vector.load %arg0[%524, %c0_399] : memref<1764x3xf32, #tpu.memory_space<vmem>>, vector<39x3xf32>
      %526 = arith.truncf %525 : vector<39x3xf32> to vector<39x3xbf16>
      %c2_400 = arith.constant 2 : index
      %c0_401 = arith.constant 0 : index
      %c0_402 = arith.constant 0 : index
      %527 = vector.load %arg1[%c2_400, %c0_401, %c0_402] : memref<16x3x32xbf16, #tpu.memory_space<vmem>>, vector<1x3x32xbf16>
      %528 = vector.shape_cast %527 : vector<1x3x32xbf16> to vector<3x32xbf16>
      %cst_403 = arith.constant dense<0.000000e+00> : vector<39x32xf32>
      %529 = tpu.matmul %526, %528, %cst_403 {dimension_numbers = #tpu.dot_dimension_numbers<[1], [0], [0], [1], [0, 0, 1, 1], [], []>} : vector<39x3xbf16>, vector<3x32xbf16>, vector<39x32xf32> -> vector<39x32xf32>
      %530 = arith.addf %519, %529 : vector<39x32xf32>
      %c2_i32_404 = arith.constant 2 : i32
      %531 = arith.muli %c2_i32_404, %arg27 : i32
      %c0_i32_405 = arith.constant 0 : i32
      %532 = arith.addi %531, %c0_i32_405 : i32
      %c42_i32_406 = arith.constant 42 : i32
      %533 = arith.muli %532, %c42_i32_406 : i32
      %c3_i32 = arith.constant 3 : i32
      %534 = arith.addi %533, %c3_i32 : i32
      %535 = arith.index_cast %534 : i32 to index
      %c0_407 = arith.constant 0 : index
      %536 = vector.load %arg0[%535, %c0_407] : memref<1764x3xf32, #tpu.memory_space<vmem>>, vector<39x3xf32>
      %537 = arith.truncf %536 : vector<39x3xf32> to vector<39x3xbf16>
      %c3_408 = arith.constant 3 : index
      %c0_409 = arith.constant 0 : index
      %c0_410 = arith.constant 0 : index
      %538 = vector.load %arg1[%c3_408, %c0_409, %c0_410] : memref<16x3x32xbf16, #tpu.memory_space<vmem>>, vector<1x3x32xbf16>
      %539 = vector.shape_cast %538 : vector<1x3x32xbf16> to vector<3x32xbf16>
      %cst_411 = arith.constant dense<0.000000e+00> : vector<39x32xf32>
      %540 = tpu.matmul %537, %539, %cst_411 {dimension_numbers = #tpu.dot_dimension_numbers<[1], [0], [0], [1], [0, 0, 1, 1], [], []>} : vector<39x3xbf16>, vector<3x32xbf16>, vector<39x32xf32> -> vector<39x32xf32>
      %541 = arith.addf %530, %540 : vector<39x32xf32>
      %c2_i32_412 = arith.constant 2 : i32
      %542 = arith.muli %c2_i32_412, %arg27 : i32
      %c1_i32_413 = arith.constant 1 : i32
      %543 = arith.addi %542, %c1_i32_413 : i32
      %c42_i32_414 = arith.constant 42 : i32
      %544 = arith.muli %543, %c42_i32_414 : i32
      %c0_i32_415 = arith.constant 0 : i32
      %545 = arith.addi %544, %c0_i32_415 : i32
      %546 = arith.index_cast %545 : i32 to index
      %c0_416 = arith.constant 0 : index
      %547 = vector.load %arg0[%546, %c0_416] : memref<1764x3xf32, #tpu.memory_space<vmem>>, vector<39x3xf32>
      %548 = arith.truncf %547 : vector<39x3xf32> to vector<39x3xbf16>
      %c4_417 = arith.constant 4 : index
      %c0_418 = arith.constant 0 : index
      %c0_419 = arith.constant 0 : index
      %549 = vector.load %arg1[%c4_417, %c0_418, %c0_419] : memref<16x3x32xbf16, #tpu.memory_space<vmem>>, vector<1x3x32xbf16>
      %550 = vector.shape_cast %549 : vector<1x3x32xbf16> to vector<3x32xbf16>
      %cst_420 = arith.constant dense<0.000000e+00> : vector<39x32xf32>
      %551 = tpu.matmul %548, %550, %cst_420 {dimension_numbers = #tpu.dot_dimension_numbers<[1], [0], [0], [1], [0, 0, 1, 1], [], []>} : vector<39x3xbf16>, vector<3x32xbf16>, vector<39x32xf32> -> vector<39x32xf32>
      %552 = arith.addf %541, %551 : vector<39x32xf32>
      %c2_i32_421 = arith.constant 2 : i32
      %553 = arith.muli %c2_i32_421, %arg27 : i32
      %c1_i32_422 = arith.constant 1 : i32
      %554 = arith.addi %553, %c1_i32_422 : i32
      %c42_i32_423 = arith.constant 42 : i32
      %555 = arith.muli %554, %c42_i32_423 : i32
      %c1_i32_424 = arith.constant 1 : i32
      %556 = arith.addi %555, %c1_i32_424 : i32
      %557 = arith.index_cast %556 : i32 to index
      %c0_425 = arith.constant 0 : index
      %558 = vector.load %arg0[%557, %c0_425] : memref<1764x3xf32, #tpu.memory_space<vmem>>, vector<39x3xf32>
      %559 = arith.truncf %558 : vector<39x3xf32> to vector<39x3xbf16>
      %c5_426 = arith.constant 5 : index
      %c0_427 = arith.constant 0 : index
      %c0_428 = arith.constant 0 : index
      %560 = vector.load %arg1[%c5_426, %c0_427, %c0_428] : memref<16x3x32xbf16, #tpu.memory_space<vmem>>, vector<1x3x32xbf16>
      %561 = vector.shape_cast %560 : vector<1x3x32xbf16> to vector<3x32xbf16>
      %cst_429 = arith.constant dense<0.000000e+00> : vector<39x32xf32>
      %562 = tpu.matmul %559, %561, %cst_429 {dimension_numbers = #tpu.dot_dimension_numbers<[1], [0], [0], [1], [0, 0, 1, 1], [], []>} : vector<39x3xbf16>, vector<3x32xbf16>, vector<39x32xf32> -> vector<39x32xf32>
      %563 = arith.addf %552, %562 : vector<39x32xf32>
      %c2_i32_430 = arith.constant 2 : i32
      %564 = arith.muli %c2_i32_430, %arg27 : i32
      %c1_i32_431 = arith.constant 1 : i32
      %565 = arith.addi %564, %c1_i32_431 : i32
      %c42_i32_432 = arith.constant 42 : i32
      %566 = arith.muli %565, %c42_i32_432 : i32
      %c2_i32_433 = arith.constant 2 : i32
      %567 = arith.addi %566, %c2_i32_433 : i32
      %568 = arith.index_cast %567 : i32 to index
      %c0_434 = arith.constant 0 : index
      %569 = vector.load %arg0[%568, %c0_434] : memref<1764x3xf32, #tpu.memory_space<vmem>>, vector<39x3xf32>
      %570 = arith.truncf %569 : vector<39x3xf32> to vector<39x3xbf16>
      %c6_435 = arith.constant 6 : index
      %c0_436 = arith.constant 0 : index
      %c0_437 = arith.constant 0 : index
      %571 = vector.load %arg1[%c6_435, %c0_436, %c0_437] : memref<16x3x32xbf16, #tpu.memory_space<vmem>>, vector<1x3x32xbf16>
      %572 = vector.shape_cast %571 : vector<1x3x32xbf16> to vector<3x32xbf16>
      %cst_438 = arith.constant dense<0.000000e+00> : vector<39x32xf32>
      %573 = tpu.matmul %570, %572, %cst_438 {dimension_numbers = #tpu.dot_dimension_numbers<[1], [0], [0], [1], [0, 0, 1, 1], [], []>} : vector<39x3xbf16>, vector<3x32xbf16>, vector<39x32xf32> -> vector<39x32xf32>
      %574 = arith.addf %563, %573 : vector<39x32xf32>
      %c2_i32_439 = arith.constant 2 : i32
      %575 = arith.muli %c2_i32_439, %arg27 : i32
      %c1_i32_440 = arith.constant 1 : i32
      %576 = arith.addi %575, %c1_i32_440 : i32
      %c42_i32_441 = arith.constant 42 : i32
      %577 = arith.muli %576, %c42_i32_441 : i32
      %c3_i32_442 = arith.constant 3 : i32
      %578 = arith.addi %577, %c3_i32_442 : i32
      %579 = arith.index_cast %578 : i32 to index
      %c0_443 = arith.constant 0 : index
      %580 = vector.load %arg0[%579, %c0_443] : memref<1764x3xf32, #tpu.memory_space<vmem>>, vector<39x3xf32>
      %581 = arith.truncf %580 : vector<39x3xf32> to vector<39x3xbf16>
      %c7_444 = arith.constant 7 : index
      %c0_445 = arith.constant 0 : index
      %c0_446 = arith.constant 0 : index
      %582 = vector.load %arg1[%c7_444, %c0_445, %c0_446] : memref<16x3x32xbf16, #tpu.memory_space<vmem>>, vector<1x3x32xbf16>
      %583 = vector.shape_cast %582 : vector<1x3x32xbf16> to vector<3x32xbf16>
      %cst_447 = arith.constant dense<0.000000e+00> : vector<39x32xf32>
      %584 = tpu.matmul %581, %583, %cst_447 {dimension_numbers = #tpu.dot_dimension_numbers<[1], [0], [0], [1], [0, 0, 1, 1], [], []>} : vector<39x3xbf16>, vector<3x32xbf16>, vector<39x32xf32> -> vector<39x32xf32>
      %585 = arith.addf %574, %584 : vector<39x32xf32>
      %c2_i32_448 = arith.constant 2 : i32
      %586 = arith.muli %c2_i32_448, %arg27 : i32
      %c2_i32_449 = arith.constant 2 : i32
      %587 = arith.addi %586, %c2_i32_449 : i32
      %c42_i32_450 = arith.constant 42 : i32
      %588 = arith.muli %587, %c42_i32_450 : i32
      %c0_i32_451 = arith.constant 0 : i32
      %589 = arith.addi %588, %c0_i32_451 : i32
      %590 = arith.index_cast %589 : i32 to index
      %c0_452 = arith.constant 0 : index
      %591 = vector.load %arg0[%590, %c0_452] : memref<1764x3xf32, #tpu.memory_space<vmem>>, vector<39x3xf32>
      %592 = arith.truncf %591 : vector<39x3xf32> to vector<39x3xbf16>
      %c8_453 = arith.constant 8 : index
      %c0_454 = arith.constant 0 : index
      %c0_455 = arith.constant 0 : index
      %593 = vector.load %arg1[%c8_453, %c0_454, %c0_455] : memref<16x3x32xbf16, #tpu.memory_space<vmem>>, vector<1x3x32xbf16>
      %594 = vector.shape_cast %593 : vector<1x3x32xbf16> to vector<3x32xbf16>
      %cst_456 = arith.constant dense<0.000000e+00> : vector<39x32xf32>
      %595 = tpu.matmul %592, %594, %cst_456 {dimension_numbers = #tpu.dot_dimension_numbers<[1], [0], [0], [1], [0, 0, 1, 1], [], []>} : vector<39x3xbf16>, vector<3x32xbf16>, vector<39x32xf32> -> vector<39x32xf32>
      %596 = arith.addf %585, %595 : vector<39x32xf32>
      %c2_i32_457 = arith.constant 2 : i32
      %597 = arith.muli %c2_i32_457, %arg27 : i32
      %c2_i32_458 = arith.constant 2 : i32
      %598 = arith.addi %597, %c2_i32_458 : i32
      %c42_i32_459 = arith.constant 42 : i32
      %599 = arith.muli %598, %c42_i32_459 : i32
      %c1_i32_460 = arith.constant 1 : i32
      %600 = arith.addi %599, %c1_i32_460 : i32
      %601 = arith.index_cast %600 : i32 to index
      %c0_461 = arith.constant 0 : index
      %602 = vector.load %arg0[%601, %c0_461] : memref<1764x3xf32, #tpu.memory_space<vmem>>, vector<39x3xf32>
      %603 = arith.truncf %602 : vector<39x3xf32> to vector<39x3xbf16>
      %c9_462 = arith.constant 9 : index
      %c0_463 = arith.constant 0 : index
      %c0_464 = arith.constant 0 : index
      %604 = vector.load %arg1[%c9_462, %c0_463, %c0_464] : memref<16x3x32xbf16, #tpu.memory_space<vmem>>, vector<1x3x32xbf16>
      %605 = vector.shape_cast %604 : vector<1x3x32xbf16> to vector<3x32xbf16>
      %cst_465 = arith.constant dense<0.000000e+00> : vector<39x32xf32>
      %606 = tpu.matmul %603, %605, %cst_465 {dimension_numbers = #tpu.dot_dimension_numbers<[1], [0], [0], [1], [0, 0, 1, 1], [], []>} : vector<39x3xbf16>, vector<3x32xbf16>, vector<39x32xf32> -> vector<39x32xf32>
      %607 = arith.addf %596, %606 : vector<39x32xf32>
      %c2_i32_466 = arith.constant 2 : i32
      %608 = arith.muli %c2_i32_466, %arg27 : i32
      %c2_i32_467 = arith.constant 2 : i32
      %609 = arith.addi %608, %c2_i32_467 : i32
      %c42_i32_468 = arith.constant 42 : i32
      %610 = arith.muli %609, %c42_i32_468 : i32
      %c2_i32_469 = arith.constant 2 : i32
      %611 = arith.addi %610, %c2_i32_469 : i32
      %612 = arith.index_cast %611 : i32 to index
      %c0_470 = arith.constant 0 : index
      %613 = vector.load %arg0[%612, %c0_470] : memref<1764x3xf32, #tpu.memory_space<vmem>>, vector<39x3xf32>
      %614 = arith.truncf %613 : vector<39x3xf32> to vector<39x3xbf16>
      %c10_471 = arith.constant 10 : index
      %c0_472 = arith.constant 0 : index
      %c0_473 = arith.constant 0 : index
      %615 = vector.load %arg1[%c10_471, %c0_472, %c0_473] : memref<16x3x32xbf16, #tpu.memory_space<vmem>>, vector<1x3x32xbf16>
      %616 = vector.shape_cast %615 : vector<1x3x32xbf16> to vector<3x32xbf16>
      %cst_474 = arith.constant dense<0.000000e+00> : vector<39x32xf32>
      %617 = tpu.matmul %614, %616, %cst_474 {dimension_numbers = #tpu.dot_dimension_numbers<[1], [0], [0], [1], [0, 0, 1, 1], [], []>} : vector<39x3xbf16>, vector<3x32xbf16>, vector<39x32xf32> -> vector<39x32xf32>
      %618 = arith.addf %607, %617 : vector<39x32xf32>
      %c2_i32_475 = arith.constant 2 : i32
      %619 = arith.muli %c2_i32_475, %arg27 : i32
      %c2_i32_476 = arith.constant 2 : i32
      %620 = arith.addi %619, %c2_i32_476 : i32
      %c42_i32_477 = arith.constant 42 : i32
      %621 = arith.muli %620, %c42_i32_477 : i32
      %c3_i32_478 = arith.constant 3 : i32
      %622 = arith.addi %621, %c3_i32_478 : i32
      %623 = arith.index_cast %622 : i32 to index
      %c0_479 = arith.constant 0 : index
      %624 = vector.load %arg0[%623, %c0_479] : memref<1764x3xf32, #tpu.memory_space<vmem>>, vector<39x3xf32>
      %625 = arith.truncf %624 : vector<39x3xf32> to vector<39x3xbf16>
      %c11_480 = arith.constant 11 : index
      %c0_481 = arith.constant 0 : index
      %c0_482 = arith.constant 0 : index
      %626 = vector.load %arg1[%c11_480, %c0_481, %c0_482] : memref<16x3x32xbf16, #tpu.memory_space<vmem>>, vector<1x3x32xbf16>
      %627 = vector.shape_cast %626 : vector<1x3x32xbf16> to vector<3x32xbf16>
      %cst_483 = arith.constant dense<0.000000e+00> : vector<39x32xf32>
      %628 = tpu.matmul %625, %627, %cst_483 {dimension_numbers = #tpu.dot_dimension_numbers<[1], [0], [0], [1], [0, 0, 1, 1], [], []>} : vector<39x3xbf16>, vector<3x32xbf16>, vector<39x32xf32> -> vector<39x32xf32>
      %629 = arith.addf %618, %628 : vector<39x32xf32>
      %c2_i32_484 = arith.constant 2 : i32
      %630 = arith.muli %c2_i32_484, %arg27 : i32
      %c3_i32_485 = arith.constant 3 : i32
      %631 = arith.addi %630, %c3_i32_485 : i32
      %c42_i32_486 = arith.constant 42 : i32
      %632 = arith.muli %631, %c42_i32_486 : i32
      %c0_i32_487 = arith.constant 0 : i32
      %633 = arith.addi %632, %c0_i32_487 : i32
      %634 = arith.index_cast %633 : i32 to index
      %c0_488 = arith.constant 0 : index
      %635 = vector.load %arg0[%634, %c0_488] : memref<1764x3xf32, #tpu.memory_space<vmem>>, vector<39x3xf32>
      %636 = arith.truncf %635 : vector<39x3xf32> to vector<39x3xbf16>
      %c12_489 = arith.constant 12 : index
      %c0_490 = arith.constant 0 : index
      %c0_491 = arith.constant 0 : index
      %637 = vector.load %arg1[%c12_489, %c0_490, %c0_491] : memref<16x3x32xbf16, #tpu.memory_space<vmem>>, vector<1x3x32xbf16>
      %638 = vector.shape_cast %637 : vector<1x3x32xbf16> to vector<3x32xbf16>
      %cst_492 = arith.constant dense<0.000000e+00> : vector<39x32xf32>
      %639 = tpu.matmul %636, %638, %cst_492 {dimension_numbers = #tpu.dot_dimension_numbers<[1], [0], [0], [1], [0, 0, 1, 1], [], []>} : vector<39x3xbf16>, vector<3x32xbf16>, vector<39x32xf32> -> vector<39x32xf32>
      %640 = arith.addf %629, %639 : vector<39x32xf32>
      %c2_i32_493 = arith.constant 2 : i32
      %641 = arith.muli %c2_i32_493, %arg27 : i32
      %c3_i32_494 = arith.constant 3 : i32
      %642 = arith.addi %641, %c3_i32_494 : i32
      %c42_i32_495 = arith.constant 42 : i32
      %643 = arith.muli %642, %c42_i32_495 : i32
      %c1_i32_496 = arith.constant 1 : i32
      %644 = arith.addi %643, %c1_i32_496 : i32
      %645 = arith.index_cast %644 : i32 to index
      %c0_497 = arith.constant 0 : index
      %646 = vector.load %arg0[%645, %c0_497] : memref<1764x3xf32, #tpu.memory_space<vmem>>, vector<39x3xf32>
      %647 = arith.truncf %646 : vector<39x3xf32> to vector<39x3xbf16>
      %c13_498 = arith.constant 13 : index
      %c0_499 = arith.constant 0 : index
      %c0_500 = arith.constant 0 : index
      %648 = vector.load %arg1[%c13_498, %c0_499, %c0_500] : memref<16x3x32xbf16, #tpu.memory_space<vmem>>, vector<1x3x32xbf16>
      %649 = vector.shape_cast %648 : vector<1x3x32xbf16> to vector<3x32xbf16>
      %cst_501 = arith.constant dense<0.000000e+00> : vector<39x32xf32>
      %650 = tpu.matmul %647, %649, %cst_501 {dimension_numbers = #tpu.dot_dimension_numbers<[1], [0], [0], [1], [0, 0, 1, 1], [], []>} : vector<39x3xbf16>, vector<3x32xbf16>, vector<39x32xf32> -> vector<39x32xf32>
      %651 = arith.addf %640, %650 : vector<39x32xf32>
      %c2_i32_502 = arith.constant 2 : i32
      %652 = arith.muli %c2_i32_502, %arg27 : i32
      %c3_i32_503 = arith.constant 3 : i32
      %653 = arith.addi %652, %c3_i32_503 : i32
      %c42_i32_504 = arith.constant 42 : i32
      %654 = arith.muli %653, %c42_i32_504 : i32
      %c2_i32_505 = arith.constant 2 : i32
      %655 = arith.addi %654, %c2_i32_505 : i32
      %656 = arith.index_cast %655 : i32 to index
      %c0_506 = arith.constant 0 : index
      %657 = vector.load %arg0[%656, %c0_506] : memref<1764x3xf32, #tpu.memory_space<vmem>>, vector<39x3xf32>
      %658 = arith.truncf %657 : vector<39x3xf32> to vector<39x3xbf16>
      %c14 = arith.constant 14 : index
      %c0_507 = arith.constant 0 : index
      %c0_508 = arith.constant 0 : index
      %659 = vector.load %arg1[%c14, %c0_507, %c0_508] : memref<16x3x32xbf16, #tpu.memory_space<vmem>>, vector<1x3x32xbf16>
      %660 = vector.shape_cast %659 : vector<1x3x32xbf16> to vector<3x32xbf16>
      %cst_509 = arith.constant dense<0.000000e+00> : vector<39x32xf32>
      %661 = tpu.matmul %658, %660, %cst_509 {dimension_numbers = #tpu.dot_dimension_numbers<[1], [0], [0], [1], [0, 0, 1, 1], [], []>} : vector<39x3xbf16>, vector<3x32xbf16>, vector<39x32xf32> -> vector<39x32xf32>
      %662 = arith.addf %651, %661 : vector<39x32xf32>
      %c2_i32_510 = arith.constant 2 : i32
      %663 = arith.muli %c2_i32_510, %arg27 : i32
      %c3_i32_511 = arith.constant 3 : i32
      %664 = arith.addi %663, %c3_i32_511 : i32
      %c42_i32_512 = arith.constant 42 : i32
      %665 = arith.muli %664, %c42_i32_512 : i32
      %c3_i32_513 = arith.constant 3 : i32
      %666 = arith.addi %665, %c3_i32_513 : i32
      %667 = arith.index_cast %666 : i32 to index
      %c0_514 = arith.constant 0 : index
      %668 = vector.load %arg0[%667, %c0_514] : memref<1764x3xf32, #tpu.memory_space<vmem>>, vector<39x3xf32>
      %669 = arith.truncf %668 : vector<39x3xf32> to vector<39x3xbf16>
      %c15 = arith.constant 15 : index
      %c0_515 = arith.constant 0 : index
      %c0_516 = arith.constant 0 : index
      %670 = vector.load %arg1[%c15, %c0_515, %c0_516] : memref<16x3x32xbf16, #tpu.memory_space<vmem>>, vector<1x3x32xbf16>
      %671 = vector.shape_cast %670 : vector<1x3x32xbf16> to vector<3x32xbf16>
      %cst_517 = arith.constant dense<0.000000e+00> : vector<39x32xf32>
      %672 = tpu.matmul %669, %671, %cst_517 {dimension_numbers = #tpu.dot_dimension_numbers<[1], [0], [0], [1], [0, 0, 1, 1], [], []>} : vector<39x3xbf16>, vector<3x32xbf16>, vector<39x32xf32> -> vector<39x32xf32>
      %673 = arith.addf %662, %672 : vector<39x32xf32>
      %cst_518 = arith.constant dense<0.000000e+00> : vector<20x32xf32>
      %674 = tpu.matmul %6, %673, %cst_518 {dimension_numbers = #tpu.dot_dimension_numbers<[1], [0], [0], [1], [0, 0, 1, 1], [], []>} : vector<20x39xf32>, vector<39x32xf32>, vector<20x32xf32> -> vector<20x32xf32>
      %675 = vector.broadcast %7 : vector<1x32xf32> to vector<20x32xf32>
      %676 = arith.addf %674, %675 : vector<20x32xf32>
      %cst_519 = arith.constant 0.000000e+00 : f32
      %677 = vector.broadcast %cst_519 : f32 to vector<20x32xf32>
      %678 = arith.maximumf %676, %677 : vector<20x32xf32>
      %c20_i32_520 = arith.constant 20 : i32
      %679 = arith.muli %arg27, %c20_i32_520 : i32
      %680 = arith.index_cast %679 : i32 to index
      %c0_521 = arith.constant 0 : index
      %681 = vector.load %arg23[%680, %c0_521] : memref<400x32xf32, #tpu.memory_space<vmem>>, vector<20x32xf32>
      tpu.vector_store %arg23[%680, %c0_521], %678 {strides = array<i32>} : memref<400x32xf32, #tpu.memory_space<vmem>>, vector<20x32xf32>,
    }
    %c20_i32_1 = arith.constant 20 : i32
    %9 = tpu.iota {dimensions = array<i32: 0>} : vector<9x17xi32>
    %10 = tpu.iota {dimensions = array<i32: 1>} : vector<9x17xi32>
    %c2_i32_2 = arith.constant 2 : i32
    %11 = vector.broadcast %c2_i32_2 : i32 to vector<9x17xi32>
    %12 = arith.muli %11, %9 : vector<9x17xi32>
    %13 = arith.cmpi eq, %10, %12 : vector<9x17xi32>
    %14 = arith.extui %13 : vector<9x17xi1> to vector<9x17xi32>
    %15 = arith.sitofp %14 : vector<9x17xi32> to vector<9x17xf32>
    %c0_3 = arith.constant 0 : index
    %c0_4 = arith.constant 0 : index
    %16 = vector.load %arg4[%c0_3, %c0_4] : memref<1x64xf32, #tpu.memory_space<vmem>>, vector<1x64xf32>
    %c0_i32_5 = arith.constant 0 : i32
    %c9_i32 = arith.constant 9 : i32
    %17 = arith.addi %c0_i32_5, %c9_i32 : i32
    %c1_i32_6 = arith.constant 1 : i32
    scf.for %arg27 = %c0_i32_5 to %17 step %c1_i32_6  : i32 {
      %cst_377 = arith.constant 0.000000e+00 : f32
      %497 = vector.broadcast %cst_377 : f32 to vector<17x64xf32>
      %c2_i32_378 = arith.constant 2 : i32
      %498 = arith.muli %c2_i32_378, %arg27 : i32
      %c0_i32_379 = arith.constant 0 : i32
      %499 = arith.addi %498, %c0_i32_379 : i32
      %c20_i32_380 = arith.constant 20 : i32
      %500 = arith.muli %499, %c20_i32_380 : i32
      %c0_i32_381 = arith.constant 0 : i32
      %501 = arith.addi %500, %c0_i32_381 : i32
      %502 = arith.index_cast %501 : i32 to index
      %c0_382 = arith.constant 0 : index
      %503 = vector.load %arg23[%502, %c0_382] : memref<400x32xf32, #tpu.memory_space<vmem>>, vector<17x32xf32>
      %504 = arith.truncf %503 : vector<17x32xf32> to vector<17x32xbf16>
      %c0_383 = arith.constant 0 : index
      %c0_384 = arith.constant 0 : index
      %c0_385 = arith.constant 0 : index
      %505 = vector.load %arg3[%c0_383, %c0_384, %c0_385] : memref<16x32x64xbf16, #tpu.memory_space<vmem>>, vector<1x32x64xbf16>
      %506 = vector.shape_cast %505 : vector<1x32x64xbf16> to vector<32x64xbf16>
      %cst_386 = arith.constant dense<0.000000e+00> : vector<17x64xf32>
      %507 = tpu.matmul %504, %506, %cst_386 {dimension_numbers = #tpu.dot_dimension_numbers<[1], [0], [0], [1], [0, 0, 1, 1], [], []>} : vector<17x32xbf16>, vector<32x64xbf16>, vector<17x64xf32> -> vector<17x64xf32>
      %508 = arith.addf %497, %507 : vector<17x64xf32>
      %c2_i32_387 = arith.constant 2 : i32
      %509 = arith.muli %c2_i32_387, %arg27 : i32
      %c0_i32_388 = arith.constant 0 : i32
      %510 = arith.addi %509, %c0_i32_388 : i32
      %c20_i32_389 = arith.constant 20 : i32
      %511 = arith.muli %510, %c20_i32_389 : i32
      %c1_i32_390 = arith.constant 1 : i32
      %512 = arith.addi %511, %c1_i32_390 : i32
      %513 = arith.index_cast %512 : i32 to index
      %c0_391 = arith.constant 0 : index
      %514 = vector.load %arg23[%513, %c0_391] : memref<400x32xf32, #tpu.memory_space<vmem>>, vector<17x32xf32>
      %515 = arith.truncf %514 : vector<17x32xf32> to vector<17x32xbf16>
      %c1_392 = arith.constant 1 : index
      %c0_393 = arith.constant 0 : index
      %c0_394 = arith.constant 0 : index
      %516 = vector.load %arg3[%c1_392, %c0_393, %c0_394] : memref<16x32x64xbf16, #tpu.memory_space<vmem>>, vector<1x32x64xbf16>
      %517 = vector.shape_cast %516 : vector<1x32x64xbf16> to vector<32x64xbf16>
      %cst_395 = arith.constant dense<0.000000e+00> : vector<17x64xf32>
      %518 = tpu.matmul %515, %517, %cst_395 {dimension_numbers = #tpu.dot_dimension_numbers<[1], [0], [0], [1], [0, 0, 1, 1], [], []>} : vector<17x32xbf16>, vector<32x64xbf16>, vector<17x64xf32> -> vector<17x64xf32>
      %519 = arith.addf %508, %518 : vector<17x64xf32>
      %c2_i32_396 = arith.constant 2 : i32
      %520 = arith.muli %c2_i32_396, %arg27 : i32
      %c0_i32_397 = arith.constant 0 : i32
      %521 = arith.addi %520, %c0_i32_397 : i32
      %c20_i32_398 = arith.constant 20 : i32
      %522 = arith.muli %521, %c20_i32_398 : i32
      %c2_i32_399 = arith.constant 2 : i32
      %523 = arith.addi %522, %c2_i32_399 : i32
      %524 = arith.index_cast %523 : i32 to index
      %c0_400 = arith.constant 0 : index
      %525 = vector.load %arg23[%524, %c0_400] : memref<400x32xf32, #tpu.memory_space<vmem>>, vector<17x32xf32>
      %526 = arith.truncf %525 : vector<17x32xf32> to vector<17x32xbf16>
      %c2_401 = arith.constant 2 : index
      %c0_402 = arith.constant 0 : index
      %c0_403 = arith.constant 0 : index
      %527 = vector.load %arg3[%c2_401, %c0_402, %c0_403] : memref<16x32x64xbf16, #tpu.memory_space<vmem>>, vector<1x32x64xbf16>
      %528 = vector.shape_cast %527 : vector<1x32x64xbf16> to vector<32x64xbf16>
      %cst_404 = arith.constant dense<0.000000e+00> : vector<17x64xf32>
      %529 = tpu.matmul %526, %528, %cst_404 {dimension_numbers = #tpu.dot_dimension_numbers<[1], [0], [0], [1], [0, 0, 1, 1], [], []>} : vector<17x32xbf16>, vector<32x64xbf16>, vector<17x64xf32> -> vector<17x64xf32>
      %530 = arith.addf %519, %529 : vector<17x64xf32>
      %c2_i32_405 = arith.constant 2 : i32
      %531 = arith.muli %c2_i32_405, %arg27 : i32
      %c0_i32_406 = arith.constant 0 : i32
      %532 = arith.addi %531, %c0_i32_406 : i32
      %c20_i32_407 = arith.constant 20 : i32
      %533 = arith.muli %532, %c20_i32_407 : i32
      %c3_i32 = arith.constant 3 : i32
      %534 = arith.addi %533, %c3_i32 : i32
      %535 = arith.index_cast %534 : i32 to index
      %c0_408 = arith.constant 0 : index
      %536 = vector.load %arg23[%535, %c0_408] : memref<400x32xf32, #tpu.memory_space<vmem>>, vector<17x32xf32>
      %537 = arith.truncf %536 : vector<17x32xf32> to vector<17x32xbf16>
      %c3_409 = arith.constant 3 : index
      %c0_410 = arith.constant 0 : index
      %c0_411 = arith.constant 0 : index
      %538 = vector.load %arg3[%c3_409, %c0_410, %c0_411] : memref<16x32x64xbf16, #tpu.memory_space<vmem>>, vector<1x32x64xbf16>
      %539 = vector.shape_cast %538 : vector<1x32x64xbf16> to vector<32x64xbf16>
      %cst_412 = arith.constant dense<0.000000e+00> : vector<17x64xf32>
      %540 = tpu.matmul %537, %539, %cst_412 {dimension_numbers = #tpu.dot_dimension_numbers<[1], [0], [0], [1], [0, 0, 1, 1], [], []>} : vector<17x32xbf16>, vector<32x64xbf16>, vector<17x64xf32> -> vector<17x64xf32>
      %541 = arith.addf %530, %540 : vector<17x64xf32>
      %c2_i32_413 = arith.constant 2 : i32
      %542 = arith.muli %c2_i32_413, %arg27 : i32
      %c1_i32_414 = arith.constant 1 : i32
      %543 = arith.addi %542, %c1_i32_414 : i32
      %c20_i32_415 = arith.constant 20 : i32
      %544 = arith.muli %543, %c20_i32_415 : i32
      %c0_i32_416 = arith.constant 0 : i32
      %545 = arith.addi %544, %c0_i32_416 : i32
      %546 = arith.index_cast %545 : i32 to index
      %c0_417 = arith.constant 0 : index
      %547 = vector.load %arg23[%546, %c0_417] : memref<400x32xf32, #tpu.memory_space<vmem>>, vector<17x32xf32>
      %548 = arith.truncf %547 : vector<17x32xf32> to vector<17x32xbf16>
      %c4_418 = arith.constant 4 : index
      %c0_419 = arith.constant 0 : index
      %c0_420 = arith.constant 0 : index
      %549 = vector.load %arg3[%c4_418, %c0_419, %c0_420] : memref<16x32x64xbf16, #tpu.memory_space<vmem>>, vector<1x32x64xbf16>
      %550 = vector.shape_cast %549 : vector<1x32x64xbf16> to vector<32x64xbf16>
      %cst_421 = arith.constant dense<0.000000e+00> : vector<17x64xf32>
      %551 = tpu.matmul %548, %550, %cst_421 {dimension_numbers = #tpu.dot_dimension_numbers<[1], [0], [0], [1], [0, 0, 1, 1], [], []>} : vector<17x32xbf16>, vector<32x64xbf16>, vector<17x64xf32> -> vector<17x64xf32>
      %552 = arith.addf %541, %551 : vector<17x64xf32>
      %c2_i32_422 = arith.constant 2 : i32
      %553 = arith.muli %c2_i32_422, %arg27 : i32
      %c1_i32_423 = arith.constant 1 : i32
      %554 = arith.addi %553, %c1_i32_423 : i32
      %c20_i32_424 = arith.constant 20 : i32
      %555 = arith.muli %554, %c20_i32_424 : i32
      %c1_i32_425 = arith.constant 1 : i32
      %556 = arith.addi %555, %c1_i32_425 : i32
      %557 = arith.index_cast %556 : i32 to index
      %c0_426 = arith.constant 0 : index
      %558 = vector.load %arg23[%557, %c0_426] : memref<400x32xf32, #tpu.memory_space<vmem>>, vector<17x32xf32>
      %559 = arith.truncf %558 : vector<17x32xf32> to vector<17x32xbf16>
      %c5_427 = arith.constant 5 : index
      %c0_428 = arith.constant 0 : index
      %c0_429 = arith.constant 0 : index
      %560 = vector.load %arg3[%c5_427, %c0_428, %c0_429] : memref<16x32x64xbf16, #tpu.memory_space<vmem>>, vector<1x32x64xbf16>
      %561 = vector.shape_cast %560 : vector<1x32x64xbf16> to vector<32x64xbf16>
      %cst_430 = arith.constant dense<0.000000e+00> : vector<17x64xf32>
      %562 = tpu.matmul %559, %561, %cst_430 {dimension_numbers = #tpu.dot_dimension_numbers<[1], [0], [0], [1], [0, 0, 1, 1], [], []>} : vector<17x32xbf16>, vector<32x64xbf16>, vector<17x64xf32> -> vector<17x64xf32>
      %563 = arith.addf %552, %562 : vector<17x64xf32>
      %c2_i32_431 = arith.constant 2 : i32
      %564 = arith.muli %c2_i32_431, %arg27 : i32
      %c1_i32_432 = arith.constant 1 : i32
      %565 = arith.addi %564, %c1_i32_432 : i32
      %c20_i32_433 = arith.constant 20 : i32
      %566 = arith.muli %565, %c20_i32_433 : i32
      %c2_i32_434 = arith.constant 2 : i32
      %567 = arith.addi %566, %c2_i32_434 : i32
      %568 = arith.index_cast %567 : i32 to index
      %c0_435 = arith.constant 0 : index
      %569 = vector.load %arg23[%568, %c0_435] : memref<400x32xf32, #tpu.memory_space<vmem>>, vector<17x32xf32>
      %570 = arith.truncf %569 : vector<17x32xf32> to vector<17x32xbf16>
      %c6_436 = arith.constant 6 : index
      %c0_437 = arith.constant 0 : index
      %c0_438 = arith.constant 0 : index
      %571 = vector.load %arg3[%c6_436, %c0_437, %c0_438] : memref<16x32x64xbf16, #tpu.memory_space<vmem>>, vector<1x32x64xbf16>
      %572 = vector.shape_cast %571 : vector<1x32x64xbf16> to vector<32x64xbf16>
      %cst_439 = arith.constant dense<0.000000e+00> : vector<17x64xf32>
      %573 = tpu.matmul %570, %572, %cst_439 {dimension_numbers = #tpu.dot_dimension_numbers<[1], [0], [0], [1], [0, 0, 1, 1], [], []>} : vector<17x32xbf16>, vector<32x64xbf16>, vector<17x64xf32> -> vector<17x64xf32>
      %574 = arith.addf %563, %573 : vector<17x64xf32>
      %c2_i32_440 = arith.constant 2 : i32
      %575 = arith.muli %c2_i32_440, %arg27 : i32
      %c1_i32_441 = arith.constant 1 : i32
      %576 = arith.addi %575, %c1_i32_441 : i32
      %c20_i32_442 = arith.constant 20 : i32
      %577 = arith.muli %576, %c20_i32_442 : i32
      %c3_i32_443 = arith.constant 3 : i32
      %578 = arith.addi %577, %c3_i32_443 : i32
      %579 = arith.index_cast %578 : i32 to index
      %c0_444 = arith.constant 0 : index
      %580 = vector.load %arg23[%579, %c0_444] : memref<400x32xf32, #tpu.memory_space<vmem>>, vector<17x32xf32>
      %581 = arith.truncf %580 : vector<17x32xf32> to vector<17x32xbf16>
      %c7_445 = arith.constant 7 : index
      %c0_446 = arith.constant 0 : index
      %c0_447 = arith.constant 0 : index
      %582 = vector.load %arg3[%c7_445, %c0_446, %c0_447] : memref<16x32x64xbf16, #tpu.memory_space<vmem>>, vector<1x32x64xbf16>
      %583 = vector.shape_cast %582 : vector<1x32x64xbf16> to vector<32x64xbf16>
      %cst_448 = arith.constant dense<0.000000e+00> : vector<17x64xf32>
      %584 = tpu.matmul %581, %583, %cst_448 {dimension_numbers = #tpu.dot_dimension_numbers<[1], [0], [0], [1], [0, 0, 1, 1], [], []>} : vector<17x32xbf16>, vector<32x64xbf16>, vector<17x64xf32> -> vector<17x64xf32>
      %585 = arith.addf %574, %584 : vector<17x64xf32>
      %c2_i32_449 = arith.constant 2 : i32
      %586 = arith.muli %c2_i32_449, %arg27 : i32
      %c2_i32_450 = arith.constant 2 : i32
      %587 = arith.addi %586, %c2_i32_450 : i32
      %c20_i32_451 = arith.constant 20 : i32
      %588 = arith.muli %587, %c20_i32_451 : i32
      %c0_i32_452 = arith.constant 0 : i32
      %589 = arith.addi %588, %c0_i32_452 : i32
      %590 = arith.index_cast %589 : i32 to index
      %c0_453 = arith.constant 0 : index
      %591 = vector.load %arg23[%590, %c0_453] : memref<400x32xf32, #tpu.memory_space<vmem>>, vector<17x32xf32>
      %592 = arith.truncf %591 : vector<17x32xf32> to vector<17x32xbf16>
      %c8_454 = arith.constant 8 : index
      %c0_455 = arith.constant 0 : index
      %c0_456 = arith.constant 0 : index
      %593 = vector.load %arg3[%c8_454, %c0_455, %c0_456] : memref<16x32x64xbf16, #tpu.memory_space<vmem>>, vector<1x32x64xbf16>
      %594 = vector.shape_cast %593 : vector<1x32x64xbf16> to vector<32x64xbf16>
      %cst_457 = arith.constant dense<0.000000e+00> : vector<17x64xf32>
      %595 = tpu.matmul %592, %594, %cst_457 {dimension_numbers = #tpu.dot_dimension_numbers<[1], [0], [0], [1], [0, 0, 1, 1], [], []>} : vector<17x32xbf16>, vector<32x64xbf16>, vector<17x64xf32> -> vector<17x64xf32>
      %596 = arith.addf %585, %595 : vector<17x64xf32>
      %c2_i32_458 = arith.constant 2 : i32
      %597 = arith.muli %c2_i32_458, %arg27 : i32
      %c2_i32_459 = arith.constant 2 : i32
      %598 = arith.addi %597, %c2_i32_459 : i32
      %c20_i32_460 = arith.constant 20 : i32
      %599 = arith.muli %598, %c20_i32_460 : i32
      %c1_i32_461 = arith.constant 1 : i32
      %600 = arith.addi %599, %c1_i32_461 : i32
      %601 = arith.index_cast %600 : i32 to index
      %c0_462 = arith.constant 0 : index
      %602 = vector.load %arg23[%601, %c0_462] : memref<400x32xf32, #tpu.memory_space<vmem>>, vector<17x32xf32>
      %603 = arith.truncf %602 : vector<17x32xf32> to vector<17x32xbf16>
      %c9_463 = arith.constant 9 : index
      %c0_464 = arith.constant 0 : index
      %c0_465 = arith.constant 0 : index
      %604 = vector.load %arg3[%c9_463, %c0_464, %c0_465] : memref<16x32x64xbf16, #tpu.memory_space<vmem>>, vector<1x32x64xbf16>
      %605 = vector.shape_cast %604 : vector<1x32x64xbf16> to vector<32x64xbf16>
      %cst_466 = arith.constant dense<0.000000e+00> : vector<17x64xf32>
      %606 = tpu.matmul %603, %605, %cst_466 {dimension_numbers = #tpu.dot_dimension_numbers<[1], [0], [0], [1], [0, 0, 1, 1], [], []>} : vector<17x32xbf16>, vector<32x64xbf16>, vector<17x64xf32> -> vector<17x64xf32>
      %607 = arith.addf %596, %606 : vector<17x64xf32>
      %c2_i32_467 = arith.constant 2 : i32
      %608 = arith.muli %c2_i32_467, %arg27 : i32
      %c2_i32_468 = arith.constant 2 : i32
      %609 = arith.addi %608, %c2_i32_468 : i32
      %c20_i32_469 = arith.constant 20 : i32
      %610 = arith.muli %609, %c20_i32_469 : i32
      %c2_i32_470 = arith.constant 2 : i32
      %611 = arith.addi %610, %c2_i32_470 : i32
      %612 = arith.index_cast %611 : i32 to index
      %c0_471 = arith.constant 0 : index
      %613 = vector.load %arg23[%612, %c0_471] : memref<400x32xf32, #tpu.memory_space<vmem>>, vector<17x32xf32>
      %614 = arith.truncf %613 : vector<17x32xf32> to vector<17x32xbf16>
      %c10_472 = arith.constant 10 : index
      %c0_473 = arith.constant 0 : index
      %c0_474 = arith.constant 0 : index
      %615 = vector.load %arg3[%c10_472, %c0_473, %c0_474] : memref<16x32x64xbf16, #tpu.memory_space<vmem>>, vector<1x32x64xbf16>
      %616 = vector.shape_cast %615 : vector<1x32x64xbf16> to vector<32x64xbf16>
      %cst_475 = arith.constant dense<0.000000e+00> : vector<17x64xf32>
      %617 = tpu.matmul %614, %616, %cst_475 {dimension_numbers = #tpu.dot_dimension_numbers<[1], [0], [0], [1], [0, 0, 1, 1], [], []>} : vector<17x32xbf16>, vector<32x64xbf16>, vector<17x64xf32> -> vector<17x64xf32>
      %618 = arith.addf %607, %617 : vector<17x64xf32>
      %c2_i32_476 = arith.constant 2 : i32
      %619 = arith.muli %c2_i32_476, %arg27 : i32
      %c2_i32_477 = arith.constant 2 : i32
      %620 = arith.addi %619, %c2_i32_477 : i32
      %c20_i32_478 = arith.constant 20 : i32
      %621 = arith.muli %620, %c20_i32_478 : i32
      %c3_i32_479 = arith.constant 3 : i32
      %622 = arith.addi %621, %c3_i32_479 : i32
      %623 = arith.index_cast %622 : i32 to index
      %c0_480 = arith.constant 0 : index
      %624 = vector.load %arg23[%623, %c0_480] : memref<400x32xf32, #tpu.memory_space<vmem>>, vector<17x32xf32>
      %625 = arith.truncf %624 : vector<17x32xf32> to vector<17x32xbf16>
      %c11_481 = arith.constant 11 : index
      %c0_482 = arith.constant 0 : index
      %c0_483 = arith.constant 0 : index
      %626 = vector.load %arg3[%c11_481, %c0_482, %c0_483] : memref<16x32x64xbf16, #tpu.memory_space<vmem>>, vector<1x32x64xbf16>
      %627 = vector.shape_cast %626 : vector<1x32x64xbf16> to vector<32x64xbf16>
      %cst_484 = arith.constant dense<0.000000e+00> : vector<17x64xf32>
      %628 = tpu.matmul %625, %627, %cst_484 {dimension_numbers = #tpu.dot_dimension_numbers<[1], [0], [0], [1], [0, 0, 1, 1], [], []>} : vector<17x32xbf16>, vector<32x64xbf16>, vector<17x64xf32> -> vector<17x64xf32>
      %629 = arith.addf %618, %628 : vector<17x64xf32>
      %c2_i32_485 = arith.constant 2 : i32
      %630 = arith.muli %c2_i32_485, %arg27 : i32
      %c3_i32_486 = arith.constant 3 : i32
      %631 = arith.addi %630, %c3_i32_486 : i32
      %c20_i32_487 = arith.constant 20 : i32
      %632 = arith.muli %631, %c20_i32_487 : i32
      %c0_i32_488 = arith.constant 0 : i32
      %633 = arith.addi %632, %c0_i32_488 : i32
      %634 = arith.index_cast %633 : i32 to index
      %c0_489 = arith.constant 0 : index
      %635 = vector.load %arg23[%634, %c0_489] : memref<400x32xf32, #tpu.memory_space<vmem>>, vector<17x32xf32>
      %636 = arith.truncf %635 : vector<17x32xf32> to vector<17x32xbf16>
      %c12_490 = arith.constant 12 : index
      %c0_491 = arith.constant 0 : index
      %c0_492 = arith.constant 0 : index
      %637 = vector.load %arg3[%c12_490, %c0_491, %c0_492] : memref<16x32x64xbf16, #tpu.memory_space<vmem>>, vector<1x32x64xbf16>
      %638 = vector.shape_cast %637 : vector<1x32x64xbf16> to vector<32x64xbf16>
      %cst_493 = arith.constant dense<0.000000e+00> : vector<17x64xf32>
      %639 = tpu.matmul %636, %638, %cst_493 {dimension_numbers = #tpu.dot_dimension_numbers<[1], [0], [0], [1], [0, 0, 1, 1], [], []>} : vector<17x32xbf16>, vector<32x64xbf16>, vector<17x64xf32> -> vector<17x64xf32>
      %640 = arith.addf %629, %639 : vector<17x64xf32>
      %c2_i32_494 = arith.constant 2 : i32
      %641 = arith.muli %c2_i32_494, %arg27 : i32
      %c3_i32_495 = arith.constant 3 : i32
      %642 = arith.addi %641, %c3_i32_495 : i32
      %c20_i32_496 = arith.constant 20 : i32
      %643 = arith.muli %642, %c20_i32_496 : i32
      %c1_i32_497 = arith.constant 1 : i32
      %644 = arith.addi %643, %c1_i32_497 : i32
      %645 = arith.index_cast %644 : i32 to index
      %c0_498 = arith.constant 0 : index
      %646 = vector.load %arg23[%645, %c0_498] : memref<400x32xf32, #tpu.memory_space<vmem>>, vector<17x32xf32>
      %647 = arith.truncf %646 : vector<17x32xf32> to vector<17x32xbf16>
      %c13_499 = arith.constant 13 : index
      %c0_500 = arith.constant 0 : index
      %c0_501 = arith.constant 0 : index
      %648 = vector.load %arg3[%c13_499, %c0_500, %c0_501] : memref<16x32x64xbf16, #tpu.memory_space<vmem>>, vector<1x32x64xbf16>
      %649 = vector.shape_cast %648 : vector<1x32x64xbf16> to vector<32x64xbf16>
      %cst_502 = arith.constant dense<0.000000e+00> : vector<17x64xf32>
      %650 = tpu.matmul %647, %649, %cst_502 {dimension_numbers = #tpu.dot_dimension_numbers<[1], [0], [0], [1], [0, 0, 1, 1], [], []>} : vector<17x32xbf16>, vector<32x64xbf16>, vector<17x64xf32> -> vector<17x64xf32>
      %651 = arith.addf %640, %650 : vector<17x64xf32>
      %c2_i32_503 = arith.constant 2 : i32
      %652 = arith.muli %c2_i32_503, %arg27 : i32
      %c3_i32_504 = arith.constant 3 : i32
      %653 = arith.addi %652, %c3_i32_504 : i32
      %c20_i32_505 = arith.constant 20 : i32
      %654 = arith.muli %653, %c20_i32_505 : i32
      %c2_i32_506 = arith.constant 2 : i32
      %655 = arith.addi %654, %c2_i32_506 : i32
      %656 = arith.index_cast %655 : i32 to index
      %c0_507 = arith.constant 0 : index
      %657 = vector.load %arg23[%656, %c0_507] : memref<400x32xf32, #tpu.memory_space<vmem>>, vector<17x32xf32>
      %658 = arith.truncf %657 : vector<17x32xf32> to vector<17x32xbf16>
      %c14 = arith.constant 14 : index
      %c0_508 = arith.constant 0 : index
      %c0_509 = arith.constant 0 : index
      %659 = vector.load %arg3[%c14, %c0_508, %c0_509] : memref<16x32x64xbf16, #tpu.memory_space<vmem>>, vector<1x32x64xbf16>
      %660 = vector.shape_cast %659 : vector<1x32x64xbf16> to vector<32x64xbf16>
      %cst_510 = arith.constant dense<0.000000e+00> : vector<17x64xf32>
      %661 = tpu.matmul %658, %660, %cst_510 {dimension_numbers = #tpu.dot_dimension_numbers<[1], [0], [0], [1], [0, 0, 1, 1], [], []>} : vector<17x32xbf16>, vector<32x64xbf16>, vector<17x64xf32> -> vector<17x64xf32>
      %662 = arith.addf %651, %661 : vector<17x64xf32>
      %c2_i32_511 = arith.constant 2 : i32
      %663 = arith.muli %c2_i32_511, %arg27 : i32
      %c3_i32_512 = arith.constant 3 : i32
      %664 = arith.addi %663, %c3_i32_512 : i32
      %c20_i32_513 = arith.constant 20 : i32
      %665 = arith.muli %664, %c20_i32_513 : i32
      %c3_i32_514 = arith.constant 3 : i32
      %666 = arith.addi %665, %c3_i32_514 : i32
      %667 = arith.index_cast %666 : i32 to index
      %c0_515 = arith.constant 0 : index
      %668 = vector.load %arg23[%667, %c0_515] : memref<400x32xf32, #tpu.memory_space<vmem>>, vector<17x32xf32>
      %669 = arith.truncf %668 : vector<17x32xf32> to vector<17x32xbf16>
      %c15 = arith.constant 15 : index
      %c0_516 = arith.constant 0 : index
      %c0_517 = arith.constant 0 : index
      %670 = vector.load %arg3[%c15, %c0_516, %c0_517] : memref<16x32x64xbf16, #tpu.memory_space<vmem>>, vector<1x32x64xbf16>
      %671 = vector.shape_cast %670 : vector<1x32x64xbf16> to vector<32x64xbf16>
      %cst_518 = arith.constant dense<0.000000e+00> : vector<17x64xf32>
      %672 = tpu.matmul %669, %671, %cst_518 {dimension_numbers = #tpu.dot_dimension_numbers<[1], [0], [0], [1], [0, 0, 1, 1], [], []>} : vector<17x32xbf16>, vector<32x64xbf16>, vector<17x64xf32> -> vector<17x64xf32>
      %673 = arith.addf %662, %672 : vector<17x64xf32>
      %cst_519 = arith.constant dense<0.000000e+00> : vector<9x64xf32>
      %674 = tpu.matmul %15, %673, %cst_519 {dimension_numbers = #tpu.dot_dimension_numbers<[1], [0], [0], [1], [0, 0, 1, 1], [], []>} : vector<9x17xf32>, vector<17x64xf32>, vector<9x64xf32> -> vector<9x64xf32>
      %675 = vector.broadcast %16 : vector<1x64xf32> to vector<9x64xf32>
      %676 = arith.addf %674, %675 : vector<9x64xf32>
      %cst_520 = arith.constant 0.000000e+00 : f32
      %677 = vector.broadcast %cst_520 : f32 to vector<9x64xf32>
      %678 = arith.maximumf %676, %677 : vector<9x64xf32>
      %c9_i32_521 = arith.constant 9 : i32
      %679 = arith.muli %arg27, %c9_i32_521 : i32
      %680 = arith.index_cast %679 : i32 to index
      %c0_522 = arith.constant 0 : index
      %681 = vector.load %arg24[%680, %c0_522] : memref<81x64xf32, #tpu.memory_space<vmem>>, vector<9x64xf32>
      tpu.vector_store %arg24[%680, %c0_522], %678 {strides = array<i32>} : memref<81x64xf32, #tpu.memory_space<vmem>>, vector<9x64xf32>,
    }
    %c9_i32_7 = arith.constant 9 : i32
    %18 = tpu.iota {dimensions = array<i32: 0>} : vector<4x7xi32>
    %19 = tpu.iota {dimensions = array<i32: 1>} : vector<4x7xi32>
    %c2_i32_8 = arith.constant 2 : i32
    %20 = vector.broadcast %c2_i32_8 : i32 to vector<4x7xi32>
    %21 = arith.muli %20, %18 : vector<4x7xi32>
    %22 = arith.cmpi eq, %19, %21 : vector<4x7xi32>
    %23 = arith.extui %22 : vector<4x7xi1> to vector<4x7xi32>
    %24 = arith.sitofp %23 : vector<4x7xi32> to vector<4x7xf32>
    %c0_9 = arith.constant 0 : index
    %c0_10 = arith.constant 0 : index
    %25 = vector.load %arg6[%c0_9, %c0_10] : memref<1x128xf32, #tpu.memory_space<vmem>>, vector<1x128xf32>
    %cst = arith.constant 0.000000e+00 : f32
    %26 = vector.broadcast %cst : f32 to vector<7x128xf32>
    %c0_11 = arith.constant 0 : index
    %c0_12 = arith.constant 0 : index
    %27 = vector.load %arg24[%c0_11, %c0_12] : memref<81x64xf32, #tpu.memory_space<vmem>>, vector<7x64xf32>
    %28 = arith.truncf %27 : vector<7x64xf32> to vector<7x64xbf16>
    %c0_13 = arith.constant 0 : index
    %c0_14 = arith.constant 0 : index
    %c0_15 = arith.constant 0 : index
    %29 = vector.load %arg5[%c0_13, %c0_14, %c0_15] : memref<9x64x128xbf16, #tpu.memory_space<vmem>>, vector<1x64x128xbf16>
    %30 = vector.shape_cast %29 : vector<1x64x128xbf16> to vector<64x128xbf16>
    %cst_16 = arith.constant dense<0.000000e+00> : vector<7x128xf32>
    %31 = tpu.matmul %28, %30, %cst_16 {dimension_numbers = #tpu.dot_dimension_numbers<[1], [0], [0], [1], [0, 0, 1, 1], [], []>} : vector<7x64xbf16>, vector<64x128xbf16>, vector<7x128xf32> -> vector<7x128xf32>
    %32 = arith.addf %26, %31 : vector<7x128xf32>
    %c1 = arith.constant 1 : index
    %c0_17 = arith.constant 0 : index
    %33 = vector.load %arg24[%c1, %c0_17] : memref<81x64xf32, #tpu.memory_space<vmem>>, vector<7x64xf32>
    %34 = arith.truncf %33 : vector<7x64xf32> to vector<7x64xbf16>
    %c1_18 = arith.constant 1 : index
    %c0_19 = arith.constant 0 : index
    %c0_20 = arith.constant 0 : index
    %35 = vector.load %arg5[%c1_18, %c0_19, %c0_20] : memref<9x64x128xbf16, #tpu.memory_space<vmem>>, vector<1x64x128xbf16>
    %36 = vector.shape_cast %35 : vector<1x64x128xbf16> to vector<64x128xbf16>
    %cst_21 = arith.constant dense<0.000000e+00> : vector<7x128xf32>
    %37 = tpu.matmul %34, %36, %cst_21 {dimension_numbers = #tpu.dot_dimension_numbers<[1], [0], [0], [1], [0, 0, 1, 1], [], []>} : vector<7x64xbf16>, vector<64x128xbf16>, vector<7x128xf32> -> vector<7x128xf32>
    %38 = arith.addf %32, %37 : vector<7x128xf32>
    %c2 = arith.constant 2 : index
    %c0_22 = arith.constant 0 : index
    %39 = vector.load %arg24[%c2, %c0_22] : memref<81x64xf32, #tpu.memory_space<vmem>>, vector<7x64xf32>
    %40 = arith.truncf %39 : vector<7x64xf32> to vector<7x64xbf16>
    %c2_23 = arith.constant 2 : index
    %c0_24 = arith.constant 0 : index
    %c0_25 = arith.constant 0 : index
    %41 = vector.load %arg5[%c2_23, %c0_24, %c0_25] : memref<9x64x128xbf16, #tpu.memory_space<vmem>>, vector<1x64x128xbf16>
    %42 = vector.shape_cast %41 : vector<1x64x128xbf16> to vector<64x128xbf16>
    %cst_26 = arith.constant dense<0.000000e+00> : vector<7x128xf32>
    %43 = tpu.matmul %40, %42, %cst_26 {dimension_numbers = #tpu.dot_dimension_numbers<[1], [0], [0], [1], [0, 0, 1, 1], [], []>} : vector<7x64xbf16>, vector<64x128xbf16>, vector<7x128xf32> -> vector<7x128xf32>
    %44 = arith.addf %38, %43 : vector<7x128xf32>
    %c9 = arith.constant 9 : index
    %c0_27 = arith.constant 0 : index
    %45 = vector.load %arg24[%c9, %c0_27] : memref<81x64xf32, #tpu.memory_space<vmem>>, vector<7x64xf32>
    %46 = arith.truncf %45 : vector<7x64xf32> to vector<7x64xbf16>
    %c3 = arith.constant 3 : index
    %c0_28 = arith.constant 0 : index
    %c0_29 = arith.constant 0 : index
    %47 = vector.load %arg5[%c3, %c0_28, %c0_29] : memref<9x64x128xbf16, #tpu.memory_space<vmem>>, vector<1x64x128xbf16>
    %48 = vector.shape_cast %47 : vector<1x64x128xbf16> to vector<64x128xbf16>
    %cst_30 = arith.constant dense<0.000000e+00> : vector<7x128xf32>
    %49 = tpu.matmul %46, %48, %cst_30 {dimension_numbers = #tpu.dot_dimension_numbers<[1], [0], [0], [1], [0, 0, 1, 1], [], []>} : vector<7x64xbf16>, vector<64x128xbf16>, vector<7x128xf32> -> vector<7x128xf32>
    %50 = arith.addf %44, %49 : vector<7x128xf32>
    %c10 = arith.constant 10 : index
    %c0_31 = arith.constant 0 : index
    %51 = vector.load %arg24[%c10, %c0_31] : memref<81x64xf32, #tpu.memory_space<vmem>>, vector<7x64xf32>
    %52 = arith.truncf %51 : vector<7x64xf32> to vector<7x64xbf16>
    %c4 = arith.constant 4 : index
    %c0_32 = arith.constant 0 : index
    %c0_33 = arith.constant 0 : index
    %53 = vector.load %arg5[%c4, %c0_32, %c0_33] : memref<9x64x128xbf16, #tpu.memory_space<vmem>>, vector<1x64x128xbf16>
    %54 = vector.shape_cast %53 : vector<1x64x128xbf16> to vector<64x128xbf16>
    %cst_34 = arith.constant dense<0.000000e+00> : vector<7x128xf32>
    %55 = tpu.matmul %52, %54, %cst_34 {dimension_numbers = #tpu.dot_dimension_numbers<[1], [0], [0], [1], [0, 0, 1, 1], [], []>} : vector<7x64xbf16>, vector<64x128xbf16>, vector<7x128xf32> -> vector<7x128xf32>
    %56 = arith.addf %50, %55 : vector<7x128xf32>
    %c11 = arith.constant 11 : index
    %c0_35 = arith.constant 0 : index
    %57 = vector.load %arg24[%c11, %c0_35] : memref<81x64xf32, #tpu.memory_space<vmem>>, vector<7x64xf32>
    %58 = arith.truncf %57 : vector<7x64xf32> to vector<7x64xbf16>
    %c5 = arith.constant 5 : index
    %c0_36 = arith.constant 0 : index
    %c0_37 = arith.constant 0 : index
    %59 = vector.load %arg5[%c5, %c0_36, %c0_37] : memref<9x64x128xbf16, #tpu.memory_space<vmem>>, vector<1x64x128xbf16>
    %60 = vector.shape_cast %59 : vector<1x64x128xbf16> to vector<64x128xbf16>
    %cst_38 = arith.constant dense<0.000000e+00> : vector<7x128xf32>
    %61 = tpu.matmul %58, %60, %cst_38 {dimension_numbers = #tpu.dot_dimension_numbers<[1], [0], [0], [1], [0, 0, 1, 1], [], []>} : vector<7x64xbf16>, vector<64x128xbf16>, vector<7x128xf32> -> vector<7x128xf32>
    %62 = arith.addf %56, %61 : vector<7x128xf32>
    %c18 = arith.constant 18 : index
    %c0_39 = arith.constant 0 : index
    %63 = vector.load %arg24[%c18, %c0_39] : memref<81x64xf32, #tpu.memory_space<vmem>>, vector<7x64xf32>
    %64 = arith.truncf %63 : vector<7x64xf32> to vector<7x64xbf16>
    %c6 = arith.constant 6 : index
    %c0_40 = arith.constant 0 : index
    %c0_41 = arith.constant 0 : index
    %65 = vector.load %arg5[%c6, %c0_40, %c0_41] : memref<9x64x128xbf16, #tpu.memory_space<vmem>>, vector<1x64x128xbf16>
    %66 = vector.shape_cast %65 : vector<1x64x128xbf16> to vector<64x128xbf16>
    %cst_42 = arith.constant dense<0.000000e+00> : vector<7x128xf32>
    %67 = tpu.matmul %64, %66, %cst_42 {dimension_numbers = #tpu.dot_dimension_numbers<[1], [0], [0], [1], [0, 0, 1, 1], [], []>} : vector<7x64xbf16>, vector<64x128xbf16>, vector<7x128xf32> -> vector<7x128xf32>
    %68 = arith.addf %62, %67 : vector<7x128xf32>
    %c19 = arith.constant 19 : index
    %c0_43 = arith.constant 0 : index
    %69 = vector.load %arg24[%c19, %c0_43] : memref<81x64xf32, #tpu.memory_space<vmem>>, vector<7x64xf32>
    %70 = arith.truncf %69 : vector<7x64xf32> to vector<7x64xbf16>
    %c7 = arith.constant 7 : index
    %c0_44 = arith.constant 0 : index
    %c0_45 = arith.constant 0 : index
    %71 = vector.load %arg5[%c7, %c0_44, %c0_45] : memref<9x64x128xbf16, #tpu.memory_space<vmem>>, vector<1x64x128xbf16>
    %72 = vector.shape_cast %71 : vector<1x64x128xbf16> to vector<64x128xbf16>
    %cst_46 = arith.constant dense<0.000000e+00> : vector<7x128xf32>
    %73 = tpu.matmul %70, %72, %cst_46 {dimension_numbers = #tpu.dot_dimension_numbers<[1], [0], [0], [1], [0, 0, 1, 1], [], []>} : vector<7x64xbf16>, vector<64x128xbf16>, vector<7x128xf32> -> vector<7x128xf32>
    %74 = arith.addf %68, %73 : vector<7x128xf32>
    %c20 = arith.constant 20 : index
    %c0_47 = arith.constant 0 : index
    %75 = vector.load %arg24[%c20, %c0_47] : memref<81x64xf32, #tpu.memory_space<vmem>>, vector<7x64xf32>
    %76 = arith.truncf %75 : vector<7x64xf32> to vector<7x64xbf16>
    %c8 = arith.constant 8 : index
    %c0_48 = arith.constant 0 : index
    %c0_49 = arith.constant 0 : index
    %77 = vector.load %arg5[%c8, %c0_48, %c0_49] : memref<9x64x128xbf16, #tpu.memory_space<vmem>>, vector<1x64x128xbf16>
    %78 = vector.shape_cast %77 : vector<1x64x128xbf16> to vector<64x128xbf16>
    %cst_50 = arith.constant dense<0.000000e+00> : vector<7x128xf32>
    %79 = tpu.matmul %76, %78, %cst_50 {dimension_numbers = #tpu.dot_dimension_numbers<[1], [0], [0], [1], [0, 0, 1, 1], [], []>} : vector<7x64xbf16>, vector<64x128xbf16>, vector<7x128xf32> -> vector<7x128xf32>
    %80 = arith.addf %74, %79 : vector<7x128xf32>
    %cst_51 = arith.constant dense<0.000000e+00> : vector<4x128xf32>
    %81 = tpu.matmul %24, %80, %cst_51 {dimension_numbers = #tpu.dot_dimension_numbers<[1], [0], [0], [1], [0, 0, 1, 1], [], []>} : vector<4x7xf32>, vector<7x128xf32>, vector<4x128xf32> -> vector<4x128xf32>
    %82 = vector.broadcast %25 : vector<1x128xf32> to vector<4x128xf32>
    %83 = arith.addf %81, %82 : vector<4x128xf32>
    %cst_52 = arith.constant 0.000000e+00 : f32
    %84 = vector.broadcast %cst_52 : f32 to vector<4x128xf32>
    %85 = arith.maximumf %83, %84 : vector<4x128xf32>
    %c0_53 = arith.constant 0 : index
    %c0_54 = arith.constant 0 : index
    %86 = vector.load %arg25[%c0_53, %c0_54] : memref<16x128xf32, #tpu.memory_space<vmem>>, vector<4x128xf32>
    tpu.vector_store %arg25[%c0_53, %c0_54], %85 {strides = array<i32>} : memref<16x128xf32, #tpu.memory_space<vmem>>, vector<4x128xf32>,
    %cst_55 = arith.constant 0.000000e+00 : f32
    %87 = vector.broadcast %cst_55 : f32 to vector<7x128xf32>
    %c18_56 = arith.constant 18 : index
    %c0_57 = arith.constant 0 : index
    %88 = vector.load %arg24[%c18_56, %c0_57] : memref<81x64xf32, #tpu.memory_space<vmem>>, vector<7x64xf32>
    %89 = arith.truncf %88 : vector<7x64xf32> to vector<7x64xbf16>
    %c0_58 = arith.constant 0 : index
    %c0_59 = arith.constant 0 : index
    %c0_60 = arith.constant 0 : index
    %90 = vector.load %arg5[%c0_58, %c0_59, %c0_60] : memref<9x64x128xbf16, #tpu.memory_space<vmem>>, vector<1x64x128xbf16>
    %91 = vector.shape_cast %90 : vector<1x64x128xbf16> to vector<64x128xbf16>
    %cst_61 = arith.constant dense<0.000000e+00> : vector<7x128xf32>
    %92 = tpu.matmul %89, %91, %cst_61 {dimension_numbers = #tpu.dot_dimension_numbers<[1], [0], [0], [1], [0, 0, 1, 1], [], []>} : vector<7x64xbf16>, vector<64x128xbf16>, vector<7x128xf32> -> vector<7x128xf32>
    %93 = arith.addf %87, %92 : vector<7x128xf32>
    %c19_62 = arith.constant 19 : index
    %c0_63 = arith.constant 0 : index
    %94 = vector.load %arg24[%c19_62, %c0_63] : memref<81x64xf32, #tpu.memory_space<vmem>>, vector<7x64xf32>
    %95 = arith.truncf %94 : vector<7x64xf32> to vector<7x64xbf16>
    %c1_64 = arith.constant 1 : index
    %c0_65 = arith.constant 0 : index
    %c0_66 = arith.constant 0 : index
    %96 = vector.load %arg5[%c1_64, %c0_65, %c0_66] : memref<9x64x128xbf16, #tpu.memory_space<vmem>>, vector<1x64x128xbf16>
    %97 = vector.shape_cast %96 : vector<1x64x128xbf16> to vector<64x128xbf16>
    %cst_67 = arith.constant dense<0.000000e+00> : vector<7x128xf32>
    %98 = tpu.matmul %95, %97, %cst_67 {dimension_numbers = #tpu.dot_dimension_numbers<[1], [0], [0], [1], [0, 0, 1, 1], [], []>} : vector<7x64xbf16>, vector<64x128xbf16>, vector<7x128xf32> -> vector<7x128xf32>
    %99 = arith.addf %93, %98 : vector<7x128xf32>
    %c20_68 = arith.constant 20 : index
    %c0_69 = arith.constant 0 : index
    %100 = vector.load %arg24[%c20_68, %c0_69] : memref<81x64xf32, #tpu.memory_space<vmem>>, vector<7x64xf32>
    %101 = arith.truncf %100 : vector<7x64xf32> to vector<7x64xbf16>
    %c2_70 = arith.constant 2 : index
    %c0_71 = arith.constant 0 : index
    %c0_72 = arith.constant 0 : index
    %102 = vector.load %arg5[%c2_70, %c0_71, %c0_72] : memref<9x64x128xbf16, #tpu.memory_space<vmem>>, vector<1x64x128xbf16>
    %103 = vector.shape_cast %102 : vector<1x64x128xbf16> to vector<64x128xbf16>
    %cst_73 = arith.constant dense<0.000000e+00> : vector<7x128xf32>
    %104 = tpu.matmul %101, %103, %cst_73 {dimension_numbers = #tpu.dot_dimension_numbers<[1], [0], [0], [1], [0, 0, 1, 1], [], []>} : vector<7x64xbf16>, vector<64x128xbf16>, vector<7x128xf32> -> vector<7x128xf32>
    %105 = arith.addf %99, %104 : vector<7x128xf32>
    %c27 = arith.constant 27 : index
    %c0_74 = arith.constant 0 : index
    %106 = vector.load %arg24[%c27, %c0_74] : memref<81x64xf32, #tpu.memory_space<vmem>>, vector<7x64xf32>
    %107 = arith.truncf %106 : vector<7x64xf32> to vector<7x64xbf16>
    %c3_75 = arith.constant 3 : index
    %c0_76 = arith.constant 0 : index
    %c0_77 = arith.constant 0 : index
    %108 = vector.load %arg5[%c3_75, %c0_76, %c0_77] : memref<9x64x128xbf16, #tpu.memory_space<vmem>>, vector<1x64x128xbf16>
    %109 = vector.shape_cast %108 : vector<1x64x128xbf16> to vector<64x128xbf16>
    %cst_78 = arith.constant dense<0.000000e+00> : vector<7x128xf32>
    %110 = tpu.matmul %107, %109, %cst_78 {dimension_numbers = #tpu.dot_dimension_numbers<[1], [0], [0], [1], [0, 0, 1, 1], [], []>} : vector<7x64xbf16>, vector<64x128xbf16>, vector<7x128xf32> -> vector<7x128xf32>
    %111 = arith.addf %105, %110 : vector<7x128xf32>
    %c28 = arith.constant 28 : index
    %c0_79 = arith.constant 0 : index
    %112 = vector.load %arg24[%c28, %c0_79] : memref<81x64xf32, #tpu.memory_space<vmem>>, vector<7x64xf32>
    %113 = arith.truncf %112 : vector<7x64xf32> to vector<7x64xbf16>
    %c4_80 = arith.constant 4 : index
    %c0_81 = arith.constant 0 : index
    %c0_82 = arith.constant 0 : index
    %114 = vector.load %arg5[%c4_80, %c0_81, %c0_82] : memref<9x64x128xbf16, #tpu.memory_space<vmem>>, vector<1x64x128xbf16>
    %115 = vector.shape_cast %114 : vector<1x64x128xbf16> to vector<64x128xbf16>
    %cst_83 = arith.constant dense<0.000000e+00> : vector<7x128xf32>
    %116 = tpu.matmul %113, %115, %cst_83 {dimension_numbers = #tpu.dot_dimension_numbers<[1], [0], [0], [1], [0, 0, 1, 1], [], []>} : vector<7x64xbf16>, vector<64x128xbf16>, vector<7x128xf32> -> vector<7x128xf32>
    %117 = arith.addf %111, %116 : vector<7x128xf32>
    %c29 = arith.constant 29 : index
    %c0_84 = arith.constant 0 : index
    %118 = vector.load %arg24[%c29, %c0_84] : memref<81x64xf32, #tpu.memory_space<vmem>>, vector<7x64xf32>
    %119 = arith.truncf %118 : vector<7x64xf32> to vector<7x64xbf16>
    %c5_85 = arith.constant 5 : index
    %c0_86 = arith.constant 0 : index
    %c0_87 = arith.constant 0 : index
    %120 = vector.load %arg5[%c5_85, %c0_86, %c0_87] : memref<9x64x128xbf16, #tpu.memory_space<vmem>>, vector<1x64x128xbf16>
    %121 = vector.shape_cast %120 : vector<1x64x128xbf16> to vector<64x128xbf16>
    %cst_88 = arith.constant dense<0.000000e+00> : vector<7x128xf32>
    %122 = tpu.matmul %119, %121, %cst_88 {dimension_numbers = #tpu.dot_dimension_numbers<[1], [0], [0], [1], [0, 0, 1, 1], [], []>} : vector<7x64xbf16>, vector<64x128xbf16>, vector<7x128xf32> -> vector<7x128xf32>
    %123 = arith.addf %117, %122 : vector<7x128xf32>
    %c36 = arith.constant 36 : index
    %c0_89 = arith.constant 0 : index
    %124 = vector.load %arg24[%c36, %c0_89] : memref<81x64xf32, #tpu.memory_space<vmem>>, vector<7x64xf32>
    %125 = arith.truncf %124 : vector<7x64xf32> to vector<7x64xbf16>
    %c6_90 = arith.constant 6 : index
    %c0_91 = arith.constant 0 : index
    %c0_92 = arith.constant 0 : index
    %126 = vector.load %arg5[%c6_90, %c0_91, %c0_92] : memref<9x64x128xbf16, #tpu.memory_space<vmem>>, vector<1x64x128xbf16>
    %127 = vector.shape_cast %126 : vector<1x64x128xbf16> to vector<64x128xbf16>
    %cst_93 = arith.constant dense<0.000000e+00> : vector<7x128xf32>
    %128 = tpu.matmul %125, %127, %cst_93 {dimension_numbers = #tpu.dot_dimension_numbers<[1], [0], [0], [1], [0, 0, 1, 1], [], []>} : vector<7x64xbf16>, vector<64x128xbf16>, vector<7x128xf32> -> vector<7x128xf32>
    %129 = arith.addf %123, %128 : vector<7x128xf32>
    %c37 = arith.constant 37 : index
    %c0_94 = arith.constant 0 : index
    %130 = vector.load %arg24[%c37, %c0_94] : memref<81x64xf32, #tpu.memory_space<vmem>>, vector<7x64xf32>
    %131 = arith.truncf %130 : vector<7x64xf32> to vector<7x64xbf16>
    %c7_95 = arith.constant 7 : index
    %c0_96 = arith.constant 0 : index
    %c0_97 = arith.constant 0 : index
    %132 = vector.load %arg5[%c7_95, %c0_96, %c0_97] : memref<9x64x128xbf16, #tpu.memory_space<vmem>>, vector<1x64x128xbf16>
    %133 = vector.shape_cast %132 : vector<1x64x128xbf16> to vector<64x128xbf16>
    %cst_98 = arith.constant dense<0.000000e+00> : vector<7x128xf32>
    %134 = tpu.matmul %131, %133, %cst_98 {dimension_numbers = #tpu.dot_dimension_numbers<[1], [0], [0], [1], [0, 0, 1, 1], [], []>} : vector<7x64xbf16>, vector<64x128xbf16>, vector<7x128xf32> -> vector<7x128xf32>
    %135 = arith.addf %129, %134 : vector<7x128xf32>
    %c38 = arith.constant 38 : index
    %c0_99 = arith.constant 0 : index
    %136 = vector.load %arg24[%c38, %c0_99] : memref<81x64xf32, #tpu.memory_space<vmem>>, vector<7x64xf32>
    %137 = arith.truncf %136 : vector<7x64xf32> to vector<7x64xbf16>
    %c8_100 = arith.constant 8 : index
    %c0_101 = arith.constant 0 : index
    %c0_102 = arith.constant 0 : index
    %138 = vector.load %arg5[%c8_100, %c0_101, %c0_102] : memref<9x64x128xbf16, #tpu.memory_space<vmem>>, vector<1x64x128xbf16>
    %139 = vector.shape_cast %138 : vector<1x64x128xbf16> to vector<64x128xbf16>
    %cst_103 = arith.constant dense<0.000000e+00> : vector<7x128xf32>
    %140 = tpu.matmul %137, %139, %cst_103 {dimension_numbers = #tpu.dot_dimension_numbers<[1], [0], [0], [1], [0, 0, 1, 1], [], []>} : vector<7x64xbf16>, vector<64x128xbf16>, vector<7x128xf32> -> vector<7x128xf32>
    %141 = arith.addf %135, %140 : vector<7x128xf32>
    %cst_104 = arith.constant dense<0.000000e+00> : vector<4x128xf32>
    %142 = tpu.matmul %24, %141, %cst_104 {dimension_numbers = #tpu.dot_dimension_numbers<[1], [0], [0], [1], [0, 0, 1, 1], [], []>} : vector<4x7xf32>, vector<7x128xf32>, vector<4x128xf32> -> vector<4x128xf32>
    %143 = vector.broadcast %25 : vector<1x128xf32> to vector<4x128xf32>
    %144 = arith.addf %142, %143 : vector<4x128xf32>
    %cst_105 = arith.constant 0.000000e+00 : f32
    %145 = vector.broadcast %cst_105 : f32 to vector<4x128xf32>
    %146 = arith.maximumf %144, %145 : vector<4x128xf32>
    %c4_106 = arith.constant 4 : index
    %c0_107 = arith.constant 0 : index
    %147 = vector.load %arg25[%c4_106, %c0_107] : memref<16x128xf32, #tpu.memory_space<vmem>>, vector<4x128xf32>
    tpu.vector_store %arg25[%c4_106, %c0_107], %146 {strides = array<i32>} : memref<16x128xf32, #tpu.memory_space<vmem>>, vector<4x128xf32>,
    %cst_108 = arith.constant 0.000000e+00 : f32
    %148 = vector.broadcast %cst_108 : f32 to vector<7x128xf32>
    %c36_109 = arith.constant 36 : index
    %c0_110 = arith.constant 0 : index
    %149 = vector.load %arg24[%c36_109, %c0_110] : memref<81x64xf32, #tpu.memory_space<vmem>>, vector<7x64xf32>
    %150 = arith.truncf %149 : vector<7x64xf32> to vector<7x64xbf16>
    %c0_111 = arith.constant 0 : index
    %c0_112 = arith.constant 0 : index
    %c0_113 = arith.constant 0 : index
    %151 = vector.load %arg5[%c0_111, %c0_112, %c0_113] : memref<9x64x128xbf16, #tpu.memory_space<vmem>>, vector<1x64x128xbf16>
    %152 = vector.shape_cast %151 : vector<1x64x128xbf16> to vector<64x128xbf16>
    %cst_114 = arith.constant dense<0.000000e+00> : vector<7x128xf32>
    %153 = tpu.matmul %150, %152, %cst_114 {dimension_numbers = #tpu.dot_dimension_numbers<[1], [0], [0], [1], [0, 0, 1, 1], [], []>} : vector<7x64xbf16>, vector<64x128xbf16>, vector<7x128xf32> -> vector<7x128xf32>
    %154 = arith.addf %148, %153 : vector<7x128xf32>
    %c37_115 = arith.constant 37 : index
    %c0_116 = arith.constant 0 : index
    %155 = vector.load %arg24[%c37_115, %c0_116] : memref<81x64xf32, #tpu.memory_space<vmem>>, vector<7x64xf32>
    %156 = arith.truncf %155 : vector<7x64xf32> to vector<7x64xbf16>
    %c1_117 = arith.constant 1 : index
    %c0_118 = arith.constant 0 : index
    %c0_119 = arith.constant 0 : index
    %157 = vector.load %arg5[%c1_117, %c0_118, %c0_119] : memref<9x64x128xbf16, #tpu.memory_space<vmem>>, vector<1x64x128xbf16>
    %158 = vector.shape_cast %157 : vector<1x64x128xbf16> to vector<64x128xbf16>
    %cst_120 = arith.constant dense<0.000000e+00> : vector<7x128xf32>
    %159 = tpu.matmul %156, %158, %cst_120 {dimension_numbers = #tpu.dot_dimension_numbers<[1], [0], [0], [1], [0, 0, 1, 1], [], []>} : vector<7x64xbf16>, vector<64x128xbf16>, vector<7x128xf32> -> vector<7x128xf32>
    %160 = arith.addf %154, %159 : vector<7x128xf32>
    %c38_121 = arith.constant 38 : index
    %c0_122 = arith.constant 0 : index
    %161 = vector.load %arg24[%c38_121, %c0_122] : memref<81x64xf32, #tpu.memory_space<vmem>>, vector<7x64xf32>
    %162 = arith.truncf %161 : vector<7x64xf32> to vector<7x64xbf16>
    %c2_123 = arith.constant 2 : index
    %c0_124 = arith.constant 0 : index
    %c0_125 = arith.constant 0 : index
    %163 = vector.load %arg5[%c2_123, %c0_124, %c0_125] : memref<9x64x128xbf16, #tpu.memory_space<vmem>>, vector<1x64x128xbf16>
    %164 = vector.shape_cast %163 : vector<1x64x128xbf16> to vector<64x128xbf16>
    %cst_126 = arith.constant dense<0.000000e+00> : vector<7x128xf32>
    %165 = tpu.matmul %162, %164, %cst_126 {dimension_numbers = #tpu.dot_dimension_numbers<[1], [0], [0], [1], [0, 0, 1, 1], [], []>} : vector<7x64xbf16>, vector<64x128xbf16>, vector<7x128xf32> -> vector<7x128xf32>
    %166 = arith.addf %160, %165 : vector<7x128xf32>
    %c45 = arith.constant 45 : index
    %c0_127 = arith.constant 0 : index
    %167 = vector.load %arg24[%c45, %c0_127] : memref<81x64xf32, #tpu.memory_space<vmem>>, vector<7x64xf32>
    %168 = arith.truncf %167 : vector<7x64xf32> to vector<7x64xbf16>
    %c3_128 = arith.constant 3 : index
    %c0_129 = arith.constant 0 : index
    %c0_130 = arith.constant 0 : index
    %169 = vector.load %arg5[%c3_128, %c0_129, %c0_130] : memref<9x64x128xbf16, #tpu.memory_space<vmem>>, vector<1x64x128xbf16>
    %170 = vector.shape_cast %169 : vector<1x64x128xbf16> to vector<64x128xbf16>
    %cst_131 = arith.constant dense<0.000000e+00> : vector<7x128xf32>
    %171 = tpu.matmul %168, %170, %cst_131 {dimension_numbers = #tpu.dot_dimension_numbers<[1], [0], [0], [1], [0, 0, 1, 1], [], []>} : vector<7x64xbf16>, vector<64x128xbf16>, vector<7x128xf32> -> vector<7x128xf32>
    %172 = arith.addf %166, %171 : vector<7x128xf32>
    %c46 = arith.constant 46 : index
    %c0_132 = arith.constant 0 : index
    %173 = vector.load %arg24[%c46, %c0_132] : memref<81x64xf32, #tpu.memory_space<vmem>>, vector<7x64xf32>
    %174 = arith.truncf %173 : vector<7x64xf32> to vector<7x64xbf16>
    %c4_133 = arith.constant 4 : index
    %c0_134 = arith.constant 0 : index
    %c0_135 = arith.constant 0 : index
    %175 = vector.load %arg5[%c4_133, %c0_134, %c0_135] : memref<9x64x128xbf16, #tpu.memory_space<vmem>>, vector<1x64x128xbf16>
    %176 = vector.shape_cast %175 : vector<1x64x128xbf16> to vector<64x128xbf16>
    %cst_136 = arith.constant dense<0.000000e+00> : vector<7x128xf32>
    %177 = tpu.matmul %174, %176, %cst_136 {dimension_numbers = #tpu.dot_dimension_numbers<[1], [0], [0], [1], [0, 0, 1, 1], [], []>} : vector<7x64xbf16>, vector<64x128xbf16>, vector<7x128xf32> -> vector<7x128xf32>
    %178 = arith.addf %172, %177 : vector<7x128xf32>
    %c47 = arith.constant 47 : index
    %c0_137 = arith.constant 0 : index
    %179 = vector.load %arg24[%c47, %c0_137] : memref<81x64xf32, #tpu.memory_space<vmem>>, vector<7x64xf32>
    %180 = arith.truncf %179 : vector<7x64xf32> to vector<7x64xbf16>
    %c5_138 = arith.constant 5 : index
    %c0_139 = arith.constant 0 : index
    %c0_140 = arith.constant 0 : index
    %181 = vector.load %arg5[%c5_138, %c0_139, %c0_140] : memref<9x64x128xbf16, #tpu.memory_space<vmem>>, vector<1x64x128xbf16>
    %182 = vector.shape_cast %181 : vector<1x64x128xbf16> to vector<64x128xbf16>
    %cst_141 = arith.constant dense<0.000000e+00> : vector<7x128xf32>
    %183 = tpu.matmul %180, %182, %cst_141 {dimension_numbers = #tpu.dot_dimension_numbers<[1], [0], [0], [1], [0, 0, 1, 1], [], []>} : vector<7x64xbf16>, vector<64x128xbf16>, vector<7x128xf32> -> vector<7x128xf32>
    %184 = arith.addf %178, %183 : vector<7x128xf32>
    %c54 = arith.constant 54 : index
    %c0_142 = arith.constant 0 : index
    %185 = vector.load %arg24[%c54, %c0_142] : memref<81x64xf32, #tpu.memory_space<vmem>>, vector<7x64xf32>
    %186 = arith.truncf %185 : vector<7x64xf32> to vector<7x64xbf16>
    %c6_143 = arith.constant 6 : index
    %c0_144 = arith.constant 0 : index
    %c0_145 = arith.constant 0 : index
    %187 = vector.load %arg5[%c6_143, %c0_144, %c0_145] : memref<9x64x128xbf16, #tpu.memory_space<vmem>>, vector<1x64x128xbf16>
    %188 = vector.shape_cast %187 : vector<1x64x128xbf16> to vector<64x128xbf16>
    %cst_146 = arith.constant dense<0.000000e+00> : vector<7x128xf32>
    %189 = tpu.matmul %186, %188, %cst_146 {dimension_numbers = #tpu.dot_dimension_numbers<[1], [0], [0], [1], [0, 0, 1, 1], [], []>} : vector<7x64xbf16>, vector<64x128xbf16>, vector<7x128xf32> -> vector<7x128xf32>
    %190 = arith.addf %184, %189 : vector<7x128xf32>
    %c55 = arith.constant 55 : index
    %c0_147 = arith.constant 0 : index
    %191 = vector.load %arg24[%c55, %c0_147] : memref<81x64xf32, #tpu.memory_space<vmem>>, vector<7x64xf32>
    %192 = arith.truncf %191 : vector<7x64xf32> to vector<7x64xbf16>
    %c7_148 = arith.constant 7 : index
    %c0_149 = arith.constant 0 : index
    %c0_150 = arith.constant 0 : index
    %193 = vector.load %arg5[%c7_148, %c0_149, %c0_150] : memref<9x64x128xbf16, #tpu.memory_space<vmem>>, vector<1x64x128xbf16>
    %194 = vector.shape_cast %193 : vector<1x64x128xbf16> to vector<64x128xbf16>
    %cst_151 = arith.constant dense<0.000000e+00> : vector<7x128xf32>
    %195 = tpu.matmul %192, %194, %cst_151 {dimension_numbers = #tpu.dot_dimension_numbers<[1], [0], [0], [1], [0, 0, 1, 1], [], []>} : vector<7x64xbf16>, vector<64x128xbf16>, vector<7x128xf32> -> vector<7x128xf32>
    %196 = arith.addf %190, %195 : vector<7x128xf32>
    %c56 = arith.constant 56 : index
    %c0_152 = arith.constant 0 : index
    %197 = vector.load %arg24[%c56, %c0_152] : memref<81x64xf32, #tpu.memory_space<vmem>>, vector<7x64xf32>
    %198 = arith.truncf %197 : vector<7x64xf32> to vector<7x64xbf16>
    %c8_153 = arith.constant 8 : index
    %c0_154 = arith.constant 0 : index
    %c0_155 = arith.constant 0 : index
    %199 = vector.load %arg5[%c8_153, %c0_154, %c0_155] : memref<9x64x128xbf16, #tpu.memory_space<vmem>>, vector<1x64x128xbf16>
    %200 = vector.shape_cast %199 : vector<1x64x128xbf16> to vector<64x128xbf16>
    %cst_156 = arith.constant dense<0.000000e+00> : vector<7x128xf32>
    %201 = tpu.matmul %198, %200, %cst_156 {dimension_numbers = #tpu.dot_dimension_numbers<[1], [0], [0], [1], [0, 0, 1, 1], [], []>} : vector<7x64xbf16>, vector<64x128xbf16>, vector<7x128xf32> -> vector<7x128xf32>
    %202 = arith.addf %196, %201 : vector<7x128xf32>
    %cst_157 = arith.constant dense<0.000000e+00> : vector<4x128xf32>
    %203 = tpu.matmul %24, %202, %cst_157 {dimension_numbers = #tpu.dot_dimension_numbers<[1], [0], [0], [1], [0, 0, 1, 1], [], []>} : vector<4x7xf32>, vector<7x128xf32>, vector<4x128xf32> -> vector<4x128xf32>
    %204 = vector.broadcast %25 : vector<1x128xf32> to vector<4x128xf32>
    %205 = arith.addf %203, %204 : vector<4x128xf32>
    %cst_158 = arith.constant 0.000000e+00 : f32
    %206 = vector.broadcast %cst_158 : f32 to vector<4x128xf32>
    %207 = arith.maximumf %205, %206 : vector<4x128xf32>
    %c8_159 = arith.constant 8 : index
    %c0_160 = arith.constant 0 : index
    %208 = vector.load %arg25[%c8_159, %c0_160] : memref<16x128xf32, #tpu.memory_space<vmem>>, vector<4x128xf32>
    tpu.vector_store %arg25[%c8_159, %c0_160], %207 {strides = array<i32>} : memref<16x128xf32, #tpu.memory_space<vmem>>, vector<4x128xf32>,
    %cst_161 = arith.constant 0.000000e+00 : f32
    %209 = vector.broadcast %cst_161 : f32 to vector<7x128xf32>
    %c54_162 = arith.constant 54 : index
    %c0_163 = arith.constant 0 : index
    %210 = vector.load %arg24[%c54_162, %c0_163] : memref<81x64xf32, #tpu.memory_space<vmem>>, vector<7x64xf32>
    %211 = arith.truncf %210 : vector<7x64xf32> to vector<7x64xbf16>
    %c0_164 = arith.constant 0 : index
    %c0_165 = arith.constant 0 : index
    %c0_166 = arith.constant 0 : index
    %212 = vector.load %arg5[%c0_164, %c0_165, %c0_166] : memref<9x64x128xbf16, #tpu.memory_space<vmem>>, vector<1x64x128xbf16>
    %213 = vector.shape_cast %212 : vector<1x64x128xbf16> to vector<64x128xbf16>
    %cst_167 = arith.constant dense<0.000000e+00> : vector<7x128xf32>
    %214 = tpu.matmul %211, %213, %cst_167 {dimension_numbers = #tpu.dot_dimension_numbers<[1], [0], [0], [1], [0, 0, 1, 1], [], []>} : vector<7x64xbf16>, vector<64x128xbf16>, vector<7x128xf32> -> vector<7x128xf32>
    %215 = arith.addf %209, %214 : vector<7x128xf32>
    %c55_168 = arith.constant 55 : index
    %c0_169 = arith.constant 0 : index
    %216 = vector.load %arg24[%c55_168, %c0_169] : memref<81x64xf32, #tpu.memory_space<vmem>>, vector<7x64xf32>
    %217 = arith.truncf %216 : vector<7x64xf32> to vector<7x64xbf16>
    %c1_170 = arith.constant 1 : index
    %c0_171 = arith.constant 0 : index
    %c0_172 = arith.constant 0 : index
    %218 = vector.load %arg5[%c1_170, %c0_171, %c0_172] : memref<9x64x128xbf16, #tpu.memory_space<vmem>>, vector<1x64x128xbf16>
    %219 = vector.shape_cast %218 : vector<1x64x128xbf16> to vector<64x128xbf16>
    %cst_173 = arith.constant dense<0.000000e+00> : vector<7x128xf32>
    %220 = tpu.matmul %217, %219, %cst_173 {dimension_numbers = #tpu.dot_dimension_numbers<[1], [0], [0], [1], [0, 0, 1, 1], [], []>} : vector<7x64xbf16>, vector<64x128xbf16>, vector<7x128xf32> -> vector<7x128xf32>
    %221 = arith.addf %215, %220 : vector<7x128xf32>
    %c56_174 = arith.constant 56 : index
    %c0_175 = arith.constant 0 : index
    %222 = vector.load %arg24[%c56_174, %c0_175] : memref<81x64xf32, #tpu.memory_space<vmem>>, vector<7x64xf32>
    %223 = arith.truncf %222 : vector<7x64xf32> to vector<7x64xbf16>
    %c2_176 = arith.constant 2 : index
    %c0_177 = arith.constant 0 : index
    %c0_178 = arith.constant 0 : index
    %224 = vector.load %arg5[%c2_176, %c0_177, %c0_178] : memref<9x64x128xbf16, #tpu.memory_space<vmem>>, vector<1x64x128xbf16>
    %225 = vector.shape_cast %224 : vector<1x64x128xbf16> to vector<64x128xbf16>
    %cst_179 = arith.constant dense<0.000000e+00> : vector<7x128xf32>
    %226 = tpu.matmul %223, %225, %cst_179 {dimension_numbers = #tpu.dot_dimension_numbers<[1], [0], [0], [1], [0, 0, 1, 1], [], []>} : vector<7x64xbf16>, vector<64x128xbf16>, vector<7x128xf32> -> vector<7x128xf32>
    %227 = arith.addf %221, %226 : vector<7x128xf32>
    %c63 = arith.constant 63 : index
    %c0_180 = arith.constant 0 : index
    %228 = vector.load %arg24[%c63, %c0_180] : memref<81x64xf32, #tpu.memory_space<vmem>>, vector<7x64xf32>
    %229 = arith.truncf %228 : vector<7x64xf32> to vector<7x64xbf16>
    %c3_181 = arith.constant 3 : index
    %c0_182 = arith.constant 0 : index
    %c0_183 = arith.constant 0 : index
    %230 = vector.load %arg5[%c3_181, %c0_182, %c0_183] : memref<9x64x128xbf16, #tpu.memory_space<vmem>>, vector<1x64x128xbf16>
    %231 = vector.shape_cast %230 : vector<1x64x128xbf16> to vector<64x128xbf16>
    %cst_184 = arith.constant dense<0.000000e+00> : vector<7x128xf32>
    %232 = tpu.matmul %229, %231, %cst_184 {dimension_numbers = #tpu.dot_dimension_numbers<[1], [0], [0], [1], [0, 0, 1, 1], [], []>} : vector<7x64xbf16>, vector<64x128xbf16>, vector<7x128xf32> -> vector<7x128xf32>
    %233 = arith.addf %227, %232 : vector<7x128xf32>
    %c64 = arith.constant 64 : index
    %c0_185 = arith.constant 0 : index
    %234 = vector.load %arg24[%c64, %c0_185] : memref<81x64xf32, #tpu.memory_space<vmem>>, vector<7x64xf32>
    %235 = arith.truncf %234 : vector<7x64xf32> to vector<7x64xbf16>
    %c4_186 = arith.constant 4 : index
    %c0_187 = arith.constant 0 : index
    %c0_188 = arith.constant 0 : index
    %236 = vector.load %arg5[%c4_186, %c0_187, %c0_188] : memref<9x64x128xbf16, #tpu.memory_space<vmem>>, vector<1x64x128xbf16>
    %237 = vector.shape_cast %236 : vector<1x64x128xbf16> to vector<64x128xbf16>
    %cst_189 = arith.constant dense<0.000000e+00> : vector<7x128xf32>
    %238 = tpu.matmul %235, %237, %cst_189 {dimension_numbers = #tpu.dot_dimension_numbers<[1], [0], [0], [1], [0, 0, 1, 1], [], []>} : vector<7x64xbf16>, vector<64x128xbf16>, vector<7x128xf32> -> vector<7x128xf32>
    %239 = arith.addf %233, %238 : vector<7x128xf32>
    %c65 = arith.constant 65 : index
    %c0_190 = arith.constant 0 : index
    %240 = vector.load %arg24[%c65, %c0_190] : memref<81x64xf32, #tpu.memory_space<vmem>>, vector<7x64xf32>
    %241 = arith.truncf %240 : vector<7x64xf32> to vector<7x64xbf16>
    %c5_191 = arith.constant 5 : index
    %c0_192 = arith.constant 0 : index
    %c0_193 = arith.constant 0 : index
    %242 = vector.load %arg5[%c5_191, %c0_192, %c0_193] : memref<9x64x128xbf16, #tpu.memory_space<vmem>>, vector<1x64x128xbf16>
    %243 = vector.shape_cast %242 : vector<1x64x128xbf16> to vector<64x128xbf16>
    %cst_194 = arith.constant dense<0.000000e+00> : vector<7x128xf32>
    %244 = tpu.matmul %241, %243, %cst_194 {dimension_numbers = #tpu.dot_dimension_numbers<[1], [0], [0], [1], [0, 0, 1, 1], [], []>} : vector<7x64xbf16>, vector<64x128xbf16>, vector<7x128xf32> -> vector<7x128xf32>
    %245 = arith.addf %239, %244 : vector<7x128xf32>
    %c72 = arith.constant 72 : index
    %c0_195 = arith.constant 0 : index
    %246 = vector.load %arg24[%c72, %c0_195] : memref<81x64xf32, #tpu.memory_space<vmem>>, vector<7x64xf32>
    %247 = arith.truncf %246 : vector<7x64xf32> to vector<7x64xbf16>
    %c6_196 = arith.constant 6 : index
    %c0_197 = arith.constant 0 : index
    %c0_198 = arith.constant 0 : index
    %248 = vector.load %arg5[%c6_196, %c0_197, %c0_198] : memref<9x64x128xbf16, #tpu.memory_space<vmem>>, vector<1x64x128xbf16>
    %249 = vector.shape_cast %248 : vector<1x64x128xbf16> to vector<64x128xbf16>
    %cst_199 = arith.constant dense<0.000000e+00> : vector<7x128xf32>
    %250 = tpu.matmul %247, %249, %cst_199 {dimension_numbers = #tpu.dot_dimension_numbers<[1], [0], [0], [1], [0, 0, 1, 1], [], []>} : vector<7x64xbf16>, vector<64x128xbf16>, vector<7x128xf32> -> vector<7x128xf32>
    %251 = arith.addf %245, %250 : vector<7x128xf32>
    %c73 = arith.constant 73 : index
    %c0_200 = arith.constant 0 : index
    %252 = vector.load %arg24[%c73, %c0_200] : memref<81x64xf32, #tpu.memory_space<vmem>>, vector<7x64xf32>
    %253 = arith.truncf %252 : vector<7x64xf32> to vector<7x64xbf16>
    %c7_201 = arith.constant 7 : index
    %c0_202 = arith.constant 0 : index
    %c0_203 = arith.constant 0 : index
    %254 = vector.load %arg5[%c7_201, %c0_202, %c0_203] : memref<9x64x128xbf16, #tpu.memory_space<vmem>>, vector<1x64x128xbf16>
    %255 = vector.shape_cast %254 : vector<1x64x128xbf16> to vector<64x128xbf16>
    %cst_204 = arith.constant dense<0.000000e+00> : vector<7x128xf32>
    %256 = tpu.matmul %253, %255, %cst_204 {dimension_numbers = #tpu.dot_dimension_numbers<[1], [0], [0], [1], [0, 0, 1, 1], [], []>} : vector<7x64xbf16>, vector<64x128xbf16>, vector<7x128xf32> -> vector<7x128xf32>
    %257 = arith.addf %251, %256 : vector<7x128xf32>
    %c74 = arith.constant 74 : index
    %c0_205 = arith.constant 0 : index
    %258 = vector.load %arg24[%c74, %c0_205] : memref<81x64xf32, #tpu.memory_space<vmem>>, vector<7x64xf32>
    %259 = arith.truncf %258 : vector<7x64xf32> to vector<7x64xbf16>
    %c8_206 = arith.constant 8 : index
    %c0_207 = arith.constant 0 : index
    %c0_208 = arith.constant 0 : index
    %260 = vector.load %arg5[%c8_206, %c0_207, %c0_208] : memref<9x64x128xbf16, #tpu.memory_space<vmem>>, vector<1x64x128xbf16>
    %261 = vector.shape_cast %260 : vector<1x64x128xbf16> to vector<64x128xbf16>
    %cst_209 = arith.constant dense<0.000000e+00> : vector<7x128xf32>
    %262 = tpu.matmul %259, %261, %cst_209 {dimension_numbers = #tpu.dot_dimension_numbers<[1], [0], [0], [1], [0, 0, 1, 1], [], []>} : vector<7x64xbf16>, vector<64x128xbf16>, vector<7x128xf32> -> vector<7x128xf32>
    %263 = arith.addf %257, %262 : vector<7x128xf32>
    %cst_210 = arith.constant dense<0.000000e+00> : vector<4x128xf32>
    %264 = tpu.matmul %24, %263, %cst_210 {dimension_numbers = #tpu.dot_dimension_numbers<[1], [0], [0], [1], [0, 0, 1, 1], [], []>} : vector<4x7xf32>, vector<7x128xf32>, vector<4x128xf32> -> vector<4x128xf32>
    %265 = vector.broadcast %25 : vector<1x128xf32> to vector<4x128xf32>
    %266 = arith.addf %264, %265 : vector<4x128xf32>
    %cst_211 = arith.constant 0.000000e+00 : f32
    %267 = vector.broadcast %cst_211 : f32 to vector<4x128xf32>
    %268 = arith.maximumf %266, %267 : vector<4x128xf32>
    %c12 = arith.constant 12 : index
    %c0_212 = arith.constant 0 : index
    %269 = vector.load %arg25[%c12, %c0_212] : memref<16x128xf32, #tpu.memory_space<vmem>>, vector<4x128xf32>
    tpu.vector_store %arg25[%c12, %c0_212], %268 {strides = array<i32>} : memref<16x128xf32, #tpu.memory_space<vmem>>, vector<4x128xf32>,
    %270 = tpu.iota {dimensions = array<i32: 0>} : vector<2x3xi32>
    %271 = tpu.iota {dimensions = array<i32: 1>} : vector<2x3xi32>
    %c2_i32_213 = arith.constant 2 : i32
    %272 = vector.broadcast %c2_i32_213 : i32 to vector<2x3xi32>
    %273 = arith.muli %272, %270 : vector<2x3xi32>
    %274 = arith.cmpi eq, %271, %273 : vector<2x3xi32>
    %275 = arith.extui %274 : vector<2x3xi1> to vector<2x3xi32>
    %276 = arith.sitofp %275 : vector<2x3xi32> to vector<2x3xf32>
    %c0_214 = arith.constant 0 : index
    %c0_215 = arith.constant 0 : index
    %277 = vector.load %arg8[%c0_214, %c0_215] : memref<1x256xf32, #tpu.memory_space<vmem>>, vector<1x256xf32>
    %cst_216 = arith.constant 0.000000e+00 : f32
    %278 = vector.broadcast %cst_216 : f32 to vector<3x256xf32>
    %c0_217 = arith.constant 0 : index
    %c0_218 = arith.constant 0 : index
    %279 = vector.load %arg25[%c0_217, %c0_218] : memref<16x128xf32, #tpu.memory_space<vmem>>, vector<3x128xf32>
    %280 = arith.truncf %279 : vector<3x128xf32> to vector<3x128xbf16>
    %c0_219 = arith.constant 0 : index
    %c0_220 = arith.constant 0 : index
    %c0_221 = arith.constant 0 : index
    %281 = vector.load %arg7[%c0_219, %c0_220, %c0_221] : memref<4x128x256xbf16, #tpu.memory_space<vmem>>, vector<1x128x256xbf16>
    %282 = vector.shape_cast %281 : vector<1x128x256xbf16> to vector<128x256xbf16>
    %cst_222 = arith.constant dense<0.000000e+00> : vector<3x256xf32>
    %283 = tpu.matmul %280, %282, %cst_222 {dimension_numbers = #tpu.dot_dimension_numbers<[1], [0], [0], [1], [0, 0, 1, 1], [], []>} : vector<3x128xbf16>, vector<128x256xbf16>, vector<3x256xf32> -> vector<3x256xf32>
    %284 = arith.addf %278, %283 : vector<3x256xf32>
    %c1_223 = arith.constant 1 : index
    %c0_224 = arith.constant 0 : index
    %285 = vector.load %arg25[%c1_223, %c0_224] : memref<16x128xf32, #tpu.memory_space<vmem>>, vector<3x128xf32>
    %286 = arith.truncf %285 : vector<3x128xf32> to vector<3x128xbf16>
    %c1_225 = arith.constant 1 : index
    %c0_226 = arith.constant 0 : index
    %c0_227 = arith.constant 0 : index
    %287 = vector.load %arg7[%c1_225, %c0_226, %c0_227] : memref<4x128x256xbf16, #tpu.memory_space<vmem>>, vector<1x128x256xbf16>
    %288 = vector.shape_cast %287 : vector<1x128x256xbf16> to vector<128x256xbf16>
    %cst_228 = arith.constant dense<0.000000e+00> : vector<3x256xf32>
    %289 = tpu.matmul %286, %288, %cst_228 {dimension_numbers = #tpu.dot_dimension_numbers<[1], [0], [0], [1], [0, 0, 1, 1], [], []>} : vector<3x128xbf16>, vector<128x256xbf16>, vector<3x256xf32> -> vector<3x256xf32>
    %290 = arith.addf %284, %289 : vector<3x256xf32>
    %c4_229 = arith.constant 4 : index
    %c0_230 = arith.constant 0 : index
    %291 = vector.load %arg25[%c4_229, %c0_230] : memref<16x128xf32, #tpu.memory_space<vmem>>, vector<3x128xf32>
    %292 = arith.truncf %291 : vector<3x128xf32> to vector<3x128xbf16>
    %c2_231 = arith.constant 2 : index
    %c0_232 = arith.constant 0 : index
    %c0_233 = arith.constant 0 : index
    %293 = vector.load %arg7[%c2_231, %c0_232, %c0_233] : memref<4x128x256xbf16, #tpu.memory_space<vmem>>, vector<1x128x256xbf16>
    %294 = vector.shape_cast %293 : vector<1x128x256xbf16> to vector<128x256xbf16>
    %cst_234 = arith.constant dense<0.000000e+00> : vector<3x256xf32>
    %295 = tpu.matmul %292, %294, %cst_234 {dimension_numbers = #tpu.dot_dimension_numbers<[1], [0], [0], [1], [0, 0, 1, 1], [], []>} : vector<3x128xbf16>, vector<128x256xbf16>, vector<3x256xf32> -> vector<3x256xf32>
    %296 = arith.addf %290, %295 : vector<3x256xf32>
    %c5_235 = arith.constant 5 : index
    %c0_236 = arith.constant 0 : index
    %297 = vector.load %arg25[%c5_235, %c0_236] : memref<16x128xf32, #tpu.memory_space<vmem>>, vector<3x128xf32>
    %298 = arith.truncf %297 : vector<3x128xf32> to vector<3x128xbf16>
    %c3_237 = arith.constant 3 : index
    %c0_238 = arith.constant 0 : index
    %c0_239 = arith.constant 0 : index
    %299 = vector.load %arg7[%c3_237, %c0_238, %c0_239] : memref<4x128x256xbf16, #tpu.memory_space<vmem>>, vector<1x128x256xbf16>
    %300 = vector.shape_cast %299 : vector<1x128x256xbf16> to vector<128x256xbf16>
    %cst_240 = arith.constant dense<0.000000e+00> : vector<3x256xf32>
    %301 = tpu.matmul %298, %300, %cst_240 {dimension_numbers = #tpu.dot_dimension_numbers<[1], [0], [0], [1], [0, 0, 1, 1], [], []>} : vector<3x128xbf16>, vector<128x256xbf16>, vector<3x256xf32> -> vector<3x256xf32>
    %302 = arith.addf %296, %301 : vector<3x256xf32>
    %cst_241 = arith.constant dense<0.000000e+00> : vector<2x256xf32>
    %303 = tpu.matmul %276, %302, %cst_241 {dimension_numbers = #tpu.dot_dimension_numbers<[1], [0], [0], [1], [0, 0, 1, 1], [], []>} : vector<2x3xf32>, vector<3x256xf32>, vector<2x256xf32> -> vector<2x256xf32>
    %304 = vector.broadcast %277 : vector<1x256xf32> to vector<2x256xf32>
    %305 = arith.addf %303, %304 : vector<2x256xf32>
    %cst_242 = arith.constant 0.000000e+00 : f32
    %306 = vector.broadcast %cst_242 : f32 to vector<2x256xf32>
    %307 = arith.maximumf %305, %306 : vector<2x256xf32>
    %c0_243 = arith.constant 0 : index
    %c0_244 = arith.constant 0 : index
    %308 = vector.load %arg26[%c0_243, %c0_244] : memref<4x256xf32, #tpu.memory_space<vmem>>, vector<2x256xf32>
    tpu.vector_store %arg26[%c0_243, %c0_244], %307 {strides = array<i32>} : memref<4x256xf32, #tpu.memory_space<vmem>>, vector<2x256xf32>,
    %cst_245 = arith.constant 0.000000e+00 : f32
    %309 = vector.broadcast %cst_245 : f32 to vector<3x256xf32>
    %c8_246 = arith.constant 8 : index
    %c0_247 = arith.constant 0 : index
    %310 = vector.load %arg25[%c8_246, %c0_247] : memref<16x128xf32, #tpu.memory_space<vmem>>, vector<3x128xf32>
    %311 = arith.truncf %310 : vector<3x128xf32> to vector<3x128xbf16>
    %c0_248 = arith.constant 0 : index
    %c0_249 = arith.constant 0 : index
    %c0_250 = arith.constant 0 : index
    %312 = vector.load %arg7[%c0_248, %c0_249, %c0_250] : memref<4x128x256xbf16, #tpu.memory_space<vmem>>, vector<1x128x256xbf16>
    %313 = vector.shape_cast %312 : vector<1x128x256xbf16> to vector<128x256xbf16>
    %cst_251 = arith.constant dense<0.000000e+00> : vector<3x256xf32>
    %314 = tpu.matmul %311, %313, %cst_251 {dimension_numbers = #tpu.dot_dimension_numbers<[1], [0], [0], [1], [0, 0, 1, 1], [], []>} : vector<3x128xbf16>, vector<128x256xbf16>, vector<3x256xf32> -> vector<3x256xf32>
    %315 = arith.addf %309, %314 : vector<3x256xf32>
    %c9_252 = arith.constant 9 : index
    %c0_253 = arith.constant 0 : index
    %316 = vector.load %arg25[%c9_252, %c0_253] : memref<16x128xf32, #tpu.memory_space<vmem>>, vector<3x128xf32>
    %317 = arith.truncf %316 : vector<3x128xf32> to vector<3x128xbf16>
    %c1_254 = arith.constant 1 : index
    %c0_255 = arith.constant 0 : index
    %c0_256 = arith.constant 0 : index
    %318 = vector.load %arg7[%c1_254, %c0_255, %c0_256] : memref<4x128x256xbf16, #tpu.memory_space<vmem>>, vector<1x128x256xbf16>
    %319 = vector.shape_cast %318 : vector<1x128x256xbf16> to vector<128x256xbf16>
    %cst_257 = arith.constant dense<0.000000e+00> : vector<3x256xf32>
    %320 = tpu.matmul %317, %319, %cst_257 {dimension_numbers = #tpu.dot_dimension_numbers<[1], [0], [0], [1], [0, 0, 1, 1], [], []>} : vector<3x128xbf16>, vector<128x256xbf16>, vector<3x256xf32> -> vector<3x256xf32>
    %321 = arith.addf %315, %320 : vector<3x256xf32>
    %c12_258 = arith.constant 12 : index
    %c0_259 = arith.constant 0 : index
    %322 = vector.load %arg25[%c12_258, %c0_259] : memref<16x128xf32, #tpu.memory_space<vmem>>, vector<3x128xf32>
    %323 = arith.truncf %322 : vector<3x128xf32> to vector<3x128xbf16>
    %c2_260 = arith.constant 2 : index
    %c0_261 = arith.constant 0 : index
    %c0_262 = arith.constant 0 : index
    %324 = vector.load %arg7[%c2_260, %c0_261, %c0_262] : memref<4x128x256xbf16, #tpu.memory_space<vmem>>, vector<1x128x256xbf16>
    %325 = vector.shape_cast %324 : vector<1x128x256xbf16> to vector<128x256xbf16>
    %cst_263 = arith.constant dense<0.000000e+00> : vector<3x256xf32>
    %326 = tpu.matmul %323, %325, %cst_263 {dimension_numbers = #tpu.dot_dimension_numbers<[1], [0], [0], [1], [0, 0, 1, 1], [], []>} : vector<3x128xbf16>, vector<128x256xbf16>, vector<3x256xf32> -> vector<3x256xf32>
    %327 = arith.addf %321, %326 : vector<3x256xf32>
    %c13 = arith.constant 13 : index
    %c0_264 = arith.constant 0 : index
    %328 = vector.load %arg25[%c13, %c0_264] : memref<16x128xf32, #tpu.memory_space<vmem>>, vector<3x128xf32>
    %329 = arith.truncf %328 : vector<3x128xf32> to vector<3x128xbf16>
    %c3_265 = arith.constant 3 : index
    %c0_266 = arith.constant 0 : index
    %c0_267 = arith.constant 0 : index
    %330 = vector.load %arg7[%c3_265, %c0_266, %c0_267] : memref<4x128x256xbf16, #tpu.memory_space<vmem>>, vector<1x128x256xbf16>
    %331 = vector.shape_cast %330 : vector<1x128x256xbf16> to vector<128x256xbf16>
    %cst_268 = arith.constant dense<0.000000e+00> : vector<3x256xf32>
    %332 = tpu.matmul %329, %331, %cst_268 {dimension_numbers = #tpu.dot_dimension_numbers<[1], [0], [0], [1], [0, 0, 1, 1], [], []>} : vector<3x128xbf16>, vector<128x256xbf16>, vector<3x256xf32> -> vector<3x256xf32>
    %333 = arith.addf %327, %332 : vector<3x256xf32>
    %cst_269 = arith.constant dense<0.000000e+00> : vector<2x256xf32>
    %334 = tpu.matmul %276, %333, %cst_269 {dimension_numbers = #tpu.dot_dimension_numbers<[1], [0], [0], [1], [0, 0, 1, 1], [], []>} : vector<2x3xf32>, vector<3x256xf32>, vector<2x256xf32> -> vector<2x256xf32>
    %335 = vector.broadcast %277 : vector<1x256xf32> to vector<2x256xf32>
    %336 = arith.addf %334, %335 : vector<2x256xf32>
    %cst_270 = arith.constant 0.000000e+00 : f32
    %337 = vector.broadcast %cst_270 : f32 to vector<2x256xf32>
    %338 = arith.maximumf %336, %337 : vector<2x256xf32>
    %c2_271 = arith.constant 2 : index
    %c0_272 = arith.constant 0 : index
    %339 = vector.load %arg26[%c2_271, %c0_272] : memref<4x256xf32, #tpu.memory_space<vmem>>, vector<2x256xf32>
    tpu.vector_store %arg26[%c2_271, %c0_272], %338 {strides = array<i32>} : memref<4x256xf32, #tpu.memory_space<vmem>>, vector<2x256xf32>,
    %c0_273 = arith.constant 0 : index
    %c0_274 = arith.constant 0 : index
    %340 = vector.load %arg10[%c0_273, %c0_274] : memref<1x16xf32, #tpu.memory_space<vmem>>, vector<1x16xf32>
    %c0_275 = arith.constant 0 : index
    %c0_276 = arith.constant 0 : index
    %341 = vector.load %arg26[%c0_275, %c0_276] : memref<4x256xf32, #tpu.memory_space<vmem>>, vector<1x256xf32>
    %342 = arith.truncf %341 : vector<1x256xf32> to vector<1x256xbf16>
    %c0_277 = arith.constant 0 : index
    %c0_278 = arith.constant 0 : index
    %c0_279 = arith.constant 0 : index
    %343 = vector.load %arg9[%c0_277, %c0_278, %c0_279] : memref<4x256x16xbf16, #tpu.memory_space<vmem>>, vector<1x256x16xbf16>
    %344 = vector.shape_cast %343 : vector<1x256x16xbf16> to vector<256x16xbf16>
    %cst_280 = arith.constant dense<0.000000e+00> : vector<1x16xf32>
    %345 = tpu.matmul %342, %344, %cst_280 {dimension_numbers = #tpu.dot_dimension_numbers<[1], [0], [0], [1], [0, 0, 1, 1], [], []>} : vector<1x256xbf16>, vector<256x16xbf16>, vector<1x16xf32> -> vector<1x16xf32>
    %346 = arith.addf %340, %345 : vector<1x16xf32>
    %c1_281 = arith.constant 1 : index
    %c0_282 = arith.constant 0 : index
    %347 = vector.load %arg26[%c1_281, %c0_282] : memref<4x256xf32, #tpu.memory_space<vmem>>, vector<1x256xf32>
    %348 = arith.truncf %347 : vector<1x256xf32> to vector<1x256xbf16>
    %c1_283 = arith.constant 1 : index
    %c0_284 = arith.constant 0 : index
    %c0_285 = arith.constant 0 : index
    %349 = vector.load %arg9[%c1_283, %c0_284, %c0_285] : memref<4x256x16xbf16, #tpu.memory_space<vmem>>, vector<1x256x16xbf16>
    %350 = vector.shape_cast %349 : vector<1x256x16xbf16> to vector<256x16xbf16>
    %cst_286 = arith.constant dense<0.000000e+00> : vector<1x16xf32>
    %351 = tpu.matmul %348, %350, %cst_286 {dimension_numbers = #tpu.dot_dimension_numbers<[1], [0], [0], [1], [0, 0, 1, 1], [], []>} : vector<1x256xbf16>, vector<256x16xbf16>, vector<1x16xf32> -> vector<1x16xf32>
    %352 = arith.addf %346, %351 : vector<1x16xf32>
    %c2_287 = arith.constant 2 : index
    %c0_288 = arith.constant 0 : index
    %353 = vector.load %arg26[%c2_287, %c0_288] : memref<4x256xf32, #tpu.memory_space<vmem>>, vector<1x256xf32>
    %354 = arith.truncf %353 : vector<1x256xf32> to vector<1x256xbf16>
    %c2_289 = arith.constant 2 : index
    %c0_290 = arith.constant 0 : index
    %c0_291 = arith.constant 0 : index
    %355 = vector.load %arg9[%c2_289, %c0_290, %c0_291] : memref<4x256x16xbf16, #tpu.memory_space<vmem>>, vector<1x256x16xbf16>
    %356 = vector.shape_cast %355 : vector<1x256x16xbf16> to vector<256x16xbf16>
    %cst_292 = arith.constant dense<0.000000e+00> : vector<1x16xf32>
    %357 = tpu.matmul %354, %356, %cst_292 {dimension_numbers = #tpu.dot_dimension_numbers<[1], [0], [0], [1], [0, 0, 1, 1], [], []>} : vector<1x256xbf16>, vector<256x16xbf16>, vector<1x16xf32> -> vector<1x16xf32>
    %358 = arith.addf %352, %357 : vector<1x16xf32>
    %c3_293 = arith.constant 3 : index
    %c0_294 = arith.constant 0 : index
    %359 = vector.load %arg26[%c3_293, %c0_294] : memref<4x256xf32, #tpu.memory_space<vmem>>, vector<1x256xf32>
    %360 = arith.truncf %359 : vector<1x256xf32> to vector<1x256xbf16>
    %c3_295 = arith.constant 3 : index
    %c0_296 = arith.constant 0 : index
    %c0_297 = arith.constant 0 : index
    %361 = vector.load %arg9[%c3_295, %c0_296, %c0_297] : memref<4x256x16xbf16, #tpu.memory_space<vmem>>, vector<1x256x16xbf16>
    %362 = vector.shape_cast %361 : vector<1x256x16xbf16> to vector<256x16xbf16>
    %cst_298 = arith.constant dense<0.000000e+00> : vector<1x16xf32>
    %363 = tpu.matmul %360, %362, %cst_298 {dimension_numbers = #tpu.dot_dimension_numbers<[1], [0], [0], [1], [0, 0, 1, 1], [], []>} : vector<1x256xbf16>, vector<256x16xbf16>, vector<1x16xf32> -> vector<1x16xf32>
    %364 = arith.addf %358, %363 : vector<1x16xf32>
    %c0_299 = arith.constant 0 : index
    %c0_300 = arith.constant 0 : index
    %365 = vector.load %arg21[%c0_299, %c0_300] : memref<4x16xf32, #tpu.memory_space<vmem>>, vector<1x16xf32>
    %c1_301 = arith.constant 1 : index
    %c0_302 = arith.constant 0 : index
    %366 = vector.load %arg21[%c1_301, %c0_302] : memref<4x16xf32, #tpu.memory_space<vmem>>, vector<1x16xf32>
    %c2_303 = arith.constant 2 : index
    %c0_304 = arith.constant 0 : index
    %367 = vector.load %arg21[%c2_303, %c0_304] : memref<4x16xf32, #tpu.memory_space<vmem>>, vector<1x16xf32>
    %c3_305 = arith.constant 3 : index
    %c0_306 = arith.constant 0 : index
    %368 = vector.load %arg21[%c3_305, %c0_306] : memref<4x16xf32, #tpu.memory_space<vmem>>, vector<1x16xf32>
    %c0_307 = arith.constant 0 : index
    %c0_308 = arith.constant 0 : index
    %369 = vector.load %arg11[%c0_307, %c0_308] : memref<32x64xf32, #tpu.memory_space<vmem>>, vector<16x64xf32>
    %cst_309 = arith.constant dense<0.000000e+00> : vector<1x64xf32>
    %370 = tpu.matmul %364, %369, %cst_309 {dimension_numbers = #tpu.dot_dimension_numbers<[1], [0], [0], [1], [0, 0, 1, 1], [], []>} : vector<1x16xf32>, vector<16x64xf32>, vector<1x64xf32> -> vector<1x64xf32>
    %c16 = arith.constant 16 : index
    %c0_310 = arith.constant 0 : index
    %371 = vector.load %arg11[%c16, %c0_310] : memref<32x64xf32, #tpu.memory_space<vmem>>, vector<16x64xf32>
    %cst_311 = arith.constant dense<0.000000e+00> : vector<1x64xf32>
    %372 = tpu.matmul %367, %371, %cst_311 {dimension_numbers = #tpu.dot_dimension_numbers<[1], [0], [0], [1], [0, 0, 1, 1], [], []>} : vector<1x16xf32>, vector<16x64xf32>, vector<1x64xf32> -> vector<1x64xf32>
    %373 = arith.addf %370, %372 : vector<1x64xf32>
    %c0_312 = arith.constant 0 : index
    %c0_313 = arith.constant 0 : index
    %374 = vector.load %arg12[%c0_312, %c0_313] : memref<16x64xf32, #tpu.memory_space<vmem>>, vector<16x64xf32>
    %cst_314 = arith.constant dense<0.000000e+00> : vector<1x64xf32>
    %375 = tpu.matmul %365, %374, %cst_314 {dimension_numbers = #tpu.dot_dimension_numbers<[1], [0], [0], [1], [0, 0, 1, 1], [], []>} : vector<1x16xf32>, vector<16x64xf32>, vector<1x64xf32> -> vector<1x64xf32>
    %376 = arith.addf %373, %375 : vector<1x64xf32>
    %c0_315 = arith.constant 0 : index
    %c0_316 = arith.constant 0 : index
    %377 = vector.load %arg13[%c0_315, %c0_316] : memref<1x64xf32, #tpu.memory_space<vmem>>, vector<1x64xf32>
    %378 = arith.addf %376, %377 : vector<1x64xf32>
    %379 = vector.extract_strided_slice %378 {offsets = [0, 0], sizes = [1, 16], strides = [1, 1]} : vector<1x64xf32> to vector<1x16xf32>
    %380 = arith.negf %379 : vector<1x16xf32>
    %381 = math.exp %380 : vector<1x16xf32>
    %cst_317 = arith.constant 1.000000e+00 : f32
    %382 = vector.broadcast %cst_317 : f32 to vector<1x16xf32>
    %383 = arith.addf %382, %381 : vector<1x16xf32>
    %384 = arith.divf %382, %383 : vector<1x16xf32>
    %385 = vector.extract_strided_slice %378 {offsets = [0, 16], sizes = [1, 16], strides = [1, 1]} : vector<1x64xf32> to vector<1x16xf32>
    %386 = arith.negf %385 : vector<1x16xf32>
    %387 = math.exp %386 : vector<1x16xf32>
    %cst_318 = arith.constant 1.000000e+00 : f32
    %388 = vector.broadcast %cst_318 : f32 to vector<1x16xf32>
    %389 = arith.addf %388, %387 : vector<1x16xf32>
    %390 = arith.divf %388, %389 : vector<1x16xf32>
    %391 = vector.extract_strided_slice %378 {offsets = [0, 32], sizes = [1, 16], strides = [1, 1]} : vector<1x64xf32> to vector<1x16xf32>
    %392 = math.tanh %391 : vector<1x16xf32>
    %393 = vector.extract_strided_slice %378 {offsets = [0, 48], sizes = [1, 16], strides = [1, 1]} : vector<1x64xf32> to vector<1x16xf32>
    %394 = arith.negf %393 : vector<1x16xf32>
    %395 = math.exp %394 : vector<1x16xf32>
    %cst_319 = arith.constant 1.000000e+00 : f32
    %396 = vector.broadcast %cst_319 : f32 to vector<1x16xf32>
    %397 = arith.addf %396, %395 : vector<1x16xf32>
    %398 = arith.divf %396, %397 : vector<1x16xf32>
    %399 = arith.mulf %390, %366 : vector<1x16xf32>
    %400 = arith.mulf %384, %392 : vector<1x16xf32>
    %401 = arith.addf %399, %400 : vector<1x16xf32>
    %402 = math.tanh %401 : vector<1x16xf32>
    %403 = arith.mulf %398, %402 : vector<1x16xf32>
    %c0_320 = arith.constant 0 : index
    %c0_321 = arith.constant 0 : index
    %404 = vector.load %arg17[%c0_320, %c0_321] : memref<16x1xf32, #tpu.memory_space<vmem>>, vector<16x1xf32>
    %cst_322 = arith.constant dense<0.000000e+00> : vector<1x1xf32>
    %405 = tpu.matmul %403, %404, %cst_322 {dimension_numbers = #tpu.dot_dimension_numbers<[1], [0], [0], [1], [0, 0, 1, 1], [], []>} : vector<1x16xf32>, vector<16x1xf32>, vector<1x1xf32> -> vector<1x1xf32>
    %c0_323 = arith.constant 0 : index
    %c0_324 = arith.constant 0 : index
    %406 = vector.load %arg18[%c0_323, %c0_324] : memref<1x1xf32, #tpu.memory_space<vmem>>, vector<1x1xf32>
    %407 = arith.addf %405, %406 : vector<1x1xf32>
    %c0_325 = arith.constant 0 : index
    %c0_326 = arith.constant 0 : index
    %408 = vector.load %arg19[%c0_325, %c0_326] : memref<16x2xf32, #tpu.memory_space<vmem>>, vector<16x2xf32>
    %cst_327 = arith.constant dense<0.000000e+00> : vector<1x2xf32>
    %409 = tpu.matmul %403, %408, %cst_327 {dimension_numbers = #tpu.dot_dimension_numbers<[1], [0], [0], [1], [0, 0, 1, 1], [], []>} : vector<1x16xf32>, vector<16x2xf32>, vector<1x2xf32> -> vector<1x2xf32>
    %c0_328 = arith.constant 0 : index
    %c0_329 = arith.constant 0 : index
    %410 = vector.load %arg20[%c0_328, %c0_329] : memref<1x2xf32, #tpu.memory_space<vmem>>, vector<1x2xf32>
    %411 = arith.addf %409, %410 : vector<1x2xf32>
    %cst_330 = arith.constant dense<0xFF800000> : vector<1xf32>
    %412 = vector.multi_reduction <maximumf>, %411, %cst_330 [1] : vector<1x2xf32> to vector<1xf32>
    %413 = vector.shape_cast %412 : vector<1xf32> to vector<1x1xf32>
    %414 = vector.broadcast %413 : vector<1x1xf32> to vector<1x2xf32>
    %415 = arith.subf %411, %414 : vector<1x2xf32>
    %416 = math.exp %415 : vector<1x2xf32>
    %cst_331 = arith.constant dense<0.000000e+00> : vector<1xf32>
    %417 = vector.multi_reduction <add>, %416, %cst_331 [1] : vector<1x2xf32> to vector<1xf32>
    %418 = vector.shape_cast %417 : vector<1xf32> to vector<1x1xf32>
    %419 = tpu.reciprocal %418 {approx = true} : vector<1x1xf32> -> vector<1x1xf32>
    %420 = vector.broadcast %419 : vector<1x1xf32> to vector<1x2xf32>
    %421 = arith.mulf %416, %420 : vector<1x2xf32>
    %422 = vector.broadcast %413 : vector<1x1xf32> to vector<1x2xf32>
    %423 = arith.subf %411, %422 : vector<1x2xf32>
    %424 = math.log %418 : vector<1x1xf32>
    %425 = vector.broadcast %424 : vector<1x1xf32> to vector<1x2xf32>
    %426 = arith.subf %423, %425 : vector<1x2xf32>
    %427 = arith.mulf %426, %421 : vector<1x2xf32>
    %cst_332 = arith.constant dense<0.000000e+00> : vector<1xf32>
    %428 = vector.multi_reduction <add>, %427, %cst_332 [1] : vector<1x2xf32> to vector<1xf32>
    %429 = vector.shape_cast %428 : vector<1xf32> to vector<1x1xf32>
    %cst_333 = arith.constant 0.000000e+00 : f32
    %430 = vector.broadcast %cst_333 : f32 to vector<1x1xf32>
    %431 = arith.subf %430, %429 : vector<1x1xf32>
    %432 = tpu.iota {dimensions = array<i32: 1>} : vector<1x2xi32>
    %433 = arith.sitofp %432 : vector<1x2xi32> to vector<1x2xf32>
    %cst_334 = arith.constant dense<0xFF800000> : vector<1xf32>
    %434 = vector.multi_reduction <maximumf>, %421, %cst_334 [1] : vector<1x2xf32> to vector<1xf32>
    %435 = vector.shape_cast %434 : vector<1xf32> to vector<1x1xf32>
    %436 = vector.broadcast %435 : vector<1x1xf32> to vector<1x2xf32>
    %437 = arith.cmpf oge, %421, %436 : vector<1x2xf32>
    %cst_335 = arith.constant 2.000000e+00 : f32
    %438 = vector.broadcast %cst_335 : f32 to vector<1x2xf32>
    %439 = arith.select %437, %433, %438 : vector<1x2xi1>, vector<1x2xf32>
    %cst_336 = arith.constant dense<0x7F800000> : vector<1xf32>
    %440 = vector.multi_reduction <minimumf>, %439, %cst_336 [1] : vector<1x2xf32> to vector<1xf32>
    %441 = vector.shape_cast %440 : vector<1xf32> to vector<1x1xf32>
    %442 = vector.broadcast %441 : vector<1x1xf32> to vector<1x2xf32>
    %443 = arith.cmpf oeq, %433, %442 : vector<1x2xf32>
    %444 = arith.extui %443 : vector<1x2xi1> to vector<1x2xi32>
    %445 = arith.sitofp %444 : vector<1x2xi32> to vector<1x2xf32>
    %446 = arith.mulf %445, %426 : vector<1x2xf32>
    %cst_337 = arith.constant dense<0.000000e+00> : vector<1xf32>
    %447 = vector.multi_reduction <add>, %446, %cst_337 [1] : vector<1x2xf32> to vector<1xf32>
    %448 = vector.shape_cast %447 : vector<1xf32> to vector<1x1xf32>
    %c0_338 = arith.constant 0 : index
    %c0_339 = arith.constant 0 : index
    %449 = vector.load %arg14[%c0_338, %c0_339] : memref<18x64xf32, #tpu.memory_space<vmem>>, vector<16x64xf32>
    %cst_340 = arith.constant dense<0.000000e+00> : vector<1x64xf32>
    %450 = tpu.matmul %364, %449, %cst_340 {dimension_numbers = #tpu.dot_dimension_numbers<[1], [0], [0], [1], [0, 0, 1, 1], [], []>} : vector<1x16xf32>, vector<16x64xf32>, vector<1x64xf32> -> vector<1x64xf32>
    %c16_341 = arith.constant 16 : index
    %c0_342 = arith.constant 0 : index
    %451 = vector.load %arg14[%c16_341, %c0_342] : memref<18x64xf32, #tpu.memory_space<vmem>>, vector<2x64xf32>
    %cst_343 = arith.constant dense<0.000000e+00> : vector<1x64xf32>
    %452 = tpu.matmul %445, %451, %cst_343 {dimension_numbers = #tpu.dot_dimension_numbers<[1], [0], [0], [1], [0, 0, 1, 1], [], []>} : vector<1x2xf32>, vector<2x64xf32>, vector<1x64xf32> -> vector<1x64xf32>
    %453 = arith.addf %450, %452 : vector<1x64xf32>
    %c0_344 = arith.constant 0 : index
    %c0_345 = arith.constant 0 : index
    %454 = vector.load %arg15[%c0_344, %c0_345] : memref<16x64xf32, #tpu.memory_space<vmem>>, vector<16x64xf32>
    %cst_346 = arith.constant dense<0.000000e+00> : vector<1x64xf32>
    %455 = tpu.matmul %367, %454, %cst_346 {dimension_numbers = #tpu.dot_dimension_numbers<[1], [0], [0], [1], [0, 0, 1, 1], [], []>} : vector<1x16xf32>, vector<16x64xf32>, vector<1x64xf32> -> vector<1x64xf32>
    %456 = arith.addf %453, %455 : vector<1x64xf32>
    %c0_347 = arith.constant 0 : index
    %c0_348 = arith.constant 0 : index
    %457 = vector.load %arg16[%c0_347, %c0_348] : memref<1x64xf32, #tpu.memory_space<vmem>>, vector<1x64xf32>
    %458 = arith.addf %456, %457 : vector<1x64xf32>
    %459 = vector.extract_strided_slice %458 {offsets = [0, 0], sizes = [1, 16], strides = [1, 1]} : vector<1x64xf32> to vector<1x16xf32>
    %460 = arith.negf %459 : vector<1x16xf32>
    %461 = math.exp %460 : vector<1x16xf32>
    %cst_349 = arith.constant 1.000000e+00 : f32
    %462 = vector.broadcast %cst_349 : f32 to vector<1x16xf32>
    %463 = arith.addf %462, %461 : vector<1x16xf32>
    %464 = arith.divf %462, %463 : vector<1x16xf32>
    %465 = vector.extract_strided_slice %458 {offsets = [0, 16], sizes = [1, 16], strides = [1, 1]} : vector<1x64xf32> to vector<1x16xf32>
    %466 = arith.negf %465 : vector<1x16xf32>
    %467 = math.exp %466 : vector<1x16xf32>
    %cst_350 = arith.constant 1.000000e+00 : f32
    %468 = vector.broadcast %cst_350 : f32 to vector<1x16xf32>
    %469 = arith.addf %468, %467 : vector<1x16xf32>
    %470 = arith.divf %468, %469 : vector<1x16xf32>
    %471 = vector.extract_strided_slice %458 {offsets = [0, 32], sizes = [1, 16], strides = [1, 1]} : vector<1x64xf32> to vector<1x16xf32>
    %472 = math.tanh %471 : vector<1x16xf32>
    %473 = vector.extract_strided_slice %458 {offsets = [0, 48], sizes = [1, 16], strides = [1, 1]} : vector<1x64xf32> to vector<1x16xf32>
    %474 = arith.negf %473 : vector<1x16xf32>
    %475 = math.exp %474 : vector<1x16xf32>
    %cst_351 = arith.constant 1.000000e+00 : f32
    %476 = vector.broadcast %cst_351 : f32 to vector<1x16xf32>
    %477 = arith.addf %476, %475 : vector<1x16xf32>
    %478 = arith.divf %476, %477 : vector<1x16xf32>
    %479 = arith.mulf %470, %368 : vector<1x16xf32>
    %480 = arith.mulf %464, %472 : vector<1x16xf32>
    %481 = arith.addf %479, %480 : vector<1x16xf32>
    %482 = math.tanh %481 : vector<1x16xf32>
    %483 = arith.mulf %478, %482 : vector<1x16xf32>
    %cst_352 = arith.constant 0.000000e+00 : f32
    %484 = vector.broadcast %cst_352 : f32 to vector<8x128xf32>
    %c0_353 = arith.constant 0 : index
    %c0_354 = arith.constant 0 : index
    %485 = vector.load %arg22[%c0_353, %c0_354] : memref<8x128xf32, #tpu.memory_space<vmem>>, vector<8x128xf32>
    tpu.vector_store %arg22[%c0_353, %c0_354], %484 {strides = array<i32>} : memref<8x128xf32, #tpu.memory_space<vmem>>, vector<8x128xf32>,
    %c0_355 = arith.constant 0 : index
    %c0_356 = arith.constant 0 : index
    %486 = vector.load %arg22[%c0_355, %c0_356] : memref<8x128xf32, #tpu.memory_space<vmem>>, vector<1x16xf32>
    tpu.vector_store %arg22[%c0_355, %c0_356], %364 {strides = array<i32>} : memref<8x128xf32, #tpu.memory_space<vmem>>, vector<1x16xf32>,
    %c1_357 = arith.constant 1 : index
    %c0_358 = arith.constant 0 : index
    %487 = vector.load %arg22[%c1_357, %c0_358] : memref<8x128xf32, #tpu.memory_space<vmem>>, vector<1x16xf32>
    tpu.vector_store %arg22[%c1_357, %c0_358], %403 {strides = array<i32>} : memref<8x128xf32, #tpu.memory_space<vmem>>, vector<1x16xf32>,
    %c2_359 = arith.constant 2 : index
    %c0_360 = arith.constant 0 : index
    %488 = vector.load %arg22[%c2_359, %c0_360] : memref<8x128xf32, #tpu.memory_space<vmem>>, vector<1x16xf32>
    tpu.vector_store %arg22[%c2_359, %c0_360], %401 {strides = array<i32>} : memref<8x128xf32, #tpu.memory_space<vmem>>, vector<1x16xf32>,
    %c3_361 = arith.constant 3 : index
    %c0_362 = arith.constant 0 : index
    %489 = vector.load %arg22[%c3_361, %c0_362] : memref<8x128xf32, #tpu.memory_space<vmem>>, vector<1x16xf32>
    tpu.vector_store %arg22[%c3_361, %c0_362], %483 {strides = array<i32>} : memref<8x128xf32, #tpu.memory_space<vmem>>, vector<1x16xf32>,
    %c4_363 = arith.constant 4 : index
    %c0_364 = arith.constant 0 : index
    %490 = vector.load %arg22[%c4_363, %c0_364] : memref<8x128xf32, #tpu.memory_space<vmem>>, vector<1x16xf32>
    tpu.vector_store %arg22[%c4_363, %c0_364], %481 {strides = array<i32>} : memref<8x128xf32, #tpu.memory_space<vmem>>, vector<1x16xf32>,
    %c5_365 = arith.constant 5 : index
    %c0_366 = arith.constant 0 : index
    %491 = vector.load %arg22[%c5_365, %c0_366] : memref<8x128xf32, #tpu.memory_space<vmem>>, vector<1x1xf32>
    tpu.vector_store %arg22[%c5_365, %c0_366], %407 {strides = array<i32>} : memref<8x128xf32, #tpu.memory_space<vmem>>, vector<1x1xf32>,
    %c5_367 = arith.constant 5 : index
    %c1_368 = arith.constant 1 : index
    %492 = vector.load %arg22[%c5_367, %c1_368] : memref<8x128xf32, #tpu.memory_space<vmem>>, vector<1x1xf32>
    tpu.vector_store %arg22[%c5_367, %c1_368], %431 {strides = array<i32>} : memref<8x128xf32, #tpu.memory_space<vmem>>, vector<1x1xf32>,
    %c5_369 = arith.constant 5 : index
    %c2_370 = arith.constant 2 : index
    %493 = vector.load %arg22[%c5_369, %c2_370] : memref<8x128xf32, #tpu.memory_space<vmem>>, vector<1x1xf32>
    tpu.vector_store %arg22[%c5_369, %c2_370], %448 {strides = array<i32>} : memref<8x128xf32, #tpu.memory_space<vmem>>, vector<1x1xf32>,
    %c5_371 = arith.constant 5 : index
    %c3_372 = arith.constant 3 : index
    %494 = vector.load %arg22[%c5_371, %c3_372] : memref<8x128xf32, #tpu.memory_space<vmem>>, vector<1x1xf32>
    tpu.vector_store %arg22[%c5_371, %c3_372], %441 {strides = array<i32>} : memref<8x128xf32, #tpu.memory_space<vmem>>, vector<1x1xf32>,
    %c5_373 = arith.constant 5 : index
    %c4_374 = arith.constant 4 : index
    %495 = vector.load %arg22[%c5_373, %c4_374] : memref<8x128xf32, #tpu.memory_space<vmem>>, vector<1x2xf32>
    tpu.vector_store %arg22[%c5_373, %c4_374], %421 {strides = array<i32>} : memref<8x128xf32, #tpu.memory_space<vmem>>, vector<1x2xf32>,
    %c5_375 = arith.constant 5 : index
    %c6_376 = arith.constant 6 : index
    %496 = vector.load %arg22[%c5_375, %c6_376] : memref<8x128xf32, #tpu.memory_space<vmem>>, vector<1x2xf32>
    tpu.vector_store %arg22[%c5_375, %c6_376], %426 {strides = array<i32>} : memref<8x128xf32, #tpu.memory_space<vmem>>, vector<1x2xf32>,
    return
  }
}

</mosaic_0001>

<bundles_post_ra>
// kernel: forward.1
= control target key start
LH: loop header
LB: loop body
LE: loop exit
PB: predicated region body
PF: predicated region fallthrough
CT: control target
= control target key end

     0   :  { %v74_v0 = vlaneseq  ;;  %v12379_v10 = vmov 0.0   ;;  %s14678_s0 = inlined_call_operand.vmem [shape: f32[1764,3], index: 0, kind: input, shape index: {}]   ;;  %s14679_s1 = inlined_call_operand.vmem [shape: bf16[16,3,32], index: 1, kind: input, shape index: {}]   ;;  %s14680_s2 = inlined_call_operand.vmem [shape: f32[1,32], index: 2, kind: input, shape index: {}]   ;;  %s14681_s3 = inlined_call_operand.vmem [shape: bf16[16,32,64], index: 3, kind: input, shape index: {}]   ;;  %s14682_s4 = inlined_call_operand.vmem [shape: f32[1,64], index: 4, kind: input, shape index: {}]   ;;  %s14683_s5 = inlined_call_operand.vmem [shape: bf16[9,64,128], index: 5, kind: input, shape index: {}]   ;;  %s14684_s6 = inlined_call_operand.vmem [shape: f32[1,128], index: 6, kind: input, shape index: {}]   ;;  %s14685_s7 = inlined_call_operand.vmem [shape: bf16[4,128,256], index: 7, kind: input, shape index: {}]   ;;  %s14686_s8 = inlined_call_operand.vmem [shape: f32[1,256], index: 8, kind: input, shape index: {}]   ;;  %s14687_s9 = inlined_call_operand.vmem [shape: bf16[4,256,16], index: 9, kind: input, shape index: {}]   ;;  %s14688_s10 = inlined_call_operand.vmem [shape: f32[1,16], index: 10, kind: input, shape index: {}]   ;;  %s14689_s11 = inlined_call_operand.vmem [shape: f32[32,64], index: 11, kind: input, shape index: {}]   ;;  %s14690_s12 = inlined_call_operand.vmem [shape: f32[16,64], index: 12, kind: input, shape index: {}]   ;;  %s14691_s13 = inlined_call_operand.vmem [shape: f32[1,64], index: 13, kind: input, shape index: {}]   ;;  %s14692_s14 = inlined_call_operand.vmem [shape: f32[18,64], index: 14, kind: input, shape index: {}]   ;;  %s14693_s15 = inlined_call_operand.vmem [shape: f32[16,64], index: 15, kind: input, shape index: {}]   ;;  %s14694_s16 = inlined_call_operand.vmem [shape: f32[1,64], index: 16, kind: input, shape index: {}]   ;;  %s14695_s17 = inlined_call_operand.vmem [shape: f32[16,1], index: 17, kind: input, shape index: {}]   ;;  %s14696_s18 = inlined_call_operand.<no memory space> [shape: f32[1,1], index: 18, kind: input, shape index: {}]   ;;  %s14697_s19 = inlined_call_operand.vmem [shape: f32[16,2], index: 19, kind: input, shape index: {}]   ;;  %s14698_s20 = inlined_call_operand.vmem [shape: f32[1,2], index: 20, kind: input, shape index: {}]   ;;  %s14699_s21 = inlined_call_operand.vmem [shape: f32[4,16], index: 21, kind: input, shape index: {}]   ;;  %s14700_s22 = inlined_call_operand.vmem [shape: f32[8,128], index: 22, kind: output, shape index: {}]  }
   0x1   :  { %14722 = sst [smem:[#allocation22_spill]] %s14678_s0  ;;  %v27_v1 = vstv %s14696_s18  ;;  %s12536_s18 = smov 0  }
   0x2   :  { %14723 = sst [smem:[#allocation23_spill]] %s14679_s1  ;;  %28 = vst [vmem:[#allocation6] sm:$0x1] %v27_v1  ;;  %v12517_v3 = vshrl.u32 %v74_v0, 7  ;;  %v12519_v4 = vand.u32 127, %v74_v0 }
   0x3   :  { %14724 = sst [smem:[#allocation24_spill]] %s14680_s2 }
   0x4   :  { %14725 = sst [smem:[#allocation25_spill]] %s14681_s3  ;;  %14730 = vst [vmem:[#allocation7_spill] sm:$0xff] %v12517_v3  ;;  %14731 = vst [vmem:[#allocation8_spill] sm:$0xff] %v12519_v4  ;;  %v76_v5 = vadd.s32 8, %v12517_v3  ;;  %v77_v6 = vadd.s32 16, %v12517_v3  ;;  %v80_v7 = vmul.u32 2, %v12517_v3 }
   0x5   :  { %14726 = sst [smem:[#allocation26_spill]] %s14682_s4  ;;  %s14729_s4 = sld [smem:[#allocation24_spill]] }
   0x6   :  { %14727 = sst [smem:[#allocation27_spill]] %s14683_s5  ;;  %v81_v8 = vmul.u32 2, %v76_v5  ;;  %v82_v9 = vmul.u32 2, %v77_v6  ;;  %vm83_vm0 = vcmp.eq.s32.totalorder %v12519_v4, %v80_v7 }
   0x7   :  { %14728 = sst [smem:[#allocation28_spill]] %s14684_s6  ;;  %v12526_v11 = vsel %vm83_vm0, 1.0, %v12379_v10 }
   0x8   :  { %vm84_vm1 = vcmp.eq.s32.totalorder %v12519_v4, %v81_v8  ;;  %vm85_vm2 = vcmp.eq.s32.totalorder %v12519_v4, %v82_v9 }
   0x9   :  { %v12531_v12 = vsel %vm84_vm1, 1.0, %v12379_v10  ;;  %v12534_v13 = vsel %vm85_vm2, 1.0, %v12379_v10 }
   0xb   :  { %v12515_v2 = vld [vmem:[%s14729_s4] ss:$0 sm:$0xff] }
   0xc LB: > { %s14732_s1 = sld [smem:[#allocation23_spill]]  ;;  %vm132_vm3 = vcmask 1040384   ;;  %vm133_vm4 = vcmask 1041408   ;;  %v12380_v15 = vmov 0.0   ;;  %v12381_v16 = vmov 65535   ;;  %s99_s6 = smul.u32 84, %s12373_s18  ;;  %s12373_s18 = sphi %s12536_s18, %s98_s18  }
   0xd   : > { %10668 = vmatprep.subr.bf16.mxu1 %v12380_v15  ;;  %10766 = vmatprep.subr.bf16.mxu0 %v12380_v15  ;;  %v134_v17 = vsel %vm132_vm3, 4294967295, %v12381_v16  ;;  %vm12382_vm5 = vmmov 0   ;;  %s14733_s3 = sld [smem:[#allocation22_spill]]  ;;  %vm122_vm6 = vcmask 23552   ;;  %vm1473_vm7 = vcmask 1046528  }
   0xe   : > { %v12551_v19 = vsel %vm133_vm4, %v134_v17, 0  ;;  %10670 = vmatprep.mubr.msk.bf16.mxu1 %vm12382_vm5, %v12380_v15  ;;  %10768 = vmatprep.mubr.msk.bf16.mxu0 %vm12382_vm5, %v12380_v15  ;;  %vm1463_vm8 = vcmask 318464   ;;  %vm1562_vm9 = vcmask 261120   ;;  %vm1565_vm10 = vcmask 257024  }
  0x12   : > { %v9022_v14 = vld [vmem:[%s14732_s1 + $0x2] sm:$0x3]  ;;  %v9087_v18 = vld [vmem:[%s14732_s1 + $0xe] sm:$0x3]  ;;  %v9098_v22 = vld [vmem:[%s14732_s1 + $0x10] sm:$0x3] }
  0x13   : > { %v137_v20 = vand.u32 %v9022_v14, %v12551_v19  ;;  %v12560_v21 = vand.u32 %v9087_v18, %v12551_v19  ;;  %s12568_s28 = scalar_lea.vmem %s14733_s3, %s99_s6  ;;  %v109_v23 = vld [vmem:[%s14732_s1] sm:$0x3]  ;;  %v798_v29 = vand.u32 %v9098_v22, %v12551_v19  ;;  %v9109_v37 = vld [vmem:[%s14732_s1 + $0x12] sm:$0x3]  ;;  %v9034_v47 = vld [vmem:[%s14732_s1 + $0x4] sm:$0x3] }
  0x14   : > { %v9017_v24 = vld [vmem:[%s12568_s28 + $0x1] sm:$0xff]  ;;  %v9018_v25 = vld [vmem:[%s12568_s28 + $0x9] sm:$0xff]  ;;  %v9083_v28 = vld [vmem:[%s12568_s28 + $0x35] sm:$0xff]  ;;  %v205_v31 = vand.u32 %v12551_v19, %v109_v23  ;;  %v883_v40 = vand.u32 %v9109_v37, %v12551_v19  ;;  %v285_v49 = vand.u32 %v9034_v47, %v12551_v19 }
  0x15   : > { %10669 = vmatpush3.bf16.msra.mxu1 %v137_v20  ;;  %10767 = vmatpush3.bf16.msra.mxu0 %v12560_v21  ;;  %v9082_v26 = vld [vmem:[%s12568_s28 + $0x2d] sm:$0xff]  ;;  %v117_v27 = vpack.c.bf16 %v9018_v25, %v9017_v24  ;;  %v9020_v33 = vld [vmem:[%s12568_s28 + $0x19] sm:$0xff]  ;;  %v9021_v39 = vld [vmem:[%s12568_s28 + $0x21] sm:$0x7f] }
  0x16   : > { %10780 = vmatprep.subr.bf16.mxu0 %v12380_v15  ;;  %10682 = vmatprep.subr.bf16.mxu1 %v12380_v15  ;;  %v697_v30 = vpack.c.bf16 %v9083_v28, %v9082_v26  ;;  %v9019_v32 = vld [vmem:[%s12568_s28 + $0x11] sm:$0xff]  ;;  %v9094_v36 = vld [vmem:[%s12568_s28 + $0x5c] sm:$0xff]  ;;  %v119_v41 = vpack.c.bf16 %v9021_v39, %v9021_v39  ;;  %v9095_v42 = vld [vmem:[%s12568_s28 + $0x64] sm:$0xff] }
  0x17   : > { %v118_v34 = vpack.c.bf16 %v9020_v33, %v9019_v32  ;;  %v9093_v35 = vld [vmem:[%s12568_s28 + $0x54] sm:$0xff]  ;;  %v9096_v43 = vld [vmem:[%s12568_s28 + $0x6c] sm:$0xff]  ;;  %v101_v45 = vld [vmem:[%s12568_s28] sm:$0xff] }
  0x18   : > { %10671 = vmatmul.mubr.msk.bf16.vlgmr.msra.gmra.mrb[0].mxu1 %vm122_vm6, %v117_v27  ;;  %10769 = vmatmul.mubr.msk.bf16.vlgmr.msra.gmra.mrb[0].mxu0 %vm122_vm6, %v697_v30  ;;  %v783_v38 = vpack.c.bf16 %v9094_v36, %v9093_v35  ;;  %v784_v44 = vpack.c.bf16 %v9096_v43, %v9095_v42  ;;  %v102_v46 = vld [vmem:[%s12568_s28 + $0x8] sm:$0xff]  ;;  %v9097_v50 = vld [vmem:[%s12568_s28 + $0x74] sm:$0x7f]  ;;  %v9105_v56 = vld [vmem:[%s12568_s28 + $0x5d] sm:$0xff] }
  0x19   : > { %10674 = vmatprep.mubr.msk.bf16.mxu1 %vm12382_vm5, %v12380_v15  ;;  %10781 = vmatpush3.bf16.msra.mxu0 %v798_v29  ;;  %v106_v48 = vpack.c.bf16 %v102_v46, %v101_v45  ;;  %v785_v51 = vpack.c.bf16 %v9097_v50, %v9097_v50  ;;  %v103_v52 = vld [vmem:[%s12568_s28 + $0x10] sm:$0xff]  ;;  %v104_v53 = vld [vmem:[%s12568_s28 + $0x18] sm:$0xff]  ;;  %v105_v59 = vld [vmem:[%s12568_s28 + $0x20] sm:$0x7f] }
  0x1a   : > { %10782 = vmatprep.mubr.msk.bf16.mxu0 %vm12382_vm5, %v12380_v15  ;;  %10794 = vmatprep.subr.bf16.mxu0 %v12380_v15  ;;  %v107_v54 = vpack.c.bf16 %v104_v53, %v103_v52  ;;  %v9104_v55 = vld [vmem:[%s12568_s28 + $0x55] sm:$0xff]  ;;  %v108_v61 = vpack.c.bf16 %v105_v59, %v105_v59  ;;  %v9106_v62 = vld [vmem:[%s12568_s28 + $0x65] sm:$0xff]  ;;  %v9107_v63 = vld [vmem:[%s12568_s28 + $0x6d] sm:$0xff] }
  0x1b   : > { %10683 = vmatpush3.bf16.msra.mxu1 %v205_v31  ;;  %v9120_v57 = vld [vmem:[%s14732_s1 + $0x14] sm:$0x3]  ;;  %v868_v58 = vpack.c.bf16 %v9105_v56, %v9104_v55  ;;  %v869_v0 = vpack.c.bf16 %v9107_v63, %v9106_v62  ;;  %v9029_v1 = vld [vmem:[%s12568_s28 + $0x2] sm:$0xff]  ;;  %v9030_v5 = vld [vmem:[%s12568_s28 + $0xa] sm:$0xff] }
  0x1c   : > { %10696 = vmatprep.subr.bf16.mxu1 %v12380_v15  ;;  %v968_v60 = vand.u32 %v9120_v57, %v12551_v19  ;;  %v9043_v6 = vld [vmem:[%s14732_s1 + $0x6] sm:$0x3]  ;;  %v270_v7 = vpack.c.bf16 %v9030_v5, %v9029_v1  ;;  %v9108_v9 = vld [vmem:[%s12568_s28 + $0x75] sm:$0x7f]  ;;  %v9116_v22 = vld [vmem:[%s12568_s28 + $0x5e] sm:$0xff] }
  0x1d   : > { %v370_v8 = vand.u32 %v9043_v6, %v12551_v19  ;;  %v870_v14 = vpack.c.bf16 %v9108_v9, %v9108_v9  ;;  %v9031_v16 = vld [vmem:[%s12568_s28 + $0x12] sm:$0xff]  ;;  %v9032_v17 = vld [vmem:[%s12568_s28 + $0x1a] sm:$0xff]  ;;  %v9033_v25 = vld [vmem:[%s12568_s28 + $0x22] sm:$0x7f] }
  0x1e   : > { %v271_v18 = vpack.c.bf16 %v9032_v17, %v9031_v16  ;;  %v9115_v20 = vld [vmem:[%s12568_s28 + $0x56] sm:$0xff]  ;;  %v272_v27 = vpack.c.bf16 %v9033_v25, %v9033_v25  ;;  %v9117_v28 = vld [vmem:[%s12568_s28 + $0x66] sm:$0xff]  ;;  %v9118_v29 = vld [vmem:[%s12568_s28 + $0x6e] sm:$0xff] }
  0x1f   : > { %v9131_v23 = vld [vmem:[%s14732_s1 + $0x16] sm:$0x3]  ;;  %v953_v24 = vpack.c.bf16 %v9116_v22, %v9115_v20  ;;  %v954_v30 = vpack.c.bf16 %v9118_v29, %v9117_v28  ;;  %v9038_v31 = vld [vmem:[%s12568_s28 + $0x3] sm:$0xff]  ;;  %v9039_v32 = vld [vmem:[%s12568_s28 + $0xb] sm:$0xff] }
  0x20   : > { %10675 = vmatmul.mubr.msk.bf16.gmra.mrb[4].mxu1 %vm122_vm6, %v118_v34  ;;  %v1053_v26 = vand.u32 %v9131_v23, %v12551_v19  ;;  %v9054_v33 = vld [vmem:[%s14732_s1 + $0x8] sm:$0x3]  ;;  %v355_v34 = vpack.c.bf16 %v9039_v32, %v9038_v31  ;;  %v9119_v36 = vld [vmem:[%s12568_s28 + $0x76] sm:$0x7f]  ;;  %v9127_v42 = vld [vmem:[%s12568_s28 + $0x5f] sm:$0xff] }
  0x21   : > { %10678 = vmatprep.mubr.msk.bf16.mxu1 %vm12382_vm5, %v12380_v15  ;;  %v457_v35 = vand.u32 %v9054_v33, %v12551_v19  ;;  %v955_v37 = vpack.c.bf16 %v9119_v36, %v9119_v36  ;;  %v9041_v39 = vld [vmem:[%s12568_s28 + $0x1b] sm:$0xff]  ;;  %v9142_v43 = vld [vmem:[%s14732_s1 + $0x18] sm:$0x3]  ;;  %v9042_v45 = vld [vmem:[%s12568_s28 + $0x23] sm:$0x7f] }
  0x22   : > { %v1139_v46 = vand.u32 %v9142_v43, %v12551_v19  ;;  %v357_v47 = vpack.c.bf16 %v9042_v45, %v9042_v45  ;;  %v9050_v52 = vld [vmem:[%s12568_s28 + $0x32] sm:$0xff]  ;;  %v9065_v53 = vld [vmem:[%s14732_s1 + $0xa] sm:$0x3]  ;;  %v9052_v59 = vld [vmem:[%s12568_s28 + $0x42] sm:$0xff] }
  0x23   : > { %v542_v55 = vand.u32 %v9065_v53, %v12551_v19  ;;  %v9130_v56 = vld [vmem:[%s12568_s28 + $0x77] sm:$0x7f]  ;;  %v9138_v62 = vld [vmem:[%s12568_s28 + $0x86] sm:$0xff]  ;;  %v9141_v22 = vld [vmem:[%s12568_s28 + $0x9e] sm:$0x7f] }
  0x24   : > { %10783 = vmatmul.mubr.msk.bf16.vlgmr.msra.gmra.mrb[0].mxu0 %vm122_vm6, %v783_v38  ;;  %v9040_v38 = vld [vmem:[%s12568_s28 + $0x13] sm:$0xff]  ;;  %v1040_v57 = vpack.c.bf16 %v9130_v56, %v9130_v56  ;;  %v9053_v1 = vld [vmem:[%s12568_s28 + $0x4a] sm:$0x7f]  ;;  %v1126_v23 = vpack.c.bf16 %v9141_v22, %v9141_v22  ;;  %v9164_v29 = vld [vmem:[%s14732_s1 + $0x1c] sm:$0x3] }
  0x25   : > { %10795 = vmatpush3.bf16.msra.mxu0 %v883_v40  ;;  %10786 = vmatprep.mubr.msk.bf16.mxu0 %vm12382_vm5, %v12380_v15  ;;  %v356_v40 = vpack.c.bf16 %v9041_v39, %v9040_v38  ;;  %v9153_v63 = vld [vmem:[%s14732_s1 + $0x1a] sm:$0x3]  ;;  %v444_v6 = vpack.c.bf16 %v9053_v1, %v9053_v1  ;;  %v9076_v17 = vld [vmem:[%s14732_s1 + $0xc] sm:$0x3]  ;;  %v9063_v25 = vld [vmem:[%s12568_s28 + $0x43] sm:$0xff]  ;;  %v1309_v32 = vand.u32 %v9164_v29, %v12551_v19 }
  0x26   : > { %10808 = vmatprep.subr.bf16.mxu0 %v12380_v15  ;;  %v1224_v5 = vand.u32 %v9153_v63, %v12551_v19  ;;  %v9061_v16 = vld [vmem:[%s12568_s28 + $0x33] sm:$0xff]  ;;  %v627_v20 = vand.u32 %v9076_v17, %v12551_v19  ;;  %v9149_v28 = vld [vmem:[%s12568_s28 + $0x87] sm:$0xff]  ;;  %v9163_v56 = vld [vmem:[%s12568_s28 + $0xa0] sm:$0x7f] }
  0x27   : > { %v9064_v31 = vld [vmem:[%s12568_s28 + $0x4b] sm:$0x7f]  ;;  %v9072_v38 = vld [vmem:[%s12568_s28 + $0x34] sm:$0xff]  ;;  %v9159_v45 = vld [vmem:[%s12568_s28 + $0x80] sm:$0xff] }
  0x28   : > { %10679 = vmatmul.mubr.msk.bf16.gmra.mrb[8].mxu1 %vm122_vm6, %v119_v41  ;;  %v9126_v41 = vld [vmem:[%s12568_s28 + $0x57] sm:$0xff]  ;;  %v529_v33 = vpack.c.bf16 %v9064_v31, %v9064_v31  ;;  %v9074_v43 = vld [vmem:[%s12568_s28 + $0x44] sm:$0xff] }
  0x29   : > { %10684 = vmatprep.mubr.msk.bf16.mxu1 %vm12382_vm5, %v12380_v15  ;;  %v9172_v63 = vld [vmem:[%s12568_s28 + $0x91] sm:$0xff] }
  0x2c   : > { %10787 = vmatmul.mubr.msk.bf16.gmra.mrb[4].mxu0 %vm122_vm6, %v784_v44  ;;  %v1038_v44 = vpack.c.bf16 %v9127_v42, %v9126_v41  ;;  %v9073_v42 = vld [vmem:[%s12568_s28 + $0x3c] sm:$0xff] }
  0x2d   : > { %10790 = vmatprep.mubr.msk.bf16.mxu0 %vm12382_vm5, %v12380_v15 }
  0x30   : > { %10685 = vmatmul.mubr.msk.bf16.vlgmr.msra.gmra.mrb[0].mxu1 %vm122_vm6, %v106_v48  ;;  %v9128_v48 = vld [vmem:[%s12568_s28 + $0x67] sm:$0xff] }
  0x31   : > { %10688 = vmatprep.mubr.msk.bf16.mxu1 %vm12382_vm5, %v12380_v15  ;;  %10697 = vmatpush3.bf16.msra.mxu1 %v285_v49  ;;  %v9129_v49 = vld [vmem:[%s12568_s28 + $0x6f] sm:$0xff] }
  0x32   : > { %10710 = vmatprep.subr.bf16.mxu1 %v12380_v15  ;;  %v1039_v50 = vpack.c.bf16 %v9129_v49, %v9128_v48 }
  0x34   : > { %10791 = vmatmul.mubr.msk.bf16.gmra.mrb[8].mxu0 %vm122_vm6, %v785_v51  ;;  %v9049_v51 = vld [vmem:[%s12568_s28 + $0x2a] sm:$0xff] }
  0x35   : > { %10796 = vmatprep.mubr.msk.bf16.mxu0 %vm12382_vm5, %v12380_v15 }
  0x38   : > { %10689 = vmatmul.mubr.msk.bf16.gmra.mrb[4].mxu1 %vm122_vm6, %v107_v54  ;;  %v442_v54 = vpack.c.bf16 %v9050_v52, %v9049_v51  ;;  %v9161_v51 = vld [vmem:[%s12568_s28 + $0x90] sm:$0xff]  ;;  %v9162_v52 = vld [vmem:[%s12568_s28 + $0x98] sm:$0xff] }
  0x39   : > { %10692 = vmatprep.mubr.msk.bf16.mxu1 %vm12382_vm5, %v12380_v15  ;;  %v1295_v53 = vpack.c.bf16 %v9162_v52, %v9161_v51 }
  0x3c   : > { %10797 = vmatmul.mubr.msk.bf16.vlgmr.msra.gmra.mrb[0].mxu0 %vm122_vm6, %v868_v58  ;;  %v9051_v58 = vld [vmem:[%s12568_s28 + $0x3a] sm:$0xff] }
  0x3d   : > { %10809 = vmatpush3.bf16.msra.mxu0 %v968_v60  ;;  %10800 = vmatprep.mubr.msk.bf16.mxu0 %vm12382_vm5, %v12380_v15  ;;  %v443_v60 = vpack.c.bf16 %v9052_v59, %v9051_v58  ;;  %v9086_v58 = vld [vmem:[%s12568_s28 + $0x4d] sm:$0x7f] }
  0x3e   : > { %10822 = vmatprep.subr.bf16.mxu0 %v12380_v15  ;;  %v699_v59 = vpack.c.bf16 %v9086_v58, %v9086_v58 }
  0x40   : > { %10693 = vmatmul.mubr.msk.bf16.gmra.mrb[8].mxu1 %vm122_vm6, %v108_v61  ;;  %v9137_v61 = vld [vmem:[%s12568_s28 + $0x7e] sm:$0xff] }
  0x41   : > { %10698 = vmatprep.mubr.msk.bf16.mxu1 %vm12382_vm5, %v12380_v15 }
  0x44   : > { %10801 = vmatmul.mubr.msk.bf16.gmra.mrb[4].mxu0 %vm122_vm6, %v869_v0  ;;  %v1124_v0 = vpack.c.bf16 %v9138_v62, %v9137_v61  ;;  %v9171_v61 = vld [vmem:[%s12568_s28 + $0x89] sm:$0xff] }
  0x45   : > { %10804 = vmatprep.mubr.msk.bf16.mxu0 %vm12382_vm5, %v12380_v15 }
  0x48   : > { %10699 = vmatmul.mubr.msk.bf16.vlgmr.msra.gmra.mrb[0].mxu1 %vm122_vm6, %v270_v7  ;;  %v9139_v7 = vld [vmem:[%s12568_s28 + $0x8e] sm:$0xff] }
  0x49   : > { %10702 = vmatprep.mubr.msk.bf16.mxu1 %vm12382_vm5, %v12380_v15  ;;  %10711 = vmatpush3.bf16.msra.mxu1 %v370_v8  ;;  %v9140_v8 = vld [vmem:[%s12568_s28 + $0x96] sm:$0xff] }
  0x4a   : > { %10724 = vmatprep.subr.bf16.mxu1 %v12380_v15  ;;  %v1125_v9 = vpack.c.bf16 %v9140_v8, %v9139_v7  ;;  %v12383_v7 = vmov 0.0|0.0  }
  0x4c   : > { %10805 = vmatmul.mubr.msk.bf16.gmra.mrb[8].mxu0 %vm122_vm6, %v870_v14  ;;  %v9060_v14 = vld [vmem:[%s12568_s28 + $0x2b] sm:$0xff] }
  0x4d   : > { %10810 = vmatprep.mubr.msk.bf16.mxu0 %vm12382_vm5, %v12380_v15 }
  0x50   : > { %10703 = vmatmul.mubr.msk.bf16.gmra.mrb[4].mxu1 %vm122_vm6, %v271_v18  ;;  %v527_v18 = vpack.c.bf16 %v9061_v16, %v9060_v14 }
  0x51   : > { %10706 = vmatprep.mubr.msk.bf16.mxu1 %vm12382_vm5, %v12380_v15 }
  0x54   : > { %10811 = vmatmul.mubr.msk.bf16.vlgmr.msra.gmra.mrb[0].mxu0 %vm122_vm6, %v953_v24  ;;  %v9062_v24 = vld [vmem:[%s12568_s28 + $0x3b] sm:$0xff] }
  0x55   : > { %10823 = vmatpush3.bf16.msra.mxu0 %v1053_v26  ;;  %10814 = vmatprep.mubr.msk.bf16.mxu0 %vm12382_vm5, %v12380_v15  ;;  %v528_v26 = vpack.c.bf16 %v9063_v25, %v9062_v24 }
  0x56   : > { %10836 = vmatprep.subr.bf16.mxu0 %v12380_v15 }
  0x58   : > { %10707 = vmatmul.mubr.msk.bf16.gmra.mrb[8].mxu1 %vm122_vm6, %v272_v27  ;;  %v9148_v27 = vld [vmem:[%s12568_s28 + $0x7f] sm:$0xff] }
  0x59   : > { %10712 = vmatprep.mubr.msk.bf16.mxu1 %vm12382_vm5, %v12380_v15 }
  0x5c   : > { %10815 = vmatmul.mubr.msk.bf16.gmra.mrb[4].mxu0 %vm122_vm6, %v954_v30  ;;  %v1209_v30 = vpack.c.bf16 %v9149_v28, %v9148_v27 }
  0x5d   : > { %10818 = vmatprep.mubr.msk.bf16.mxu0 %vm12382_vm5, %v12380_v15 }
  0x60   : > { %10713 = vmatmul.mubr.msk.bf16.vlgmr.msra.gmra.mrb[0].mxu1 %vm122_vm6, %v355_v34  ;;  %v9150_v34 = vld [vmem:[%s12568_s28 + $0x8f] sm:$0xff] }
  0x61   : > { %10716 = vmatprep.mubr.msk.bf16.mxu1 %vm12382_vm5, %v12380_v15  ;;  %10725 = vmatpush3.bf16.msra.mxu1 %v457_v35  ;;  %v9151_v35 = vld [vmem:[%s12568_s28 + $0x97] sm:$0xff] }
  0x62   : > { %10738 = vmatprep.subr.bf16.mxu1 %v12380_v15  ;;  %v1210_v36 = vpack.c.bf16 %v9151_v35, %v9150_v34 }
  0x64   : > { %10819 = vmatmul.mubr.msk.bf16.gmra.mrb[8].mxu0 %vm122_vm6, %v955_v37  ;;  %v9071_v37 = vld [vmem:[%s12568_s28 + $0x2c] sm:$0xff] }
  0x65   : > { %10824 = vmatprep.mubr.msk.bf16.mxu0 %vm12382_vm5, %v12380_v15  ;;  %v612_v39 = vpack.c.bf16 %v9072_v38, %v9071_v37 }
  0x68   : > { %10717 = vmatmul.mubr.msk.bf16.gmra.mrb[4].mxu1 %vm122_vm6, %v356_v40  ;;  %v9152_v40 = vld [vmem:[%s12568_s28 + $0x9f] sm:$0x7f] }
  0x69   : > { %10720 = vmatprep.mubr.msk.bf16.mxu1 %vm12382_vm5, %v12380_v15  ;;  %v1211_v41 = vpack.c.bf16 %v9152_v40, %v9152_v40 }
  0x6c   : > { %10825 = vmatmul.mubr.msk.bf16.vlgmr.msra.gmra.mrb[0].mxu0 %vm122_vm6, %v1038_v44  ;;  %v613_v44 = vpack.c.bf16 %v9074_v43, %v9073_v42 }
  0x6d   : > { %10837 = vmatpush3.bf16.msra.mxu0 %v1139_v46  ;;  %10828 = vmatprep.mubr.msk.bf16.mxu0 %vm12382_vm5, %v12380_v15  ;;  %v9160_v46 = vld [vmem:[%s12568_s28 + $0x88] sm:$0xff] }
  0x6e   : > { %10850 = vmatprep.subr.bf16.mxu0 %v12380_v15  ;;  %v1294_v48 = vpack.c.bf16 %v9160_v46, %v9159_v45 }
  0x70   : > { %10721 = vmatmul.mubr.msk.bf16.gmra.mrb[8].mxu1 %vm122_vm6, %v357_v47  ;;  %v9175_v47 = vld [vmem:[%s14732_s1 + $0x1e] sm:$0x3] }
  0x71   : > { %10726 = vmatprep.mubr.msk.bf16.mxu1 %vm12382_vm5, %v12380_v15  ;;  %v1394_v49 = vand.u32 %v9175_v47, %v12551_v19  ;;  %v9085_v19 = vld [vmem:[%s12568_s28 + $0x45] sm:$0xff] }
  0x74   : > { %10829 = vmatmul.mubr.msk.bf16.gmra.mrb[4].mxu0 %vm122_vm6, %v1039_v50 }
  0x75   : > { %10832 = vmatprep.mubr.msk.bf16.mxu0 %vm12382_vm5, %v12380_v15 }
  0x78   : > { %10727 = vmatmul.mubr.msk.bf16.vlgmr.msra.gmra.mrb[0].mxu1 %vm122_vm6, %v442_v54  ;;  %v9084_v54 = vld [vmem:[%s12568_s28 + $0x3d] sm:$0xff] }
  0x79   : > { %10730 = vmatprep.mubr.msk.bf16.mxu1 %vm12382_vm5, %v12380_v15  ;;  %10739 = vmatpush3.bf16.msra.mxu1 %v542_v55  ;;  %v698_v55 = vpack.c.bf16 %v9085_v19, %v9084_v54 }
  0x7a   : > { %10752 = vmatprep.subr.bf16.mxu1 %v12380_v15 }
  0x7c   : > { %10833 = vmatmul.mubr.msk.bf16.gmra.mrb[8].mxu0 %vm122_vm6, %v1040_v57  ;;  %v1296_v57 = vpack.c.bf16 %v9163_v56, %v9163_v56 }
  0x7d   : > { %10838 = vmatprep.mubr.msk.bf16.mxu0 %vm12382_vm5, %v12380_v15 }
  0x80   : > { %10731 = vmatmul.mubr.msk.bf16.gmra.mrb[4].mxu1 %vm122_vm6, %v443_v60  ;;  %v9170_v60 = vld [vmem:[%s12568_s28 + $0x81] sm:$0xff] }
  0x81   : > { %10734 = vmatprep.mubr.msk.bf16.mxu1 %vm12382_vm5, %v12380_v15  ;;  %v1379_v62 = vpack.c.bf16 %v9171_v61, %v9170_v60 }
  0x84   : > { %10839 = vmatmul.mubr.msk.bf16.vlgmr.msra.gmra.mrb[0].mxu0 %vm122_vm6, %v1124_v0  ;;  %v9173_v0 = vld [vmem:[%s12568_s28 + $0x99] sm:$0xff] }
  0x85   : > { %10851 = vmatpush3.bf16.msra.mxu0 %v1224_v5  ;;  %10842 = vmatprep.mubr.msk.bf16.mxu0 %vm12382_vm5, %v12380_v15  ;;  %v1380_v1 = vpack.c.bf16 %v9173_v0, %v9172_v63  ;;  %v9174_v5 = vld [vmem:[%s12568_s28 + $0xa1] sm:$0x7f] }
  0x86   : > { %10864 = vmatprep.subr.bf16.mxu0 %v12380_v15 }
  0x88   : > { %10735 = vmatmul.mubr.msk.bf16.gmra.mrb[8].mxu1 %vm122_vm6, %v444_v6  ;;  %v1381_v6 = vpack.c.bf16 %v9174_v5, %v9174_v5 }
  0x89   : > { %10740 = vmatprep.mubr.msk.bf16.mxu1 %vm12382_vm5, %v12380_v15 }
  0x8c   : > { %10843 = vmatmul.mubr.msk.bf16.gmra.mrb[4].mxu0 %vm122_vm6, %v1125_v9 }
  0x8d   : > { %10846 = vmatprep.mubr.msk.bf16.mxu0 %vm12382_vm5, %v12380_v15 }
  0x90   : > { %10741 = vmatmul.mubr.msk.bf16.vlgmr.msra.gmra.mrb[0].mxu1 %vm122_vm6, %v527_v18 }
  0x91   : > { %10744 = vmatprep.mubr.msk.bf16.mxu1 %vm12382_vm5, %v12380_v15  ;;  %10753 = vmatpush3.bf16.msra.mxu1 %v627_v20 }
  0x92   : > { %11585 = vmatprep.subr.bf16.mxu1 %v12380_v15 }
  0x94   : > { %10847 = vmatmul.mubr.msk.bf16.gmra.mrb[8].mxu0 %vm122_vm6, %v1126_v23 }
  0x95   : > { %10852 = vmatprep.mubr.msk.bf16.mxu0 %vm12382_vm5, %v12380_v15 }
  0x98   : > { %10745 = vmatmul.mubr.msk.bf16.gmra.mrb[4].mxu1 %vm122_vm6, %v528_v26 }
  0x99   : > { %10748 = vmatprep.mubr.msk.bf16.mxu1 %vm12382_vm5, %v12380_v15 }
  0x9c   : > { %10853 = vmatmul.mubr.msk.bf16.vlgmr.msra.gmra.mrb[0].mxu0 %vm122_vm6, %v1209_v30 }
  0x9d   : > { %10865 = vmatpush3.bf16.msra.mxu0 %v1309_v32  ;;  %10856 = vmatprep.mubr.msk.bf16.mxu0 %vm12382_vm5, %v12380_v15 }
  0x9e   : > { %10878 = vmatprep.subr.bf16.mxu0 %v12380_v15 }
  0xa0   : > { %10749 = vmatmul.mubr.msk.bf16.gmra.mrb[8].mxu1 %vm122_vm6, %v529_v33 }
  0xa1   : > { %10754 = vmatprep.mubr.msk.bf16.mxu1 %vm12382_vm5, %v12380_v15 }
  0xa4   : > { %10857 = vmatmul.mubr.msk.bf16.gmra.mrb[4].mxu0 %vm122_vm6, %v1210_v36 }
  0xa5   : > { %10860 = vmatprep.mubr.msk.bf16.mxu0 %vm12382_vm5, %v12380_v15 }
  0xa8   : > { %10755 = vmatmul.mubr.msk.bf16.vlgmr.msra.gmra.mrb[0].mxu1 %vm122_vm6, %v612_v39 }
  0xa9   : > { %10758 = vmatprep.mubr.msk.bf16.mxu1 %vm12382_vm5, %v12380_v15  ;;  %11586 = vmatpush3.bf16.msra.mxu1 %v12560_v21  ;;  %v9075_v21 = vld [vmem:[%s12568_s28 + $0x4c] sm:$0x7f]  ;;  %s1560_s28 = smul.u32 20, %s12373_s18  ;;  %s98_s18 = sadd.s32 1, %s12373_s18  }
  0xaa   : > { %v614_v50 = vpack.c.bf16 %v9075_v21, %v9075_v21  ;;  %11554 = vmatprep.subr.bf16.mxu1 %v12383_v7  ;;  %p95_p0 = scmp.ge.s32.totalorder %s98_s18, 20  }
  0xab   : > { %s1561_s29 = scalar_lea.vmem [#allocation2], %s1560_s28  ;;  %s14734_s0 = sld [smem:[#allocation26_spill]] (%p95_p0) }
  0xac   : > { %10861 = vmatmul.mubr.msk.bf16.gmra.mrb[8].mxu0 %vm122_vm6, %v1211_v41  ;;  %s12885_s23 = smov (%p95_p0), 0  }
  0xad   : > { %10866 = vmatprep.mubr.msk.bf16.mxu0 %vm12382_vm5, %v12380_v15 }
  0xb0   : > { %10759 = vmatmul.mubr.msk.bf16.gmra.mrb[4].mxu1 %vm122_vm6, %v613_v44 }
  0xb1   : > { %10762 = vmatprep.mubr.msk.bf16.mxu1 %vm12382_vm5, %v12380_v15 }
  0xb4   : > { %10867 = vmatmul.mubr.msk.bf16.vlgmr.msra.gmra.mrb[0].mxu0 %vm122_vm6, %v1294_v48 }
  0xb5   : > { %10879 = vmatpush3.bf16.msra.mxu0 %v1394_v49  ;;  %10870 = vmatprep.mubr.msk.bf16.mxu0 %vm12382_vm5, %v12380_v15 }
  0xb8   : > { %10763 = vmatmul.mubr.msk.bf16.gmra.mrb[8].mxu1 %vm122_vm6, %v614_v50 }
  0xb9   : > { %10772 = vmatprep.mubr.msk.bf16.mxu1 %vm12382_vm5, %v12380_v15 }
  0xbc   : > { %10871 = vmatmul.mubr.msk.bf16.gmra.mrb[4].mxu0 %vm122_vm6, %v1295_v53 }
  0xbd   : > { %10874 = vmatprep.mubr.msk.bf16.mxu0 %vm12382_vm5, %v12380_v15 }
  0xc0   : > { %10773 = vmatmul.mubr.msk.bf16.vlgmr.msra.gmra.mrb[4].mxu1 %vm122_vm6, %v698_v55  ;;  %v12883_v55 = vld [vmem:[%s14734_s0] ss:$0 sm:$0xff] (%p95_p0) }
  0xc1   : > { %10776 = vmatprep.mubr.msk.bf16.mxu1 %vm12382_vm5, %v12380_v15 }
  0xc4   : > { %10875 = vmatmul.mubr.msk.bf16.gmra.mrb[8].mxu0 %vm122_vm6, %v1296_v57 }
  0xc5   : > { %10880 = vmatprep.mubr.msk.bf16.mxu0 %vm12382_vm5, %v12380_v15 }
  0xc8   : > { %10777 = vmatmul.mubr.msk.bf16.gmra.mrb[8].mxu1 %vm122_vm6, %v699_v59 }
  0xc9   : > { %10902 = vmatprep.mubr.msk.f32.mxu1 %vm12382_vm5, %v12380_v15 }
  0xcc   : > { %10881 = vmatmul.mubr.msk.bf16.vlgmr.msra.gmra.mrb[0].mxu0 %vm122_vm6, %v1379_v62 }
  0xcd   : > { %10884 = vmatprep.mubr.msk.bf16.mxu0 %vm12382_vm5, %v12380_v15 }
  0xd4   : > { %10885 = vmatmul.mubr.msk.bf16.gmra.mrb[4].mxu0 %vm122_vm6, %v1380_v1 }
  0xd5   : > { %10888 = vmatprep.mubr.msk.bf16.mxu0 %vm12382_vm5, %v12380_v15 }
  0xdc   : > { %10889 = vmatmul.mubr.msk.bf16.gmra.mrb[8].mxu0 %vm122_vm6, %v1381_v6 }
 0x17b   : > { %v663_v8 = vpop.f32.mrb[0].mxu1 }
 0x17c   : > { %v10756_v9 = vpop.f32.mrb[1].mxu1 }
 0x17d   : > { %v666_v14 = vpop.f32.mrb[2].mxu1 }
 0x17e   : > { %v10757_v16 = vpop.f32.mrb[3].mxu1 }
 0x193   : > { %v756_v17 = vpop.f32.mrb[4].mxu1 }
 0x194   : > { %v10774_v18 = vpop.f32.mrb[5].mxu1 }
 0x195   : > { %v759_v20 = vpop.f32.mrb[6].mxu1 }
 0x196   : > { %v10775_v22 = vpop.f32.mrb[7].mxu1 }
 0x19b   : > { %v764_v23 = vpop.f32.mrb[8].mxu1 }
 0x19c   : > { %v10778_v24 = vpop.f32.mrb[9].mxu1 }
 0x19d   : > { %v767_v25 = vpop.f32.mrb[10].mxu1 }
 0x19e   : > { %v10779_v26 = vpop.f32.mrb[11].mxu1 }
 0x19f   : > { %v1430_v27 = vpop.f32.mrb[0].mxu0 }
 0x1a0   : > { %v11587_v28 = vadd.f32 %v1430_v27, %v663_v8  ;;  %v10882_v29 = vpop.f32.mrb[1].mxu0 }
 0x1a1   : > { %v1433_v30 = vpop.f32.mrb[2].mxu0 }
 0x1a2   : > { %v11588_v31 = vadd.f32 %v1433_v30, %v666_v14  ;;  %v10883_v32 = vpop.f32.mrb[3].mxu0 }
 0x1a4   : > { %v11555_v33 = vpack.c.bf16 %v11588_v31, %v11587_v28 }
 0x1a6   : > { %11556 = vmatpush3.bf16.msra.mxu1 %v11555_v33 }
 0x1a7   : > { %v1438_v34 = vpop.f32.mrb[4].mxu0  ;;  %11557 = vmatprep.subr.bf16.mxu1 %v12383_v7 }
 0x1a8   : > { %v11589_v35 = vadd.f32 %v1438_v34, %v756_v17  ;;  %v10886_v36 = vpop.f32.mrb[5].mxu0 }
 0x1a9   : > { %v1441_v37 = vpop.f32.mrb[6].mxu0 }
 0x1aa   : > { %v11590_v38 = vadd.f32 %v1441_v37, %v759_v20  ;;  %v10887_v39 = vpop.f32.mrb[7].mxu0 }
 0x1ac   : > { %v11558_v40 = vpack.c.bf16 %v11590_v38, %v11589_v35 }
 0x1ae   : > { %11559 = vmatpush3.bf16.msra.mxu1 %v11558_v40 }
 0x1af   : > { %v1446_v41 = vpop.f32.mrb[8].mxu0  ;;  %10900 = vmatprep.subr.mxu1 %v12380_v15 }
 0x1b0   : > { %v11591_v42 = vadd.f32 %v1446_v41, %v764_v23  ;;  %v10890_v43 = vpop.f32.mrb[9].mxu0 }
 0x1b1   : > { %v1449_v44 = vpop.f32.mrb[10].mxu0 }
 0x1b2   : > { %v10891_v45 = vpop.f32.mrb[11].mxu0  ;;  %10901 = vmatpush3.msk.msra.mxu1 %vm1473_vm7, %v11591_v42 }
 0x1b3   : > { %10903 = vmatmul.mubr.msk.f32.vlgmr.msra.gmra.mrb[12].mxu1 %vm1463_vm8, %v12526_v11 }
 0x1b4   : > { %10905 = vmatprep.mubr.msk.f32.mxu1 %vm12382_vm5, %v12380_v15 }
 0x1b7   : > { %10906 = vmatmul.mubr.msk.f32.gmra.mrb[14].mxu1 %vm1463_vm8, %v12531_v12 }
 0x1b8   : > { %10908 = vmatprep.mubr.msk.f32.mxu1 %vm12382_vm5, %v12380_v15 }
 0x1bb   : > { %10909 = vmatmul.mubr.msk.f32.gmra.mrb[16].mxu1 %vm1463_vm8, %v12534_v13 }
 0x286   : > { %v1543_v46 = vpop.f32.mrb[12].mxu1 }
 0x287   : > { %v1544_v47 = vadd.f32 %v12515_v2, %v1543_v46  ;;  %v10904_v48 = vpop.f32.mrb[13].mxu1 }
 0x289   : > { %v1557_v21 = vmax.f32 %v1544_v47, 0.0 }
 0x28a   : > { %v1548_v49 = vpop.f32.mrb[14].mxu1 }
 0x28b   : > { %1563 = vst.msk [vmem:[%s1561_s29] sm:$0xff] %vm1562_vm9, %v1557_v21  ;;  %v1549_v50 = vadd.f32 %v12515_v2, %v1548_v49  ;;  %v10907_v51 = vpop.f32.mrb[15].mxu1 }
 0x28d   : > { %v1558_v52 = vmax.f32 %v1549_v50, 0.0  ;;  %97 = sbr.rel (!%p95_p0) target bundleno = 12 (0xc), region = 203 }
 0x28e   : > { %v1553_v53 = vpop.f32.mrb[16].mxu1 }
 0x28f   : > { %1564 = vst.msk [vmem:[%s1561_s29 + $0x8] sm:$0xff] %vm1562_vm9, %v1558_v52  ;;  %v1554_v15 = vadd.f32 %v12515_v2, %v1553_v53  ;;  %v10910_v54 = vpop.f32.mrb[17].mxu1 }
 0x291   : > { %v1559_v19 = vmax.f32 %v1554_v15, 0.0 }
 0x293   : > { %1566 = vst.msk [vmem:[%s1561_s29 + $0x10] sm:$0xf] %vm1565_vm10, %v1559_v19 }
 0x294 LB: > { %s14735_s6 = sld [smem:[#allocation25_spill]]  ;;  %s1574_s2 = smul.u32 40, %s12377_s23  ;;  %vm2874_vm11 = vcmask 138240   ;;  %vm2966_vm12 = vcmask 516096   ;;  %vm2964_vm13 = vcmask 523264   ;;  %s12377_s23 = sphi %s12885_s23, %s1573_s23  }
 0x296   : > { %s12906_s30 = scalar_lea.vmem [#allocation2], %s1574_s2 }
 0x29a   : > { %v12002_v56 = vld [vmem:[%s14735_s6 + $0x10] sm:$0xff]   ;;  %v12003_v2 = vld [vmem:[%s14735_s6 + $0x80] sm:$0xff]   ;;  %v12004_v13 = vld [vmem:[%s14735_s6 + $0x18] sm:$0xff]  }
 0x29b   : > { %10911 = vmatprep.subr.bf16.mxu1 %v12002_v56  ;;  %10975 = vmatprep.subr.bf16.mxu0 %v12003_v2  ;;  %v12005_v57 = vld [vmem:[%s14735_s6 + $0x88] sm:$0xff]   ;;  %v12006_v58 = vld [vmem:[%s14735_s6] sm:$0xff]   ;;  %v9276_v63 = vld [vmem:[%s12906_s30 + $0x30] sm:$0xff] }
 0x29c   : > { %10912 = vmatpush3.bf16.msra.mxu1 %v12002_v56  ;;  %10976 = vmatpush3.bf16.msra.mxu0 %v12003_v2  ;;  %v9184_v59 = vld [vmem:[%s12906_s30 + $0x1] sm:$0xff]  ;;  %v9185_v60 = vld [vmem:[%s12906_s30 + $0x9] sm:$0xff]  ;;  %v9186_v0 = vld [vmem:[%s12906_s30 + $0x11] sm:$0x1] }
 0x29d   : > { %10913 = vmatprep.subr.bf16.mxu1 %v12004_v13  ;;  %10977 = vmatprep.subr.bf16.mxu0 %v12005_v57  ;;  %v9275_v61 = vld [vmem:[%s12906_s30 + $0x28] sm:$0xff]  ;;  %v1590_v62 = vpack.c.bf16 %v9185_v60, %v9184_v59  ;;  %v9277_v1 = vld [vmem:[%s12906_s30 + $0x38] sm:$0x1]  ;;  %v1591_v6 = vpack.c.bf16 %v9186_v0, %v9186_v0  ;;  %v12007_v8 = vld [vmem:[%s14735_s6 + $0x90] sm:$0xff]  }
 0x29e   : > { %v2224_v5 = vpack.c.bf16 %v9276_v63, %v9275_v61  ;;  %v2225_v7 = vpack.c.bf16 %v9277_v1, %v9277_v1  ;;  %v12008_v9 = vld [vmem:[%s14735_s6 + $0x8] sm:$0xff]   ;;  %v12009_v14 = vld [vmem:[%s14735_s6 + $0x98] sm:$0xff]   ;;  %v1576_v16 = vld [vmem:[%s12906_s30] sm:$0xff] }
 0x29f   : > { %10915 = vmatprep.mubr.msk.bf16.mxu1 %vm1562_vm9, %v1590_v62  ;;  %v1577_v17 = vld [vmem:[%s12906_s30 + $0x8] sm:$0xff]  ;;  %v9289_v22 = vld [vmem:[%s12906_s30 + $0x31] sm:$0xff]  ;;  %v12010_v24 = vld [vmem:[%s14735_s6 + $0x20] sm:$0xff]  }
 0x2a0   : > { %10914 = vmatpush3.bf16.msra.mxu1 %v12004_v13  ;;  %10978 = vmatpush3.bf16.msra.mxu0 %v12005_v57  ;;  %v9288_v18 = vld [vmem:[%s12906_s30 + $0x29] sm:$0xff]  ;;  %v1579_v20 = vpack.c.bf16 %v1577_v17, %v1576_v16  ;;  %v12011_v25 = vld [vmem:[%s14735_s6 + $0xa0] sm:$0xff]   ;;  %v9290_v27 = vld [vmem:[%s12906_s30 + $0x39] sm:$0x1] }
 0x2a1   : > { %10979 = vmatprep.mubr.msk.bf16.mxu0 %vm1562_vm9, %v2224_v5  ;;  %10919 = vmatprep.subr.bf16.mxu1 %v12006_v58  ;;  %v2305_v23 = vpack.c.bf16 %v9289_v22, %v9288_v18  ;;  %v1578_v26 = vld [vmem:[%s12906_s30 + $0x10] sm:$0x1]  ;;  %v9199_v28 = vld [vmem:[%s12906_s30 + $0x2] sm:$0xff]  ;;  %v2306_v32 = vpack.c.bf16 %v9290_v27, %v9290_v27  ;;  %v9302_v33 = vld [vmem:[%s12906_s30 + $0x32] sm:$0xff] }
 0x2a2   : > { %10983 = vmatprep.subr.bf16.mxu0 %v12007_v8  ;;  %v9200_v29 = vld [vmem:[%s12906_s30 + $0xa] sm:$0xff]  ;;  %v1580_v30 = vpack.c.bf16 %v1578_v26, %v1578_v26  ;;  %v9201_v40 = vld [vmem:[%s12906_s30 + $0x12] sm:$0x1]  ;;  %v9303_v41 = vld [vmem:[%s12906_s30 + $0x3a] sm:$0x1] }
 0x2a3   : > { %10916 = vmatmul.mubr.msk.bf16.vlgmr.msra.gmra.mrb[0].mxu1 %vm1562_vm9, %v1591_v6  ;;  %10980 = vmatmul.mubr.msk.bf16.vlgmr.msra.gmra.mrb[0].mxu0 %vm1562_vm9, %v2225_v7  ;;  %v9301_v31 = vld [vmem:[%s12906_s30 + $0x2a] sm:$0xff]  ;;  %v1735_v36 = vpack.c.bf16 %v9200_v29, %v9199_v28  ;;  %v1736_v44 = vpack.c.bf16 %v9201_v40, %v9201_v40  ;;  %v2387_v46 = vpack.c.bf16 %v9303_v41, %v9303_v41  ;;  %v9315_v47 = vld [vmem:[%s12906_s30 + $0x33] sm:$0xff]  ;;  %v12018_v51 = vld [vmem:[%s14735_s6 + $0x40] sm:$0xff]  }
 0x2a4   : > { %10920 = vmatpush3.bf16.msra.mxu1 %v12006_v58  ;;  %10984 = vmatpush3.bf16.msra.mxu0 %v12007_v8  ;;  %v12012_v34 = vld [vmem:[%s14735_s6 + $0x28] sm:$0xff]   ;;  %v2386_v37 = vpack.c.bf16 %v9302_v33, %v9301_v31  ;;  %v12014_v38 = vld [vmem:[%s14735_s6 + $0x30] sm:$0xff]   ;;  %v12016_v48 = vld [vmem:[%s14735_s6 + $0x38] sm:$0xff]  }
 0x2a5   : > { %10921 = vmatprep.subr.bf16.mxu1 %v12008_v9  ;;  %10985 = vmatprep.subr.bf16.mxu0 %v12009_v14  ;;  %v12013_v35 = vld [vmem:[%s14735_s6 + $0xa8] sm:$0xff]   ;;  %v12015_v39 = vld [vmem:[%s14735_s6 + $0xb0] sm:$0xff]   ;;  %v12017_v21 = vld [vmem:[%s14735_s6 + $0xb8] sm:$0xff]  }
 0x2a6   : > { %10923 = vmatprep.mubr.msk.bf16.mxu1 %vm1562_vm9, %v1579_v20  ;;  %10987 = vmatprep.mubr.msk.bf16.mxu0 %vm1562_vm9, %v2305_v23  ;;  %v9210_v42 = vld [vmem:[%s12906_s30 + $0x3] sm:$0xff]  ;;  %v9211_v43 = vld [vmem:[%s12906_s30 + $0xb] sm:$0xff]  ;;  %v9212_v53 = vld [vmem:[%s12906_s30 + $0x13] sm:$0x1] }
 0x2a7   : > { %v9314_v45 = vld [vmem:[%s12906_s30 + $0x2b] sm:$0xff]  ;;  %v1816_v49 = vpack.c.bf16 %v9211_v43, %v9210_v42  ;;  %v12019_v52 = vld [vmem:[%s14735_s6 + $0xc0] sm:$0xff]   ;;  %v9316_v15 = vld [vmem:[%s12906_s30 + $0x3b] sm:$0x1]  ;;  %v1817_v56 = vpack.c.bf16 %v9212_v53, %v9212_v53 }
 0x2a8   : > { %10922 = vmatpush3.bf16.msra.mxu1 %v12008_v9  ;;  %10986 = vmatpush3.bf16.msra.mxu0 %v12009_v14  ;;  %v2467_v50 = vpack.c.bf16 %v9315_v47, %v9314_v45  ;;  %v9223_v54 = vld [vmem:[%s12906_s30 + $0x14] sm:$0xff]  ;;  %v9224_v19 = vld [vmem:[%s12906_s30 + $0x1c] sm:$0xff]  ;;  %v2468_v13 = vpack.c.bf16 %v9316_v15, %v9316_v15  ;;  %v9328_v57 = vld [vmem:[%s12906_s30 + $0x44] sm:$0xff] }
 0x2a9   : > { %10927 = vmatprep.subr.bf16.mxu1 %v12010_v24  ;;  %10991 = vmatprep.subr.bf16.mxu0 %v12011_v25  ;;  %v9327_v2 = vld [vmem:[%s12906_s30 + $0x3c] sm:$0xff]  ;;  %v12020_v58 = vld [vmem:[%s14735_s6 + $0x48] sm:$0xff]   ;;  %v1899_v60 = vpack.c.bf16 %v9224_v19, %v9223_v54  ;;  %v12022_v62 = vld [vmem:[%s14735_s6 + $0x50] sm:$0xff]  }
 0x2aa   : > { %v12021_v59 = vld [vmem:[%s14735_s6 + $0xc8] sm:$0xff]   ;;  %v2549_v61 = vpack.c.bf16 %v9328_v57, %v9327_v2  ;;  %v12023_v63 = vld [vmem:[%s14735_s6 + $0xd0] sm:$0xff]   ;;  %v9225_v0 = vld [vmem:[%s12906_s30 + $0x24] sm:$0x1] }
 0x2ab   : > { %v9329_v1 = vld [vmem:[%s12906_s30 + $0x4c] sm:$0x1]  ;;  %v1900_v5 = vpack.c.bf16 %v9225_v0, %v9225_v0  ;;  %v9236_v6 = vld [vmem:[%s12906_s30 + $0x15] sm:$0xff]  ;;  %v9237_v7 = vld [vmem:[%s12906_s30 + $0x1d] sm:$0xff] }
 0x2ac   : > { %v2550_v8 = vpack.c.bf16 %v9329_v1, %v9329_v1  ;;  %v9340_v9 = vld [vmem:[%s12906_s30 + $0x3d] sm:$0xff]  ;;  %v9341_v14 = vld [vmem:[%s12906_s30 + $0x45] sm:$0xff]  ;;  %v1980_v18 = vpack.c.bf16 %v9237_v7, %v9236_v6 }
 0x2ad   : > { %v12024_v16 = vld [vmem:[%s14735_s6 + $0x58] sm:$0xff]   ;;  %v2630_v20 = vpack.c.bf16 %v9341_v14, %v9340_v9  ;;  %v12026_v22 = vld [vmem:[%s14735_s6 + $0x60] sm:$0xff]   ;;  %v12029_v33 = vld [vmem:[%s14735_s6 + $0xe8] sm:$0xff]  }
 0x2ae   : > { %v12025_v17 = vld [vmem:[%s14735_s6 + $0xd8] sm:$0xff]   ;;  %v12027_v23 = vld [vmem:[%s14735_s6 + $0xe0] sm:$0xff]  }
 0x2af   : > { %10924 = vmatmul.mubr.msk.bf16.vlgmr.msra.gmra.mrb[0].mxu1 %vm1562_vm9, %v1580_v30  ;;  %10988 = vmatmul.mubr.msk.bf16.vlgmr.msra.gmra.mrb[0].mxu0 %vm1562_vm9, %v2306_v32  ;;  %v9249_v27 = vld [vmem:[%s12906_s30 + $0x16] sm:$0xff]  ;;  %v9250_v28 = vld [vmem:[%s12906_s30 + $0x1e] sm:$0xff]  ;;  %v9354_v31 = vld [vmem:[%s12906_s30 + $0x46] sm:$0xff] }
 0x2b0   : > { %10928 = vmatpush3.bf16.msra.mxu1 %v12010_v24  ;;  %10992 = vmatpush3.bf16.msra.mxu0 %v12011_v25  ;;  %v9238_v24 = vld [vmem:[%s12906_s30 + $0x25] sm:$0x1]  ;;  %v9342_v25 = vld [vmem:[%s12906_s30 + $0x4d] sm:$0x1]  ;;  %v9262_v41 = vld [vmem:[%s12906_s30 + $0x17] sm:$0xff] }
 0x2b1   : > { %10929 = vmatprep.subr.bf16.mxu1 %v12012_v34  ;;  %10993 = vmatprep.subr.bf16.mxu0 %v12013_v35  ;;  %v1981_v26 = vpack.c.bf16 %v9238_v24, %v9238_v24  ;;  %v2631_v29 = vpack.c.bf16 %v9342_v25, %v9342_v25  ;;  %v9353_v30 = vld [vmem:[%s12906_s30 + $0x3e] sm:$0xff]  ;;  %v12028_v32 = vld [vmem:[%s14735_s6 + $0x68] sm:$0xff]  }
 0x2b2   : > { %10931 = vmatprep.mubr.msk.bf16.mxu1 %vm1562_vm9, %v1735_v36  ;;  %10995 = vmatprep.mubr.msk.bf16.mxu0 %vm1562_vm9, %v2386_v37  ;;  %v12030_v36 = vld [vmem:[%s14735_s6 + $0x70] sm:$0xff]   ;;  %v9263_v42 = vld [vmem:[%s12906_s30 + $0x1f] sm:$0xff]  ;;  %v9367_v45 = vld [vmem:[%s12906_s30 + $0x47] sm:$0xff] }
 0x2b3   : > { %v12031_v37 = vld [vmem:[%s14735_s6 + $0xf0] sm:$0xff]   ;;  %v12033_v47 = vld [vmem:[%s14735_s6 + $0xf8] sm:$0xff]  }
 0x2b4   : > { %10930 = vmatpush3.bf16.msra.mxu1 %v12012_v34  ;;  %10994 = vmatpush3.bf16.msra.mxu0 %v12013_v35  ;;  %v2061_v34 = vpack.c.bf16 %v9250_v28, %v9249_v27  ;;  %v2711_v35 = vpack.c.bf16 %v9354_v31, %v9353_v30 }
 0x2b5   : > { %10935 = vmatprep.subr.bf16.mxu1 %v12014_v38  ;;  %10999 = vmatprep.subr.bf16.mxu0 %v12015_v39 }
 0x2bb   : > { %10932 = vmatmul.mubr.msk.bf16.vlgmr.msra.gmra.mrb[0].mxu1 %vm1562_vm9, %v1736_v44  ;;  %10996 = vmatmul.mubr.msk.bf16.vlgmr.msra.gmra.mrb[0].mxu0 %vm1562_vm9, %v2387_v46  ;;  %v9366_v44 = vld [vmem:[%s12906_s30 + $0x3f] sm:$0xff] }
 0x2bc   : > { %10936 = vmatpush3.bf16.msra.mxu1 %v12014_v38  ;;  %11000 = vmatpush3.bf16.msra.mxu0 %v12015_v39  ;;  %v9251_v38 = vld [vmem:[%s12906_s30 + $0x26] sm:$0x1]  ;;  %v9355_v39 = vld [vmem:[%s12906_s30 + $0x4e] sm:$0x1]  ;;  %v12032_v46 = vld [vmem:[%s14735_s6 + $0x78] sm:$0xff]  }
 0x2bd   : > { %10937 = vmatprep.subr.bf16.mxu1 %v12016_v48  ;;  %11001 = vmatprep.subr.bf16.mxu0 %v12017_v21  ;;  %v2062_v40 = vpack.c.bf16 %v9251_v38, %v9251_v38  ;;  %v2712_v43 = vpack.c.bf16 %v9355_v39, %v9355_v39 }
 0x2be   : > { %10939 = vmatprep.mubr.msk.bf16.mxu1 %vm1562_vm9, %v1816_v49  ;;  %11003 = vmatprep.mubr.msk.bf16.mxu0 %vm1562_vm9, %v2467_v50  ;;  %v9264_v49 = vld [vmem:[%s12906_s30 + $0x27] sm:$0x1]  ;;  %v9368_v50 = vld [vmem:[%s12906_s30 + $0x4f] sm:$0x1]  ;;  %s2962_s30 = smul.u32 9, %s12377_s23  ;;  %s1573_s23 = sadd.s32 1, %s12377_s23  }
 0x2bf   : > { %p1570_p1 = scmp.ge.s32.totalorder %s1573_s23, 9  }
 0x2c0   : > { %10938 = vmatpush3.bf16.msra.mxu1 %v12016_v48  ;;  %11002 = vmatpush3.bf16.msra.mxu0 %v12017_v21  ;;  %v2142_v48 = vpack.c.bf16 %v9263_v42, %v9262_v41  ;;  %v2792_v21 = vpack.c.bf16 %v9367_v45, %v9366_v44  ;;  %s2963_s5 = scalar_lea.vmem [#allocation3], %s2962_s30  ;;  %s14736_s18 = sld [smem:[#allocation27_spill]] (%p1570_p1)  ;;  %8838 = vst [vmem:[%s14700_s22] sm:$0xff] (%p1570_p1), %v12379_v10  ;;  %vm12384_vm14 = vmmov (%p1570_p1), 0   ;;  %vm3684_vm15 = vcmask (%p1570_p1), 56320   ;;  %v14173_v4 = vld [vmem:[%s14685_s7 + $0x1d0] ss:$8 sps:$4 sm:$0xff] (%p1570_p1)  }
 0x2c1   : > { %10943 = vmatprep.subr.bf16.mxu1 %v12018_v51  ;;  %11007 = vmatprep.subr.bf16.mxu0 %v12019_v52  ;;  %s14737_s23 = sld [smem:[#allocation28_spill]] (%p1570_p1)  ;;  %14747 = vst [vmem:[#allocation18_spill] sm:$0xff] (%p1570_p1), %v14173_v4  ;;  %v14179_v3 = vld [vmem:[%s14685_s7 + $0x1e4] ss:$8 sps:$4 sm:$0xff] (%p1570_p1)   ;;  %vm6667_vm0 = vcmask (%p1570_p1), 1042432   ;;  %vm8144_vm1 = vcmask (%p1570_p1), 130048  }
 0x2c2   :  { %14748 = vst [vmem:[#allocation19_spill] sm:$0xff] (%p1570_p1), %v14179_v3  ;;  %vm8839_vm2 = vcmask (%p1570_p1), 122880   ;;  %s12387_s25 = smov (%p1570_p1), 96   ;;  %s12389_s4 = smov (%p1570_p1), 32   ;;  %vm8548_vm5 = vcmask (%p1570_p1), 8192   ;;  %vm8860_vm8 = vcmask (%p1570_p1), 8200  }
 0x2c3   :  { %s12393_s28 = smov (%p1570_p1), 6   ;;  %vm8864_vm10 = vcmask (%p1570_p1), 24600  }
 0x2c6   :  { %v12034_v7 = vld [vmem:[%s14736_s18 + $0x20] sm:$0xff] (%p1570_p1)   ;;  %v12043_v25 = vld [vmem:[%s14736_s18 + $0x48] sm:$0xff] (%p1570_p1)   ;;  %v12045_v27 = vld [vmem:[%s14736_s18 + $0x58] sm:$0xff] (%p1570_p1)  }
 0x2c7   : > { %10940 = vmatmul.mubr.msk.bf16.vlgmr.msra.gmra.mrb[0].mxu1 %vm1562_vm9, %v1817_v56  ;;  %11004 = vmatmul.mubr.msk.bf16.vlgmr.msra.gmra.mrb[0].mxu0 %vm1562_vm9, %v2468_v13  ;;  %v12042_v24 = vld [vmem:[%s14736_s18 + $0x40] sm:$0xff] (%p1570_p1)   ;;  %v12047_v31 = vld [vmem:[%s14736_s18 + $0x68] sm:$0xff] (%p1570_p1)   ;;  %v12052_v38 = vld [vmem:[%s14736_s18 + $0x90] sm:$0xff] (%p1570_p1)  }
 0x2c8   : > { %10944 = vmatpush3.bf16.msra.mxu1 %v12018_v51  ;;  %11008 = vmatpush3.bf16.msra.mxu0 %v12019_v52  ;;  %v2143_v51 = vpack.c.bf16 %v9264_v49, %v9264_v49  ;;  %v2793_v52 = vpack.c.bf16 %v9368_v50, %v9368_v50  ;;  %v12053_v39 = vld [vmem:[%s14736_s18 + $0x98] sm:$0xff] (%p1570_p1)   ;;  %v12054_v41 = vld [vmem:[%s14736_s18 + $0xa0] sm:$0xff] (%p1570_p1)   ;;  %v12056_v44 = vld [vmem:[%s14736_s18 + $0xb0] sm:$0xff] (%p1570_p1)  }
 0x2c9   : > { %10945 = vmatprep.subr.bf16.mxu1 %v12020_v58  ;;  %11009 = vmatprep.subr.bf16.mxu0 %v12021_v59  ;;  %v12057_v45 = vld [vmem:[%s14736_s18 + $0xb8] sm:$0xff] (%p1570_p1)   ;;  %v12060_v49 = vld [vmem:[%s14736_s18 + $0xd0] sm:$0xff] (%p1570_p1)  }
 0x2ca   : > { %10947 = vmatprep.mubr.msk.bf16.mxu1 %vm1562_vm9, %v1899_v60  ;;  %11011 = vmatprep.mubr.msk.bf16.mxu0 %vm1562_vm9, %v2549_v61  ;;  %v12061_v50 = vld [vmem:[%s14736_s18 + $0xd8] sm:$0xff] (%p1570_p1)  }
 0x2cc   : > { %10946 = vmatpush3.bf16.msra.mxu1 %v12020_v58  ;;  %11010 = vmatpush3.bf16.msra.mxu0 %v12021_v59 }
 0x2cd   : > { %10951 = vmatprep.subr.bf16.mxu1 %v12022_v62  ;;  %11015 = vmatprep.subr.bf16.mxu0 %v12023_v63 }
 0x2d3   : > { %10948 = vmatmul.mubr.msk.bf16.vlgmr.msra.gmra.mrb[0].mxu1 %vm1562_vm9, %v1900_v5  ;;  %11012 = vmatmul.mubr.msk.bf16.vlgmr.msra.gmra.mrb[0].mxu0 %vm1562_vm9, %v2550_v8  ;;  %v12037_v8 = vld [vmem:[%s14736_s18 + $0x38] sm:$0xff] (%p1570_p1)  }
 0x2d4   : > { %10952 = vmatpush3.bf16.msra.mxu1 %v12022_v62  ;;  %11016 = vmatpush3.bf16.msra.mxu0 %v12023_v63 }
 0x2d5   : > { %10953 = vmatprep.subr.bf16.mxu1 %v12024_v16  ;;  %11017 = vmatprep.subr.bf16.mxu0 %v12025_v17 }
 0x2d6   : > { %10955 = vmatprep.mubr.msk.bf16.mxu1 %vm1562_vm9, %v1980_v18  ;;  %11019 = vmatprep.mubr.msk.bf16.mxu0 %vm1562_vm9, %v2630_v20  ;;  %v12040_v18 = vld [vmem:[%s14736_s18 + $0x10] sm:$0xff] (%p1570_p1)   ;;  %v12041_v20 = vld [vmem:[%s14736_s18 + $0x18] sm:$0xff] (%p1570_p1)  }
 0x2d8   : > { %10954 = vmatpush3.bf16.msra.mxu1 %v12024_v16  ;;  %11018 = vmatpush3.bf16.msra.mxu0 %v12025_v17  ;;  %v12038_v16 = vld [vmem:[%s14736_s18] sm:$0xff] (%p1570_p1)   ;;  %v12039_v17 = vld [vmem:[%s14736_s18 + $0x8] sm:$0xff] (%p1570_p1)  }
 0x2d9   : > { %10959 = vmatprep.subr.bf16.mxu1 %v12026_v22  ;;  %11023 = vmatprep.subr.bf16.mxu0 %v12027_v23 }
 0x2df   : > { %10956 = vmatmul.mubr.msk.bf16.vlgmr.msra.gmra.mrb[0].mxu1 %vm1562_vm9, %v1981_v26  ;;  %11020 = vmatmul.mubr.msk.bf16.vlgmr.msra.gmra.mrb[0].mxu0 %vm1562_vm9, %v2631_v29  ;;  %v12044_v26 = vld [vmem:[%s14736_s18 + $0x50] sm:$0xff] (%p1570_p1)   ;;  %v12046_v29 = vld [vmem:[%s14736_s18 + $0x60] sm:$0xff] (%p1570_p1)  }
 0x2e0   : > { %10960 = vmatpush3.bf16.msra.mxu1 %v12026_v22  ;;  %11024 = vmatpush3.bf16.msra.mxu0 %v12027_v23 }
 0x2e1   : > { %10961 = vmatprep.subr.bf16.mxu1 %v12028_v32  ;;  %11025 = vmatprep.subr.bf16.mxu0 %v12029_v33 }
 0x2e2   : > { %10963 = vmatprep.mubr.msk.bf16.mxu1 %vm1562_vm9, %v2061_v34  ;;  %11027 = vmatprep.mubr.msk.bf16.mxu0 %vm1562_vm9, %v2711_v35  ;;  %v12050_v35 = vld [vmem:[%s14736_s18 + $0x80] sm:$0xff] (%p1570_p1)  }
 0x2e4   : > { %10962 = vmatpush3.bf16.msra.mxu1 %v12028_v32  ;;  %11026 = vmatpush3.bf16.msra.mxu0 %v12029_v33  ;;  %v12048_v32 = vld [vmem:[%s14736_s18 + $0x70] sm:$0xff] (%p1570_p1)   ;;  %v12049_v33 = vld [vmem:[%s14736_s18 + $0x78] sm:$0xff] (%p1570_p1)  }
 0x2e5   : > { %10967 = vmatprep.subr.bf16.mxu1 %v12030_v36  ;;  %11031 = vmatprep.subr.bf16.mxu0 %v12031_v37 }
 0x2eb   : > { %10964 = vmatmul.mubr.msk.bf16.vlgmr.msra.gmra.mrb[0].mxu1 %vm1562_vm9, %v2062_v40  ;;  %11028 = vmatmul.mubr.msk.bf16.vlgmr.msra.gmra.mrb[0].mxu0 %vm1562_vm9, %v2712_v43  ;;  %v12055_v43 = vld [vmem:[%s14736_s18 + $0xa8] sm:$0xff] (%p1570_p1)  }
 0x2ec   : > { %10968 = vmatpush3.bf16.msra.mxu1 %v12030_v36  ;;  %11032 = vmatpush3.bf16.msra.mxu0 %v12031_v37  ;;  %v12051_v37 = vld [vmem:[%s14736_s18 + $0x88] sm:$0xff] (%p1570_p1)  }
 0x2ed   : > { %10969 = vmatprep.subr.bf16.mxu1 %v12032_v46  ;;  %11033 = vmatprep.subr.bf16.mxu0 %v12033_v47 }
 0x2ee   : > { %10971 = vmatprep.mubr.msk.bf16.mxu1 %vm1562_vm9, %v2142_v48  ;;  %11035 = vmatprep.mubr.msk.bf16.mxu0 %vm1562_vm9, %v2792_v21  ;;  %v12059_v21 = vld [vmem:[%s14736_s18 + $0xc8] sm:$0xff] (%p1570_p1)  }
 0x2f0   : > { %10970 = vmatpush3.bf16.msra.mxu1 %v12032_v46  ;;  %11034 = vmatpush3.bf16.msra.mxu0 %v12033_v47  ;;  %v12058_v47 = vld [vmem:[%s14736_s18 + $0xc0] sm:$0xff] (%p1570_p1)  }
 0x2f1   :  { %11048 = vmatprep.subr.bf16.mxu0 (%p1570_p1), %v12379_v10 }
 0x2f7   : > { %10972 = vmatmul.mubr.msk.bf16.vlgmr.msra.gmra.mrb[0].mxu1 %vm1562_vm9, %v2143_v51  ;;  %11036 = vmatmul.mubr.msk.bf16.vlgmr.msra.gmra.mrb[0].mxu0 %vm1562_vm9, %v2793_v52  ;;  %v12062_v52 = vld [vmem:[%s14736_s18 + $0xe0] sm:$0xff] (%p1570_p1)   ;;  %vm8862_vm9 = vcmask (%p1570_p1), 16400  }
 0x2f8   : > { %11045 = vmatprep.mubr.msk.f32.mxu1 %vm2874_vm11, %v12526_v11  ;;  %11056 = vmatprep.mubr.msk.bf16.mxu0 (%p1570_p1), %vm12384_vm14, %v12379_v10 }
 0x2f9   :  { %11049 = vmatpush3.bf16.msra.mxu0 (%p1570_p1), %v12034_v7  ;;  %v12072_v7 = vld [vmem:[%s14736_s18 + $0x30] sm:$0xff] (%p1570_p1)  }
 0x2fa   :  { %11050 = vmatprep.subr.bf16.mxu0 (%p1570_p1), %v12379_v10 }
 0x3ca   : > { %v10973_v53 = vpop.f32.mrb[0].mxu1  ;;  %v11037_v15 = vpop.f32.mrb[0].mxu0 }
 0x3cb   : > { %v2201_v54 = vpop.f32.mrb[1].mxu1  ;;  %v11760_v19 = vadd.f32 %v11037_v15, %v10973_v53  ;;  %v2851_v56 = vpop.f32.mrb[1].mxu0  ;;  %v12063_v15 = vld [vmem:[%s14736_s18 + $0xe8] sm:$0xff] (%p1570_p1)  }
 0x3cc   : > { %v10974_v2 = vpop.f32.mrb[2].mxu1  ;;  %v11761_v13 = vadd.f32 %v2851_v56, %v2201_v54  ;;  %v11038_v57 = vpop.f32.mrb[2].mxu0  ;;  %v12064_v54 = vld [vmem:[%s14736_s18 + $0xf0] sm:$0xff] (%p1570_p1)  }
 0x3cd   : > { %v2204_v58 = vpop.f32.mrb[3].mxu1  ;;  %v2854_v59 = vpop.f32.mrb[3].mxu0  ;;  %v12066_v2 = vld [vmem:[%s14736_s18 + $0x100] sm:$0xff] (%p1570_p1)   ;;  %v12067_v57 = vld [vmem:[%s14736_s18 + $0x108] sm:$0xff] (%p1570_p1)  }
 0x3ce   : > { %v11762_v60 = vadd.f32 %v2854_v59, %v2204_v58  ;;  %v12068_v58 = vld [vmem:[%s14736_s18 + $0x110] sm:$0xff] (%p1570_p1)   ;;  %v12069_v59 = vld [vmem:[%s14736_s18 + $0x118] sm:$0xff] (%p1570_p1)  }
 0x3d0   : > { %v11560_v61 = vpack.c.bf16 %v11762_v60, %v11761_v13 }
 0x3d2   : > { %11561 = vmatprep.subr.bf16.mxu1 %v11560_v61 }
 0x3d3   : > { %11563 = vmatpush3.bf16.msra.mxu1 %v11560_v61 }
 0x3d4   : > { %11043 = vmatprep.subr.msk.mxu1 %vm132_vm3, %v11760_v19 }
 0x3d7   : > { %11044 = vmatpush3.msk.msra.mxu1 %vm132_vm3, %v11760_v19  ;;  %v12065_v19 = vld [vmem:[%s14736_s18 + $0xf8] sm:$0xff] (%p1570_p1)   ;;  %vm8858_vm3 = vcmask (%p1570_p1), 0  }
 0x3d8   : > { %11046 = vmatmul.mubr.msk.f32.vlgmr.msra.gmra.mrb[4].mxu1 %vm2874_vm11, %v12531_v12  ;;  %11156 = vmatprep.subr.mxu1 (%p1570_p1), %v12379_v10  ;;  %v12035_v12 = vld [vmem:[%s14736_s18 + $0x28] sm:$0xff] (%p1570_p1)   ;;  %vm8870_vm11 = vcmask (%p1570_p1), 40992  }
 0x3d9   :  { %11158 = vmatprep.mubr.msk.f32.mxu1 (%p1570_p1), %vm12384_vm14, %v12379_v10  ;;  %11051 = vmatpush3.bf16.msra.mxu0 (%p1570_p1), %v12035_v12  ;;  %v12073_v12 = vld [vmem:[%s14736_s18 + $0x38] sm:$0xff] (%p1570_p1)  }
 0x3da   :  { %11052 = vmatprep.subr.bf16.mxu0 (%p1570_p1), %v12379_v10 }
 0x4ab   : > { %v11047_v62 = vpop.f32.mrb[4].mxu1  ;;  %1572 = sbr.rel (!%p1570_p1) target bundleno = 660 (0x294), region = 214 }
 0x4ac   : > { %v2957_v63 = vadd.f32 %v11047_v62, %v12883_v55  ;;  %v2951_v0 = vpop.f32.mrb[5].mxu1  ;;  %v13262_v62 = vld [vmem:[%s14700_s22] sm:$0xff] (%p1570_p1) }
 0x4ad   : > { %v2952_v1 = vadd.f32 %v12883_v55, %v2951_v0  ;;  %v12036_v55 = vld [vmem:[%s14736_s18 + $0x30] sm:$0xff] (%p1570_p1)  }
 0x4ae   : > { %v2961_v5 = vmax.f32 %v2957_v63, 0.0  ;;  %11053 = vmatpush3.bf16.msra.mxu0 (%p1570_p1), %v12036_v55  ;;  %v12070_v63 = vld [vmem:[%s14736_s18 + $0x20] sm:$0xff] (%p1570_p1)  }
 0x4af   : > { %v2960_v6 = vmax.f32 %v2952_v1, 0.0  ;;  %11054 = vmatprep.subr.bf16.mxu0 (%p1570_p1), %v12379_v10 }
 0x4b0   : > { %2967 = vst.msk [vmem:[%s2963_s5 + $0x8] sm:$0x1] %vm2966_vm12, %v2961_v5  ;;  %vm8876_vm12 = vcmask (%p1570_p1), 57392  }
 0x4b1   : > { %2965 = vst.msk [vmem:[%s2963_s5] sm:$0xff] %vm2964_vm13, %v2960_v6  ;;  %v12071_v6 = vld [vmem:[%s14736_s18 + $0x28] sm:$0xff] (%p1570_p1)  }
 0x4b2   :  { %11055 = vmatpush3.bf16.msra.mxu0 %v12037_v8 }
 0x4b3   :  { %11060 = vmatprep.subr.bf16.mxu0 %v12379_v10 }
 0x4b8   :  { %v2979_v9 = vld [vmem:[#allocation3 + $0x1] sm:$0x7f]  ;;  %v3204_v34 = vld [vmem:[#allocation3 + $0x9] sm:$0x7f]  ;;  %v3441_v51 = vld [vmem:[#allocation3 + $0x12] sm:$0x7f] }
 0x4b9   :  { %v2980_v14 = vpack.c.bf16 %v2979_v9, %v2979_v9  ;;  %v2969_v22 = vld [vmem:[#allocation3] sm:$0x7f]  ;;  %v3205_v36 = vpack.c.bf16 %v3204_v34, %v3204_v34  ;;  %v3283_v40 = vld [vmem:[#allocation3 + $0xa] sm:$0x7f]  ;;  %v3442_v53 = vpack.c.bf16 %v3441_v51, %v3441_v51  ;;  %v3520_v56 = vld [vmem:[#allocation3 + $0x13] sm:$0x7f] }
 0x4ba   :  { %v2970_v23 = vpack.c.bf16 %v2969_v22, %v2969_v22  ;;  %v3125_v28 = vld [vmem:[#allocation3 + $0x2] sm:$0x7f]  ;;  %v3284_v42 = vpack.c.bf16 %v3283_v40, %v3283_v40  ;;  %v3362_v46 = vld [vmem:[#allocation3 + $0xb] sm:$0x7f]  ;;  %v3521_v13 = vpack.c.bf16 %v3520_v56, %v3520_v56  ;;  %v3599_v60 = vld [vmem:[#allocation3 + $0x14] sm:$0x7f] }
 0x4bb   :  { %11057 = vmatmul.mubr.msk.bf16.vlgmr.msra.gmra.mrb[0].mxu0 %vm2964_vm13, %v2980_v14  ;;  %v3126_v30 = vpack.c.bf16 %v3125_v28, %v3125_v28  ;;  %v3363_v48 = vpack.c.bf16 %v3362_v46, %v3362_v46  ;;  %v3600_v61 = vpack.c.bf16 %v3599_v60, %v3599_v60  ;;  %v3774_v55 = vld [vmem:[#allocation3 + $0x13] sm:$0x7f] }
 0x4bc   :  { %11061 = vmatpush3.bf16.msra.mxu0 %v12038_v16  ;;  %11068 = vmatprep.mubr.msk.bf16.mxu0 %vm12384_vm14, %v12379_v10  ;;  %v3775_v8 = vpack.c.bf16 %v3774_v55, %v3774_v55  ;;  %v12074_v9 = vld [vmem:[%s14736_s18] sm:$0xff]   ;;  %v12075_v14 = vld [vmem:[%s14736_s18 + $0x8] sm:$0xff]   ;;  %v12076_v16 = vld [vmem:[%s14736_s18 + $0x10] sm:$0xff]  }
 0x4bd   :  { %11062 = vmatprep.subr.bf16.mxu0 %v12379_v10  ;;  %v12078_v22 = vld [vmem:[%s14736_s18 + $0x40] sm:$0xff]   ;;  %v4539_v55 = vld [vmem:[#allocation3 + $0x24] sm:$0x7f] }
 0x4be   :  { %v12082_v28 = vld [vmem:[%s14736_s18 + $0x60] sm:$0xff]  }
 0x4bf   :  { %v12086_v34 = vld [vmem:[%s14736_s18 + $0x80] sm:$0xff]  }
 0x4c0   :  { %11063 = vmatpush3.bf16.msra.mxu0 %v12039_v17  ;;  %v12077_v17 = vld [vmem:[%s14736_s18 + $0x18] sm:$0xff]   ;;  %v12090_v40 = vld [vmem:[%s14736_s18 + $0xa0] sm:$0xff]  }
 0x4c1   :  { %11064 = vmatprep.subr.bf16.mxu0 %v12379_v10  ;;  %v12094_v46 = vld [vmem:[%s14736_s18 + $0xc0] sm:$0xff]  }
 0x4c2   :  { %v12098_v51 = vld [vmem:[%s14736_s18 + $0xe0] sm:$0xff]  }
 0x4c3   :  { %v12102_v56 = vld [vmem:[%s14736_s18 + $0x100] sm:$0xff]  }
 0x4c4   :  { %11065 = vmatpush3.bf16.msra.mxu0 %v12040_v18  ;;  %v3764_v18 = vld [vmem:[#allocation3 + $0x12] sm:$0x7f] }
 0x4c5   :  { %11066 = vmatprep.subr.bf16.mxu0 %v12379_v10  ;;  %v12106_v60 = vld [vmem:[%s14736_s18 + $0x20] sm:$0xff]  }
 0x4c8   :  { %11067 = vmatpush3.bf16.msra.mxu0 %v12041_v20  ;;  %v3765_v20 = vpack.c.bf16 %v3764_v18, %v3764_v18  ;;  %v4693_v18 = vld [vmem:[#allocation3 + $0x26] sm:$0x7f] }
 0x4c9   :  { %11072 = vmatprep.subr.bf16.mxu0 %v12379_v10 }
 0x4cb   :  { %11069 = vmatmul.mubr.msk.bf16.vlgmr.msra.gmra.mrb[0].mxu0 %vm2964_vm13, %v2970_v23  ;;  %v12079_v23 = vld [vmem:[%s14736_s18 + $0x48] sm:$0xff]  }
 0x4cc   :  { %11073 = vmatpush3.bf16.msra.mxu0 %v12042_v24  ;;  %11080 = vmatprep.mubr.msk.bf16.mxu0 %vm12384_vm14, %v12379_v10  ;;  %v12080_v24 = vld [vmem:[%s14736_s18 + $0x50] sm:$0xff]  }
 0x4cd   :  { %11074 = vmatprep.subr.bf16.mxu0 %v12379_v10 }
 0x4d0   :  { %11075 = vmatpush3.bf16.msra.mxu0 %v12043_v25  ;;  %v12081_v25 = vld [vmem:[%s14736_s18 + $0x58] sm:$0xff]  }
 0x4d1   :  { %11076 = vmatprep.subr.bf16.mxu0 %v12379_v10 }
 0x4d4   :  { %11077 = vmatpush3.bf16.msra.mxu0 %v12044_v26  ;;  %v3918_v26 = vld [vmem:[#allocation3 + $0x14] sm:$0x7f] }
 0x4d5   :  { %11078 = vmatprep.subr.bf16.mxu0 %v12379_v10 }
 0x4d8   :  { %11079 = vmatpush3.bf16.msra.mxu0 %v12045_v27  ;;  %v3919_v27 = vpack.c.bf16 %v3918_v26, %v3918_v26  ;;  %v4771_v26 = vld [vmem:[#allocation3 + $0x2d] sm:$0x7f] }
 0x4d9   :  { %11084 = vmatprep.subr.bf16.mxu0 %v12379_v10 }
 0x4db   :  { %11081 = vmatmul.mubr.msk.bf16.vlgmr.msra.gmra.mrb[0].mxu0 %vm2964_vm13, %v3126_v30  ;;  %v12084_v30 = vld [vmem:[%s14736_s18 + $0x70] sm:$0xff]  }
 0x4dc   :  { %11085 = vmatpush3.bf16.msra.mxu0 %v12046_v29  ;;  %11092 = vmatprep.mubr.msk.bf16.mxu0 %vm12384_vm14, %v12379_v10  ;;  %v12083_v29 = vld [vmem:[%s14736_s18 + $0x68] sm:$0xff]  }
 0x4dd   :  { %11086 = vmatprep.subr.bf16.mxu0 %v12379_v10 }
 0x4e0   :  { %11087 = vmatpush3.bf16.msra.mxu0 %v12047_v31  ;;  %v12085_v31 = vld [vmem:[%s14736_s18 + $0x78] sm:$0xff]  }
 0x4e1   :  { %11088 = vmatprep.subr.bf16.mxu0 %v12379_v10 }
 0x4e4   :  { %11089 = vmatpush3.bf16.msra.mxu0 %v12048_v32  ;;  %v3996_v32 = vld [vmem:[#allocation3 + $0x1b] sm:$0x7f] }
 0x4e5   :  { %11090 = vmatprep.subr.bf16.mxu0 %v12379_v10 }
 0x4e8   :  { %11091 = vmatpush3.bf16.msra.mxu0 %v12049_v33  ;;  %v3997_v33 = vpack.c.bf16 %v3996_v32, %v3996_v32 }
 0x4e9   :  { %11096 = vmatprep.subr.bf16.mxu0 %v12379_v10 }
 0x4eb   :  { %11093 = vmatmul.mubr.msk.bf16.vlgmr.msra.gmra.mrb[0].mxu0 %vm2964_vm13, %v3205_v36  ;;  %v12088_v36 = vld [vmem:[%s14736_s18 + $0x90] sm:$0xff]  }
 0x4ec   :  { %11097 = vmatpush3.bf16.msra.mxu0 %v12050_v35  ;;  %11104 = vmatprep.mubr.msk.bf16.mxu0 %vm12384_vm14, %v12379_v10  ;;  %v12087_v35 = vld [vmem:[%s14736_s18 + $0x88] sm:$0xff]  }
 0x4ed   :  { %11098 = vmatprep.subr.bf16.mxu0 %v12379_v10 }
 0x4f0   :  { %11099 = vmatpush3.bf16.msra.mxu0 %v12051_v37  ;;  %v12089_v37 = vld [vmem:[%s14736_s18 + $0x98] sm:$0xff]  }
 0x4f1   :  { %11100 = vmatprep.subr.bf16.mxu0 %v12379_v10 }
 0x4f4   :  { %11101 = vmatpush3.bf16.msra.mxu0 %v12052_v38  ;;  %v4074_v38 = vld [vmem:[#allocation3 + $0x1c] sm:$0x7f] }
 0x4f5   :  { %11102 = vmatprep.subr.bf16.mxu0 %v12379_v10 }
 0x4f8   :  { %11103 = vmatpush3.bf16.msra.mxu0 %v12053_v39  ;;  %v4075_v39 = vpack.c.bf16 %v4074_v38, %v4074_v38 }
 0x4f9   :  { %11108 = vmatprep.subr.bf16.mxu0 %v12379_v10 }
 0x4fb   :  { %11105 = vmatmul.mubr.msk.bf16.vlgmr.msra.gmra.mrb[0].mxu0 %vm2964_vm13, %v3284_v42  ;;  %v12092_v42 = vld [vmem:[%s14736_s18 + $0xb0] sm:$0xff]  }
 0x4fc   :  { %11109 = vmatpush3.bf16.msra.mxu0 %v12054_v41  ;;  %11116 = vmatprep.mubr.msk.bf16.mxu0 %vm12384_vm14, %v12379_v10  ;;  %v12091_v41 = vld [vmem:[%s14736_s18 + $0xa8] sm:$0xff]  }
 0x4fd   :  { %11110 = vmatprep.subr.bf16.mxu0 %v12379_v10 }
 0x500   :  { %11111 = vmatpush3.bf16.msra.mxu0 %v12055_v43  ;;  %v12093_v43 = vld [vmem:[%s14736_s18 + $0xb8] sm:$0xff]  }
 0x501   :  { %11112 = vmatprep.subr.bf16.mxu0 %v12379_v10 }
 0x504   :  { %11113 = vmatpush3.bf16.msra.mxu0 %v12056_v44  ;;  %v4152_v44 = vld [vmem:[#allocation3 + $0x1d] sm:$0x7f] }
 0x505   :  { %11114 = vmatprep.subr.bf16.mxu0 %v12379_v10 }
 0x508   :  { %11115 = vmatpush3.bf16.msra.mxu0 %v12057_v45  ;;  %v4153_v45 = vpack.c.bf16 %v4152_v44, %v4152_v44 }
 0x509   :  { %11120 = vmatprep.subr.bf16.mxu0 %v12379_v10 }
 0x50b   :  { %11117 = vmatmul.mubr.msk.bf16.vlgmr.msra.gmra.mrb[0].mxu0 %vm2964_vm13, %v3363_v48  ;;  %v12096_v48 = vld [vmem:[%s14736_s18 + $0xd0] sm:$0xff]  }
 0x50c   :  { %11121 = vmatpush3.bf16.msra.mxu0 %v12058_v47  ;;  %11128 = vmatprep.mubr.msk.bf16.mxu0 %vm12384_vm14, %v12379_v10  ;;  %v12095_v47 = vld [vmem:[%s14736_s18 + $0xc8] sm:$0xff]  }
 0x50d   :  { %11122 = vmatprep.subr.bf16.mxu0 %v12379_v10 }
 0x510   :  { %11123 = vmatpush3.bf16.msra.mxu0 %v12059_v21  ;;  %v12097_v21 = vld [vmem:[%s14736_s18 + $0xd8] sm:$0xff]  }
 0x511   :  { %11124 = vmatprep.subr.bf16.mxu0 %v12379_v10 }
 0x514   :  { %11125 = vmatpush3.bf16.msra.mxu0 %v12060_v49  ;;  %v4230_v49 = vld [vmem:[#allocation3 + $0x24] sm:$0x7f] }
 0x515   :  { %11126 = vmatprep.subr.bf16.mxu0 %v12379_v10 }
 0x518   :  { %11127 = vmatpush3.bf16.msra.mxu0 %v12061_v50  ;;  %v4231_v50 = vpack.c.bf16 %v4230_v49, %v4230_v49 }
 0x519   :  { %11132 = vmatprep.subr.bf16.mxu0 %v12379_v10 }
 0x51b   :  { %11129 = vmatmul.mubr.msk.bf16.vlgmr.msra.gmra.mrb[0].mxu0 %vm2964_vm13, %v3442_v53  ;;  %v12100_v53 = vld [vmem:[%s14736_s18 + $0xf0] sm:$0xff]  }
 0x51c   :  { %11133 = vmatpush3.bf16.msra.mxu0 %v12062_v52  ;;  %11140 = vmatprep.mubr.msk.bf16.mxu0 %vm12384_vm14, %v12379_v10  ;;  %v12099_v52 = vld [vmem:[%s14736_s18 + $0xe8] sm:$0xff]  }
 0x51d   :  { %11134 = vmatprep.subr.bf16.mxu0 %v12379_v10 }
 0x520   :  { %11135 = vmatpush3.bf16.msra.mxu0 %v12063_v15  ;;  %v12101_v15 = vld [vmem:[%s14736_s18 + $0xf8] sm:$0xff]  }
 0x521   :  { %11136 = vmatprep.subr.bf16.mxu0 %v12379_v10 }
 0x524   :  { %11137 = vmatpush3.bf16.msra.mxu0 %v12064_v54  ;;  %v4308_v54 = vld [vmem:[#allocation3 + $0x25] sm:$0x7f] }
 0x525   :  { %11138 = vmatprep.subr.bf16.mxu0 %v12379_v10 }
 0x528   :  { %11139 = vmatpush3.bf16.msra.mxu0 %v12065_v19  ;;  %v4309_v19 = vpack.c.bf16 %v4308_v54, %v4308_v54 }
 0x529   :  { %11144 = vmatprep.subr.bf16.mxu0 %v12379_v10 }
 0x52b   :  { %11141 = vmatmul.mubr.msk.bf16.vlgmr.msra.gmra.mrb[0].mxu0 %vm2964_vm13, %v3521_v13  ;;  %v12104_v13 = vld [vmem:[%s14736_s18 + $0x110] sm:$0xff]  }
 0x52c   :  { %11145 = vmatpush3.bf16.msra.mxu0 %v12066_v2  ;;  %11152 = vmatprep.mubr.msk.bf16.mxu0 %vm12384_vm14, %v12379_v10  ;;  %v12103_v2 = vld [vmem:[%s14736_s18 + $0x108] sm:$0xff]  }
 0x52d   :  { %11146 = vmatprep.subr.bf16.mxu0 %v12379_v10 }
 0x530   :  { %11147 = vmatpush3.bf16.msra.mxu0 %v12067_v57  ;;  %v12105_v57 = vld [vmem:[%s14736_s18 + $0x118] sm:$0xff]  }
 0x531   :  { %11148 = vmatprep.subr.bf16.mxu0 %v12379_v10 }
 0x534   :  { %11149 = vmatpush3.bf16.msra.mxu0 %v12068_v58  ;;  %v4386_v58 = vld [vmem:[#allocation3 + $0x26] sm:$0x7f] }
 0x535   :  { %11150 = vmatprep.subr.bf16.mxu0 %v12379_v10 }
 0x538   :  { %11151 = vmatpush3.bf16.msra.mxu0 %v12069_v59  ;;  %v4387_v59 = vpack.c.bf16 %v4386_v58, %v4386_v58 }
 0x539   :  { %11269 = vmatprep.subr.mxu0 %v13262_v62 }
 0x53b   :  { %11153 = vmatmul.mubr.msk.bf16.vlgmr.msra.gmra.mrb[0].mxu0 %vm2964_vm13, %v3600_v61  ;;  %v12107_v61 = vld [vmem:[%s14736_s18 + $0x28] sm:$0xff]  }
 0x53c   :  { %11271 = vmatprep.mubr.msk.f32.mxu0 %vm12384_vm14, %v13262_v62 }
 0x60e   :  { %v3671_v10 = vpop.f32.mrb[0].mxu0 }
 0x60f   :  { %v11154_v0 = vpop.f32.mrb[1].mxu0  ;;  %11157 = vmatpush3.msk.msra.mxu1 %vm1473_vm7, %v3671_v10  ;;  %v12109_v10 = vld [vmem:[%s14736_s18 + $0x38] sm:$0xff]  }
 0x610   :  { %v3674_v1 = vpop.f32.mrb[2].mxu0  ;;  %11159 = vmatmul.mubr.msk.f32.vlgmr.msra.gmra.mrb[0].mxu1 %vm3684_vm15, %v12526_v11  ;;  %11161 = vmatprep.subr.bf16.mxu1 %v13262_v62  ;;  %v4549_v0 = vld [vmem:[#allocation3 + $0x25] sm:$0x7f] }
 0x611   :  { %v11155_v5 = vpop.f32.mrb[3].mxu0  ;;  %11162 = vmatpush3.bf16.msra.mxu1 %v12070_v63  ;;  %11169 = vmatprep.mubr.msk.bf16.mxu1 %vm12384_vm14, %v13262_v62  ;;  %v12108_v63 = vld [vmem:[%s14736_s18 + $0x30] sm:$0xff]   ;;  %v4550_v1 = vpack.c.bf16 %v4549_v0, %v4549_v0 }
 0x612   :  { %11163 = vmatprep.subr.bf16.mxu1 %v13262_v62  ;;  %v12110_v5 = vld [vmem:[%s14736_s18] sm:$0xff]  }
 0x615   :  { %11164 = vmatpush3.bf16.msra.mxu1 %v12071_v6  ;;  %v12111_v6 = vld [vmem:[%s14736_s18 + $0x8] sm:$0xff]  }
 0x616   :  { %11165 = vmatprep.subr.bf16.mxu1 %v13262_v62 }
 0x619   :  { %11166 = vmatpush3.bf16.msra.mxu1 %v12072_v7  ;;  %v12112_v7 = vld [vmem:[%s14736_s18 + $0x10] sm:$0xff]  }
 0x61a   :  { %11167 = vmatprep.subr.bf16.mxu1 %v13262_v62 }
 0x61d   :  { %11168 = vmatpush3.bf16.msra.mxu1 %v12073_v12  ;;  %v12113_v12 = vld [vmem:[%s14736_s18 + $0x18] sm:$0xff]  }
 0x61e   :  { %11173 = vmatprep.subr.bf16.mxu1 %v13262_v62 }
 0x620   :  { %11170 = vmatmul.mubr.msk.bf16.vlgmr.msra.gmra.mrb[4].mxu1 %vm2964_vm13, %v3775_v8  ;;  %v4540_v8 = vpack.c.bf16 %v4539_v55, %v4539_v55  ;;  %v12145_v55 = vld [vmem:[%s14736_s18 + $0x38] sm:$0xff]  }
 0x621   :  { %11174 = vmatpush3.bf16.msra.mxu1 %v12074_v9  ;;  %11181 = vmatprep.mubr.msk.bf16.mxu1 %vm12384_vm14, %v13262_v62  ;;  %v12114_v9 = vld [vmem:[%s14736_s18 + $0x40] sm:$0xff]  }
 0x622   :  { %11175 = vmatprep.subr.bf16.mxu1 %v13262_v62 }
 0x625   :  { %11176 = vmatpush3.bf16.msra.mxu1 %v12075_v14  ;;  %v12115_v14 = vld [vmem:[%s14736_s18 + $0x48] sm:$0xff]  }
 0x626   :  { %11177 = vmatprep.subr.bf16.mxu1 %v13262_v62 }
 0x629   :  { %11178 = vmatpush3.bf16.msra.mxu1 %v12076_v16  ;;  %v12116_v16 = vld [vmem:[%s14736_s18 + $0x50] sm:$0xff]  }
 0x62a   :  { %11179 = vmatprep.subr.bf16.mxu1 %v13262_v62 }
 0x62d   :  { %11180 = vmatpush3.bf16.msra.mxu1 %v12077_v17  ;;  %v12117_v17 = vld [vmem:[%s14736_s18 + $0x58] sm:$0xff]  }
 0x62e   :  { %11185 = vmatprep.subr.bf16.mxu1 %v13262_v62 }
 0x630   :  { %11182 = vmatmul.mubr.msk.bf16.vlgmr.msra.gmra.mrb[4].mxu1 %vm2964_vm13, %v3765_v20  ;;  %v4694_v20 = vpack.c.bf16 %v4693_v18, %v4693_v18  ;;  %v12149_v18 = vld [vmem:[%s14736_s18 + $0x18] sm:$0xff]  }
 0x631   :  { %11186 = vmatpush3.bf16.msra.mxu1 %v12078_v22  ;;  %11193 = vmatprep.mubr.msk.bf16.mxu1 %vm12384_vm14, %v13262_v62  ;;  %v12118_v22 = vld [vmem:[%s14736_s18 + $0x60] sm:$0xff]  }
 0x632   :  { %11187 = vmatprep.subr.bf16.mxu1 %v13262_v62 }
 0x635   :  { %11188 = vmatpush3.bf16.msra.mxu1 %v12079_v23  ;;  %v12119_v23 = vld [vmem:[%s14736_s18 + $0x68] sm:$0xff]  }
 0x636   :  { %11189 = vmatprep.subr.bf16.mxu1 %v13262_v62 }
 0x639   :  { %11190 = vmatpush3.bf16.msra.mxu1 %v12080_v24  ;;  %v12120_v24 = vld [vmem:[%s14736_s18 + $0x70] sm:$0xff]  }
 0x63a   :  { %11191 = vmatprep.subr.bf16.mxu1 %v13262_v62 }
 0x63d   :  { %11192 = vmatpush3.bf16.msra.mxu1 %v12081_v25  ;;  %v12121_v25 = vld [vmem:[%s14736_s18 + $0x78] sm:$0xff]  }
 0x63e   :  { %11197 = vmatprep.subr.bf16.mxu1 %v13262_v62 }
 0x640   :  { %11194 = vmatmul.mubr.msk.bf16.vlgmr.msra.gmra.mrb[4].mxu1 %vm2964_vm13, %v3919_v27  ;;  %v4772_v27 = vpack.c.bf16 %v4771_v26, %v4771_v26  ;;  %v12153_v26 = vld [vmem:[%s14736_s18 + $0x58] sm:$0xff]  }
 0x641   :  { %11198 = vmatpush3.bf16.msra.mxu1 %v12082_v28  ;;  %11205 = vmatprep.mubr.msk.bf16.mxu1 %vm12384_vm14, %v13262_v62  ;;  %v12122_v28 = vld [vmem:[%s14736_s18 + $0x80] sm:$0xff]  }
 0x642   :  { %11199 = vmatprep.subr.bf16.mxu1 %v13262_v62 }
 0x645   :  { %11200 = vmatpush3.bf16.msra.mxu1 %v12083_v29  ;;  %v13525_v29 = vld [vmem:[%s14737_s23] ss:$0 sm:$0xff]  ;;  %s12388_s23 = smov 16  }
 0x646   :  { %11201 = vmatprep.subr.bf16.mxu1 %v13262_v62 }
 0x649   :  { %11202 = vmatpush3.bf16.msra.mxu1 %v12084_v30  ;;  %v12123_v30 = vld [vmem:[%s14736_s18 + $0x88] sm:$0xff]  }
 0x64a   :  { %11203 = vmatprep.subr.bf16.mxu1 %v13262_v62 }
 0x64d   :  { %11204 = vmatpush3.bf16.msra.mxu1 %v12085_v31 }
 0x64e   :  { %11209 = vmatprep.subr.bf16.mxu1 %v13262_v62 }
 0x650   :  { %11206 = vmatmul.mubr.msk.bf16.vlgmr.msra.gmra.mrb[4].mxu1 %vm2964_vm13, %v3997_v33 }
 0x651   :  { %11210 = vmatpush3.bf16.msra.mxu1 %v12086_v34  ;;  %11217 = vmatprep.mubr.msk.bf16.mxu1 %vm12384_vm14, %v13262_v62  ;;  %v12124_v34 = vld [vmem:[%s14736_s18 + $0x90] sm:$0xff]  }
 0x652   :  { %11211 = vmatprep.subr.bf16.mxu1 %v13262_v62 }
 0x655   :  { %11212 = vmatpush3.bf16.msra.mxu1 %v12087_v35 }
 0x656   :  { %11213 = vmatprep.subr.bf16.mxu1 %v13262_v62 }
 0x659   :  { %11214 = vmatpush3.bf16.msra.mxu1 %v12088_v36  ;;  %v12125_v36 = vld [vmem:[%s14736_s18 + $0x98] sm:$0xff]  }
 0x65a   :  { %11215 = vmatprep.subr.bf16.mxu1 %v13262_v62 }
 0x65d   :  { %11216 = vmatpush3.bf16.msra.mxu1 %v12089_v37  ;;  %v4849_v37 = vld [vmem:[#allocation3 + $0x2e] sm:$0x7f] }
 0x65e   :  { %11221 = vmatprep.subr.bf16.mxu1 %v13262_v62  ;;  %v4850_v38 = vpack.c.bf16 %v4849_v37, %v4849_v37  ;;  %v12159_v37 = vld [vmem:[%s14736_s18 + $0x88] sm:$0xff]  }
 0x660   :  { %11218 = vmatmul.mubr.msk.bf16.vlgmr.msra.gmra.mrb[4].mxu1 %vm2964_vm13, %v4075_v39  ;;  %v12126_v39 = vld [vmem:[%s14736_s18 + $0xa0] sm:$0xff]  }
 0x661   :  { %11222 = vmatpush3.bf16.msra.mxu1 %v12090_v40  ;;  %11229 = vmatprep.mubr.msk.bf16.mxu1 %vm12384_vm14, %v13262_v62  ;;  %v12127_v40 = vld [vmem:[%s14736_s18 + $0xa8] sm:$0xff]  }
 0x662   :  { %11223 = vmatprep.subr.bf16.mxu1 %v13262_v62 }
 0x665   :  { %11224 = vmatpush3.bf16.msra.mxu1 %v12091_v41  ;;  %v12128_v41 = vld [vmem:[%s14736_s18 + $0xb0] sm:$0xff]  }
 0x666   :  { %11225 = vmatprep.subr.bf16.mxu1 %v13262_v62 }
 0x669   :  { %11226 = vmatpush3.bf16.msra.mxu1 %v12092_v42  ;;  %v12129_v42 = vld [vmem:[%s14736_s18 + $0xb8] sm:$0xff]  }
 0x66a   :  { %11227 = vmatprep.subr.bf16.mxu1 %v13262_v62 }
 0x66d   :  { %11228 = vmatpush3.bf16.msra.mxu1 %v12093_v43  ;;  %v4927_v43 = vld [vmem:[#allocation3 + $0x2f] sm:$0x7f] }
 0x66e   :  { %11233 = vmatprep.subr.bf16.mxu1 %v13262_v62  ;;  %v4928_v44 = vpack.c.bf16 %v4927_v43, %v4927_v43  ;;  %v12161_v43 = vld [vmem:[%s14736_s18 + $0x98] sm:$0xff]  }
 0x670   :  { %11230 = vmatmul.mubr.msk.bf16.vlgmr.msra.gmra.mrb[4].mxu1 %vm2964_vm13, %v4153_v45  ;;  %v12130_v45 = vld [vmem:[%s14736_s18 + $0xc0] sm:$0xff]  }
 0x671   :  { %11234 = vmatpush3.bf16.msra.mxu1 %v12094_v46  ;;  %11241 = vmatprep.mubr.msk.bf16.mxu1 %vm12384_vm14, %v13262_v62  ;;  %v12131_v46 = vld [vmem:[%s14736_s18 + $0xc8] sm:$0xff]  }
 0x672   :  { %11235 = vmatprep.subr.bf16.mxu1 %v13262_v62 }
 0x675   :  { %11236 = vmatpush3.bf16.msra.mxu1 %v12095_v47  ;;  %v12132_v47 = vld [vmem:[%s14736_s18 + $0xd0] sm:$0xff]  }
 0x676   :  { %11237 = vmatprep.subr.bf16.mxu1 %v13262_v62 }
 0x679   :  { %11238 = vmatpush3.bf16.msra.mxu1 %v12096_v48  ;;  %v12133_v48 = vld [vmem:[%s14736_s18 + $0xd8] sm:$0xff]  }
 0x67a   :  { %11239 = vmatprep.subr.bf16.mxu1 %v13262_v62 }
 0x67d   :  { %11240 = vmatpush3.bf16.msra.mxu1 %v12097_v21  ;;  %v5005_v21 = vld [vmem:[#allocation3 + $0x36] sm:$0x7f] }
 0x67e   :  { %11245 = vmatprep.subr.bf16.mxu1 %v13262_v62  ;;  %v5006_v49 = vpack.c.bf16 %v5005_v21, %v5005_v21  ;;  %v12165_v21 = vld [vmem:[%s14736_s18 + $0xb8] sm:$0xff]  }
 0x680   :  { %11242 = vmatmul.mubr.msk.bf16.vlgmr.msra.gmra.mrb[4].mxu1 %vm2964_vm13, %v4231_v50  ;;  %v12134_v50 = vld [vmem:[%s14736_s18 + $0xe0] sm:$0xff]  }
 0x681   :  { %11246 = vmatpush3.bf16.msra.mxu1 %v12098_v51  ;;  %11253 = vmatprep.mubr.msk.bf16.mxu1 %vm12384_vm14, %v13262_v62  ;;  %v12135_v51 = vld [vmem:[%s14736_s18 + $0xe8] sm:$0xff]  }
 0x682   :  { %11247 = vmatprep.subr.bf16.mxu1 %v13262_v62 }
 0x685   :  { %11248 = vmatpush3.bf16.msra.mxu1 %v12099_v52  ;;  %v12136_v52 = vld [vmem:[%s14736_s18 + $0xf0] sm:$0xff]  }
 0x686   :  { %11249 = vmatprep.subr.bf16.mxu1 %v13262_v62 }
 0x689   :  { %11250 = vmatpush3.bf16.msra.mxu1 %v12100_v53  ;;  %v12137_v53 = vld [vmem:[%s14736_s18 + $0xf8] sm:$0xff]  }
 0x68a   :  { %11251 = vmatprep.subr.bf16.mxu1 %v13262_v62 }
 0x68d   :  { %11252 = vmatpush3.bf16.msra.mxu1 %v12101_v15  ;;  %v5083_v15 = vld [vmem:[#allocation3 + $0x37] sm:$0x7f] }
 0x68e   :  { %11257 = vmatprep.subr.bf16.mxu1 %v13262_v62  ;;  %v5084_v54 = vpack.c.bf16 %v5083_v15, %v5083_v15  ;;  %v12169_v15 = vld [vmem:[%s14736_s18 + $0xd8] sm:$0xff]  }
 0x690   :  { %11254 = vmatmul.mubr.msk.bf16.vlgmr.msra.gmra.mrb[4].mxu1 %vm2964_vm13, %v4309_v19  ;;  %v12138_v19 = vld [vmem:[%s14736_s18 + $0x100] sm:$0xff]  }
 0x691   :  { %11258 = vmatpush3.bf16.msra.mxu1 %v12102_v56  ;;  %11265 = vmatprep.mubr.msk.bf16.mxu1 %vm12384_vm14, %v13262_v62  ;;  %v12139_v56 = vld [vmem:[%s14736_s18 + $0x108] sm:$0xff]  }
 0x692   :  { %11259 = vmatprep.subr.bf16.mxu1 %v13262_v62 }
 0x695   :  { %11260 = vmatpush3.bf16.msra.mxu1 %v12103_v2  ;;  %v12140_v2 = vld [vmem:[%s14736_s18 + $0x110] sm:$0xff]  }
 0x696   :  { %11261 = vmatprep.subr.bf16.mxu1 %v13262_v62 }
 0x699   :  { %11262 = vmatpush3.bf16.msra.mxu1 %v12104_v13  ;;  %v12141_v13 = vld [vmem:[%s14736_s18 + $0x118] sm:$0xff]  }
 0x69a   :  { %11263 = vmatprep.subr.bf16.mxu1 %v13262_v62 }
 0x69d   :  { %11264 = vmatpush3.bf16.msra.mxu1 %v12105_v57  ;;  %v5161_v57 = vld [vmem:[#allocation3 + $0x38] sm:$0x7f] }
 0x69e   :  { %11274 = vmatprep.subr.bf16.mxu1 %v13262_v62  ;;  %v5162_v58 = vpack.c.bf16 %v5161_v57, %v5161_v57  ;;  %v12173_v57 = vld [vmem:[%s14736_s18 + $0xf8] sm:$0xff]  }
 0x6a0   :  { %11266 = vmatmul.mubr.msk.bf16.vlgmr.msra.gmra.mrb[4].mxu1 %vm2964_vm13, %v4387_v59 }
 0x6a1   :  { %11275 = vmatpush3.bf16.msra.mxu1 %v12106_v60  ;;  %11282 = vmatprep.mubr.msk.bf16.mxu1 %vm12384_vm14, %v13262_v62 }
 0x6a2   :  { %11276 = vmatprep.subr.bf16.mxu1 %v13262_v62 }
 0x6a5   :  { %11277 = vmatpush3.bf16.msra.mxu1 %v12107_v61 }
 0x6a6   :  { %11278 = vmatprep.subr.bf16.mxu1 %v13262_v62 }
 0x6a9   :  { %11279 = vmatpush3.bf16.msra.mxu1 %v12108_v63 }
 0x6aa   :  { %11280 = vmatprep.subr.bf16.mxu1 %v13262_v62 }
 0x6ad   :  { %11281 = vmatpush3.bf16.msra.mxu1 %v12109_v10  ;;  %v12142_v10 = vld [vmem:[%s14736_s18 + $0x20] sm:$0xff]  }
 0x6ae   :  { %11286 = vmatprep.subr.bf16.mxu1 %v13262_v62 }
 0x6b0   :  { %11283 = vmatmul.mubr.msk.bf16.vlgmr.msra.gmra.mrb[8].mxu1 %vm2964_vm13, %v4550_v1 }
 0x6b1   :  { %11287 = vmatpush3.bf16.msra.mxu1 %v12110_v5  ;;  %11294 = vmatprep.mubr.msk.bf16.mxu1 %vm12384_vm14, %v13262_v62 }
 0x6b2   :  { %11288 = vmatprep.subr.bf16.mxu1 %v13262_v62 }
 0x6b5   :  { %11289 = vmatpush3.bf16.msra.mxu1 %v12111_v6 }
 0x6b6   :  { %11290 = vmatprep.subr.bf16.mxu1 %v13262_v62 }
 0x6b9   :  { %11291 = vmatpush3.bf16.msra.mxu1 %v12112_v7  ;;  %v12143_v7 = vld [vmem:[%s14736_s18 + $0x28] sm:$0xff]  }
 0x6ba   :  { %11292 = vmatprep.subr.bf16.mxu1 %v13262_v62 }
 0x6bd   :  { %11293 = vmatpush3.bf16.msra.mxu1 %v12113_v12  ;;  %v12144_v12 = vld [vmem:[%s14736_s18 + $0x30] sm:$0xff]  }
 0x6be   :  { %11298 = vmatprep.subr.bf16.mxu1 %v13262_v62 }
 0x6c0   :  { %11295 = vmatmul.mubr.msk.bf16.vlgmr.msra.gmra.mrb[8].mxu1 %vm2964_vm13, %v4540_v8  ;;  %v5324_v8 = vld [vmem:[#allocation3 + $0x37] sm:$0x7f] }
 0x6c1   :  { %11299 = vmatpush3.bf16.msra.mxu1 %v12114_v9  ;;  %11306 = vmatprep.mubr.msk.bf16.mxu1 %vm12384_vm14, %v13262_v62  ;;  %v5325_v9 = vpack.c.bf16 %v5324_v8, %v5324_v8  ;;  %v13818_v8 = vld [vmem:[%s14685_s7 + $0x80] ss:$8 sps:$4 sm:$0xff]  }
 0x6c2   :  { %11300 = vmatprep.subr.bf16.mxu1 %v13262_v62 }
 0x6c5   :  { %11301 = vmatpush3.bf16.msra.mxu1 %v12115_v14  ;;  %v12146_v14 = vld [vmem:[%s14736_s18] sm:$0xff]  }
 0x6c6   :  { %11302 = vmatprep.subr.bf16.mxu1 %v13262_v62 }
 0x6c9   :  { %11303 = vmatpush3.bf16.msra.mxu1 %v12116_v16  ;;  %v12147_v16 = vld [vmem:[%s14736_s18 + $0x8] sm:$0xff]  }
 0x6ca   :  { %11304 = vmatprep.subr.bf16.mxu1 %v13262_v62 }
 0x6cd   :  { %11305 = vmatpush3.bf16.msra.mxu1 %v12117_v17  ;;  %v12148_v17 = vld [vmem:[%s14736_s18 + $0x10] sm:$0xff]  }
 0x6ce   :  { %11310 = vmatprep.subr.bf16.mxu1 %v13262_v62 }
 0x6d0   :  { %11307 = vmatmul.mubr.msk.bf16.vlgmr.msra.gmra.mrb[8].mxu1 %vm2964_vm13, %v4694_v20  ;;  %v5314_v20 = vld [vmem:[#allocation3 + $0x36] sm:$0x7f] }
 0x6d1   :  { %11311 = vmatpush3.bf16.msra.mxu1 %v12118_v22  ;;  %11318 = vmatprep.mubr.msk.bf16.mxu1 %vm12384_vm14, %v13262_v62  ;;  %v5315_v22 = vpack.c.bf16 %v5314_v20, %v5314_v20  ;;  %v13833_v20 = vld [vmem:[%s14685_s7 + $0x90] ss:$8 sps:$4 sm:$0xff]  }
 0x6d2   :  { %11312 = vmatprep.subr.bf16.mxu1 %v13262_v62 }
 0x6d5   :  { %11313 = vmatpush3.bf16.msra.mxu1 %v12119_v23  ;;  %v12150_v23 = vld [vmem:[%s14736_s18 + $0x40] sm:$0xff]  }
 0x6d6   :  { %11314 = vmatprep.subr.bf16.mxu1 %v13262_v62 }
 0x6d9   :  { %11315 = vmatpush3.bf16.msra.mxu1 %v12120_v24  ;;  %v12151_v24 = vld [vmem:[%s14736_s18 + $0x48] sm:$0xff]  }
 0x6da   :  { %11316 = vmatprep.subr.bf16.mxu1 %v13262_v62 }
 0x6dd   :  { %11317 = vmatpush3.bf16.msra.mxu1 %v12121_v25  ;;  %v12152_v25 = vld [vmem:[%s14736_s18 + $0x50] sm:$0xff]  }
 0x6de   :  { %11322 = vmatprep.subr.bf16.mxu1 %v13262_v62 }
 0x6e0   :  { %11319 = vmatmul.mubr.msk.bf16.vlgmr.msra.gmra.mrb[8].mxu1 %vm2964_vm13, %v4772_v27  ;;  %v5468_v27 = vld [vmem:[#allocation3 + $0x38] sm:$0x7f] }
 0x6e1   :  { %11323 = vmatpush3.bf16.msra.mxu1 %v12122_v28  ;;  %11330 = vmatprep.mubr.msk.bf16.mxu1 %vm12384_vm14, %v13262_v62  ;;  %v5469_v28 = vpack.c.bf16 %v5468_v27, %v5468_v27  ;;  %v13864_v27 = vld [vmem:[%s14685_s7 + $0xc4] ss:$8 sps:$4 sm:$0xff]  }
 0x6e2   :  { %11324 = vmatprep.subr.bf16.mxu1 %v13262_v62 }
 0x6e3   :  { %v3758_v31 = vpop.f32.mrb[0].mxu1 }
 0x6e4   :  { %v3759_v32 = vadd.f32 %v13525_v29, %v3758_v31  ;;  %v11160_v33 = vpop.f32.mrb[1].mxu1  ;;  %v12155_v31 = vld [vmem:[%s14736_s18 + $0x68] sm:$0xff]  }
 0x6e5   :  { %11325 = vmatpush3.bf16.msra.mxu1 %v12123_v30  ;;  %v12154_v30 = vld [vmem:[%s14736_s18 + $0x60] sm:$0xff]   ;;  %v12157_v33 = vld [vmem:[%s14736_s18 + $0x78] sm:$0xff]  }
 0x6e6   :  { %v3762_v35 = vmax.f32 %v3759_v32, 0.0  ;;  %11326 = vmatprep.subr.bf16.mxu1 %v13262_v62  ;;  %v12156_v32 = vld [vmem:[%s14736_s18 + $0x70] sm:$0xff]  }
 0x6e8   :  { %3763 = vst [vmem:[#allocation4] sm:$0xf] %v3762_v35 }
 0x6e9   :  { %11327 = vmatpush3.bf16.msra.mxu1 %v12124_v34  ;;  %v5546_v34 = vld [vmem:[#allocation3 + $0x3f] sm:$0x7f] }
 0x6ea   :  { %11328 = vmatprep.subr.bf16.mxu1 %v13262_v62  ;;  %v5547_v35 = vpack.c.bf16 %v5546_v34, %v5546_v34  ;;  %v13900_v34 = vld [vmem:[%s14685_s7 + $0xf4] ss:$8 sps:$4 sm:$0xff]  }
 0x6ed   :  { %11329 = vmatpush3.bf16.msra.mxu1 %v12125_v36  ;;  %v12158_v36 = vld [vmem:[%s14736_s18 + $0x80] sm:$0xff]  }
 0x6ee   :  { %11334 = vmatprep.subr.bf16.mxu1 %v13262_v62 }
 0x6f0   :  { %11331 = vmatmul.mubr.msk.bf16.vlgmr.msra.gmra.mrb[8].mxu1 %vm2964_vm13, %v4850_v38 }
 0x6f1   :  { %11335 = vmatpush3.bf16.msra.mxu1 %v12126_v39  ;;  %11342 = vmatprep.mubr.msk.bf16.mxu1 %vm12384_vm14, %v13262_v62 }
 0x6f2   :  { %11336 = vmatprep.subr.bf16.mxu1 %v13262_v62 }
 0x6f5   :  { %11337 = vmatpush3.bf16.msra.mxu1 %v12127_v40 }
 0x6f6   :  { %11338 = vmatprep.subr.bf16.mxu1 %v13262_v62 }
 0x6f9   :  { %11339 = vmatpush3.bf16.msra.mxu1 %v12128_v41  ;;  %v12160_v41 = vld [vmem:[%s14736_s18 + $0x90] sm:$0xff]  }
 0x6fa   :  { %11340 = vmatprep.subr.bf16.mxu1 %v13262_v62 }
 0x6fd   :  { %11341 = vmatpush3.bf16.msra.mxu1 %v12129_v42 }
 0x6fe   :  { %11346 = vmatprep.subr.bf16.mxu1 %v13262_v62 }
 0x700   :  { %11343 = vmatmul.mubr.msk.bf16.vlgmr.msra.gmra.mrb[8].mxu1 %vm2964_vm13, %v4928_v44  ;;  %v5624_v44 = vld [vmem:[#allocation3 + $0x40] sm:$0x7f] }
 0x701   :  { %11347 = vmatpush3.bf16.msra.mxu1 %v12130_v45  ;;  %11354 = vmatprep.mubr.msk.bf16.mxu1 %vm12384_vm14, %v13262_v62  ;;  %v5625_v45 = vpack.c.bf16 %v5624_v44, %v5624_v44  ;;  %v13949_v44 = vld [vmem:[%s14685_s7 + $0x34] ss:$8 sps:$4 sm:$0xff]  }
 0x702   :  { %11348 = vmatprep.subr.bf16.mxu1 %v13262_v62 }
 0x705   :  { %11349 = vmatpush3.bf16.msra.mxu1 %v12131_v46  ;;  %v12162_v46 = vld [vmem:[%s14736_s18 + $0xa0] sm:$0xff]  }
 0x706   :  { %11350 = vmatprep.subr.bf16.mxu1 %v13262_v62 }
 0x709   :  { %11351 = vmatpush3.bf16.msra.mxu1 %v12132_v47  ;;  %v12163_v47 = vld [vmem:[%s14736_s18 + $0xa8] sm:$0xff]  }
 0x70a   :  { %11352 = vmatprep.subr.bf16.mxu1 %v13262_v62 }
 0x70d   :  { %11353 = vmatpush3.bf16.msra.mxu1 %v12133_v48  ;;  %v12164_v48 = vld [vmem:[%s14736_s18 + $0xb0] sm:$0xff]  }
 0x70e   :  { %11358 = vmatprep.subr.bf16.mxu1 %v13262_v62 }
 0x710   :  { %11355 = vmatmul.mubr.msk.bf16.vlgmr.msra.gmra.mrb[8].mxu1 %vm2964_vm13, %v5006_v49  ;;  %v5702_v49 = vld [vmem:[#allocation3 + $0x41] sm:$0x7f] }
 0x711   :  { %11359 = vmatpush3.bf16.msra.mxu1 %v12134_v50  ;;  %11366 = vmatprep.mubr.msk.bf16.mxu1 %vm12384_vm14, %v13262_v62  ;;  %v13747_v50 = vld [vmem:[%s14700_s22] sm:$0xff] }
 0x712   :  { %11360 = vmatprep.subr.bf16.mxu1 %v13262_v62 }
 0x715   :  { %11361 = vmatpush3.bf16.msra.mxu1 %v12135_v51  ;;  %v5703_v51 = vpack.c.bf16 %v5702_v49, %v5702_v49  ;;  %v13985_v49 = vld [vmem:[%s14685_s7 + $0x64] ss:$8 sps:$4 sm:$0xff]  }
 0x716   :  { %11362 = vmatprep.subr.bf16.mxu1 %v13262_v62 }
 0x719   :  { %11363 = vmatpush3.bf16.msra.mxu1 %v12136_v52  ;;  %v12166_v52 = vld [vmem:[%s14736_s18 + $0xc0] sm:$0xff]  }
 0x71a   :  { %11364 = vmatprep.subr.bf16.mxu1 %v13262_v62 }
 0x71d   :  { %11365 = vmatpush3.bf16.msra.mxu1 %v12137_v53  ;;  %v12168_v53 = vld [vmem:[%s14736_s18 + $0xd0] sm:$0xff]  }
 0x71e   :  { %11370 = vmatprep.subr.bf16.mxu1 %v13262_v62 }
 0x720   :  { %11367 = vmatmul.mubr.msk.bf16.vlgmr.msra.gmra.mrb[8].mxu1 %vm2964_vm13, %v5084_v54  ;;  %v5780_v54 = vld [vmem:[#allocation3 + $0x48] sm:$0x7f] }
 0x721   :  { %11371 = vmatpush3.bf16.msra.mxu1 %v12138_v19  ;;  %11378 = vmatprep.mubr.msk.bf16.mxu1 %vm12384_vm14, %v13262_v62  ;;  %v5781_v19 = vpack.c.bf16 %v5780_v54, %v5780_v54  ;;  %v14015_v54 = vld [vmem:[%s14685_s7 + $0x100] ss:$8 sps:$4 sm:$0xff]  }
 0x722   :  { %11372 = vmatprep.subr.bf16.mxu1 %v13262_v62 }
 0x725   :  { %11373 = vmatpush3.bf16.msra.mxu1 %v12139_v56  ;;  %v12170_v56 = vld [vmem:[%s14736_s18 + $0xe0] sm:$0xff]  }
 0x726   :  { %11374 = vmatprep.subr.bf16.mxu1 %v13262_v62 }
 0x729   :  { %11375 = vmatpush3.bf16.msra.mxu1 %v12140_v2  ;;  %v12171_v2 = vld [vmem:[%s14736_s18 + $0xe8] sm:$0xff]  }
 0x72a   :  { %11376 = vmatprep.subr.bf16.mxu1 %v13262_v62 }
 0x72d   :  { %11377 = vmatpush3.bf16.msra.mxu1 %v12141_v13  ;;  %v12172_v13 = vld [vmem:[%s14736_s18 + $0xf0] sm:$0xff]  }
 0x72e   :  { %11495 = vmatprep.subr.mxu1 %v13262_v62 }
 0x730   :  { %11379 = vmatmul.mubr.msk.bf16.vlgmr.msra.gmra.mrb[8].mxu1 %vm2964_vm13, %v5162_v58  ;;  %v5858_v58 = vld [vmem:[#allocation3 + $0x49] sm:$0x7f] }
 0x731   :  { %11497 = vmatprep.mubr.msk.f32.mxu1 %vm12384_vm14, %v13262_v62 }
 0x773   :  { %v4457_v59 = vpop.f32.mrb[4].mxu1 }
 0x774   :  { %v11267_v60 = vpop.f32.mrb[5].mxu1  ;;  %11270 = vmatpush3.msk.msra.mxu0 %vm1473_vm7, %v4457_v59  ;;  %v5859_v59 = vpack.c.bf16 %v5858_v58, %v5858_v58  ;;  %v14046_v58 = vld [vmem:[%s14685_s7 + $0x134] ss:$8 sps:$4 sm:$0xff]  }
 0x775   :  { %v4460_v61 = vpop.f32.mrb[6].mxu1  ;;  %11272 = vmatmul.mubr.msk.f32.vlgmr.msra.gmra.mrb[4].mxu0 %vm3684_vm15, %v12526_v11  ;;  %11382 = vmatprep.subr.mxu0 %v13262_v62  ;;  %v12174_v60 = vld [vmem:[%s14736_s18 + $0x100] sm:$0xff]  }
 0x776   :  { %v11268_v63 = vpop.f32.mrb[7].mxu1  ;;  %11384 = vmatprep.mubr.msk.f32.mxu0 %vm12384_vm14, %v13262_v62  ;;  %v12175_v61 = vld [vmem:[%s14736_s18 + $0x108] sm:$0xff]  }
 0x777   :  { %v12176_v63 = vld [vmem:[%s14736_s18 + $0x110] sm:$0xff]  }
 0x803   :  { %v5232_v0 = vpop.f32.mrb[8].mxu1 }
 0x804   :  { %v11380_v1 = vpop.f32.mrb[9].mxu1  ;;  %11383 = vmatpush3.msk.msra.mxu0 %vm1473_vm7, %v5232_v0  ;;  %v5936_v0 = vld [vmem:[#allocation3 + $0x4a] sm:$0x7f] }
 0x805   :  { %v5235_v5 = vpop.f32.mrb[10].mxu1  ;;  %11385 = vmatmul.mubr.msk.f32.vlgmr.msra.gmra.mrb[6].mxu0 %vm3684_vm15, %v12526_v11  ;;  %11387 = vmatprep.subr.bf16.mxu0 %v13262_v62  ;;  %v5937_v1 = vpack.c.bf16 %v5936_v0, %v5936_v0  ;;  %v14082_v0 = vld [vmem:[%s14685_s7 + $0x164] ss:$8 sps:$4 sm:$0xff]  }
 0x806   :  { %v11381_v6 = vpop.f32.mrb[11].mxu1  ;;  %11388 = vmatpush3.bf16.msra.mxu0 %v12142_v10  ;;  %11395 = vmatprep.mubr.msk.bf16.mxu0 %vm12384_vm14, %v13262_v62  ;;  %v12177_v10 = vld [vmem:[%s14736_s18 + $0x118] sm:$0xff]  }
 0x807   :  { %11389 = vmatprep.subr.bf16.mxu0 %v13262_v62 }
 0x80a   :  { %11390 = vmatpush3.bf16.msra.mxu0 %v12143_v7 }
 0x80b   :  { %11391 = vmatprep.subr.bf16.mxu0 %v13262_v62 }
 0x80e   :  { %11392 = vmatpush3.bf16.msra.mxu0 %v12144_v12 }
 0x80f   :  { %11393 = vmatprep.subr.bf16.mxu0 %v13262_v62 }
 0x812   :  { %11394 = vmatpush3.bf16.msra.mxu0 %v12145_v55  ;;  %v13813_v55 = vld [vmem:[%s14685_s7 + $0x84] ss:$8 sps:$4 sm:$0xff]  }
 0x813   :  { %11399 = vmatprep.subr.bf16.mxu0 %v13262_v62 }
 0x815   :  { %11396 = vmatmul.mubr.msk.bf16.vlgmr.msra.gmra.mrb[8].mxu0 %vm2964_vm13, %v5325_v9 }
 0x816   :  { %11400 = vmatpush3.bf16.msra.mxu0 %v12146_v14  ;;  %11407 = vmatprep.mubr.msk.bf16.mxu0 %vm12384_vm14, %v13262_v62  ;;  %v13823_v14 = vld [vmem:[%s14685_s7 + $0x94] ss:$8 sps:$4 sm:$0xff]  }
 0x817   :  { %11401 = vmatprep.subr.bf16.mxu0 %v13262_v62 }
 0x81a   :  { %11402 = vmatpush3.bf16.msra.mxu0 %v12147_v16 }
 0x81b   :  { %11403 = vmatprep.subr.bf16.mxu0 %v13262_v62 }
 0x81e   :  { %11404 = vmatpush3.bf16.msra.mxu0 %v12148_v17 }
 0x81f   :  { %11405 = vmatprep.subr.bf16.mxu0 %v13262_v62 }
 0x822   :  { %11406 = vmatpush3.bf16.msra.mxu0 %v12149_v18 }
 0x823   :  { %11411 = vmatprep.subr.bf16.mxu0 %v13262_v62 }
 0x825   :  { %11408 = vmatmul.mubr.msk.bf16.vlgmr.msra.gmra.mrb[8].mxu0 %vm2964_vm13, %v5315_v22  ;;  %v14704_v22 = vmov 0  }
 0x826   :  { %11412 = vmatpush3.bf16.msra.mxu0 %v12150_v23  ;;  %11419 = vmatprep.mubr.msk.bf16.mxu0 %vm12384_vm14, %v13262_v62  ;;  %v13840_v23 = vld [vmem:[%s14685_s7 + $0xa4] ss:$8 sps:$4 sm:$0xff]  }
 0x827   :  { %11413 = vmatprep.subr.bf16.mxu0 %v13262_v62 }
 0x82a   :  { %11414 = vmatpush3.bf16.msra.mxu0 %v12151_v24  ;;  %v13846_v24 = vld [vmem:[%s14685_s7 + $0xa0] ss:$8 sps:$4 sm:$0xff]  }
 0x82b   :  { %11415 = vmatprep.subr.bf16.mxu0 %v13262_v62 }
 0x82e   :  { %11416 = vmatpush3.bf16.msra.mxu0 %v12152_v25  ;;  %v13852_v25 = vld [vmem:[%s14685_s7 + $0xb4] ss:$8 sps:$4 sm:$0xff]  }
 0x82f   :  { %11417 = vmatprep.subr.bf16.mxu0 %v13262_v62 }
 0x832   :  { %11418 = vmatpush3.bf16.msra.mxu0 %v12153_v26  ;;  %v13858_v26 = vld [vmem:[%s14685_s7 + $0xb0] ss:$8 sps:$4 sm:$0xff]  }
 0x833   :  { %11423 = vmatprep.subr.bf16.mxu0 %v13262_v62 }
 0x835   :  { %11420 = vmatmul.mubr.msk.bf16.vlgmr.msra.gmra.mrb[8].mxu0 %vm2964_vm13, %v5469_v28  ;;  %v13870_v28 = vld [vmem:[%s14685_s7 + $0xc0] ss:$8 sps:$4 sm:$0xff]  }
 0x836   :  { %11424 = vmatpush3.bf16.msra.mxu0 %v12154_v30  ;;  %11431 = vmatprep.mubr.msk.bf16.mxu0 %vm12384_vm14, %v13262_v62  ;;  %v13876_v30 = vld [vmem:[%s14685_s7 + $0xd4] ss:$8 sps:$4 sm:$0xff]  }
 0x837   :  { %11425 = vmatprep.subr.bf16.mxu0 %v13262_v62 }
 0x83a   :  { %11426 = vmatpush3.bf16.msra.mxu0 %v12155_v31  ;;  %v13882_v31 = vld [vmem:[%s14685_s7 + $0xd0] ss:$8 sps:$4 sm:$0xff]  }
 0x83b   :  { %11427 = vmatprep.subr.bf16.mxu0 %v13262_v62 }
 0x83e   :  { %11428 = vmatpush3.bf16.msra.mxu0 %v12156_v32  ;;  %v13888_v32 = vld [vmem:[%s14685_s7 + $0xe4] ss:$8 sps:$4 sm:$0xff]  }
 0x83f   :  { %11429 = vmatprep.subr.bf16.mxu0 %v13262_v62 }
 0x842   :  { %11430 = vmatpush3.bf16.msra.mxu0 %v12157_v33  ;;  %v13894_v33 = vld [vmem:[%s14685_s7 + $0xe0] ss:$8 sps:$4 sm:$0xff]  }
 0x843   :  { %11435 = vmatprep.subr.bf16.mxu0 %v13262_v62 }
 0x845   :  { %11432 = vmatmul.mubr.msk.bf16.vlgmr.msra.gmra.mrb[8].mxu0 %vm2964_vm13, %v5547_v35  ;;  %v13906_v35 = vld [vmem:[%s14685_s7 + $0xf0] ss:$8 sps:$4 sm:$0xff]  }
 0x846   :  { %11436 = vmatpush3.bf16.msra.mxu0 %v12158_v36  ;;  %11443 = vmatprep.mubr.msk.bf16.mxu0 %vm12384_vm14, %v13262_v62  ;;  %v13912_v36 = vld [vmem:[%s14685_s7 + $0x4] ss:$8 sps:$4 sm:$0xff]  }
 0x847   :  { %11437 = vmatprep.subr.bf16.mxu0 %v13262_v62 }
 0x848   :  { %v4533_v38 = vpop.f32.mrb[4].mxu0 }
 0x849   :  { %v4534_v39 = vadd.f32 %v13525_v29, %v4533_v38  ;;  %v11273_v40 = vpop.f32.mrb[5].mxu0  ;;  %v13918_v38 = vld [vmem:[%s14685_s7] ss:$8 sps:$4 sm:$0xff]  }
 0x84a   :  { %11438 = vmatpush3.bf16.msra.mxu0 %v12159_v37  ;;  %v6108_v37 = vld [vmem:[#allocation4 + $0x1] sm:$0x7]  ;;  %v13924_v40 = vld [vmem:[%s14685_s7 + $0x14] ss:$8 sps:$4 sm:$0xff]  }
 0x84b   :  { %11439 = vmatprep.subr.bf16.mxu0 %v13262_v62  ;;  %v4537_v42 = vmax.f32 %v4534_v39, 0.0  ;;  %v6109_v39 = vpack.c.bf16 %v6108_v37, %v6108_v37  ;;  %v14131_v37 = vld [vmem:[%s14685_s7 + $0x1a4] ss:$8 sps:$4 sm:$0xff]  }
 0x84c   :  { %14740 = vst [vmem:[#allocation11_spill] sm:$0xff] %v14131_v37 }
 0x84d   :  { %4538 = vst [vmem:[#allocation4 + $0x4] sm:$0xf] %v4537_v42  ;;  %v13937_v42 = vld [vmem:[%s14685_s7 + $0x24] ss:$8 sps:$4 sm:$0xff]  }
 0x84e   :  { %11440 = vmatpush3.bf16.msra.mxu0 %v12160_v41  ;;  %v13930_v41 = vld [vmem:[%s14685_s7 + $0x10] ss:$8 sps:$4 sm:$0xff]  }
 0x84f   :  { %11441 = vmatprep.subr.bf16.mxu0 %v13262_v62 }
 0x852   :  { %11442 = vmatpush3.bf16.msra.mxu0 %v12161_v43  ;;  %v13943_v43 = vld [vmem:[%s14685_s7 + $0x20] ss:$8 sps:$4 sm:$0xff]  }
 0x853   :  { %11447 = vmatprep.subr.bf16.mxu0 %v13262_v62 }
 0x855   :  { %11444 = vmatmul.mubr.msk.bf16.vlgmr.msra.gmra.mrb[8].mxu0 %vm2964_vm13, %v5625_v45  ;;  %v13955_v45 = vld [vmem:[%s14685_s7 + $0x30] ss:$8 sps:$4 sm:$0xff]  }
 0x856   :  { %11448 = vmatpush3.bf16.msra.mxu0 %v12162_v46  ;;  %11455 = vmatprep.mubr.msk.bf16.mxu0 %vm12384_vm14, %v13262_v62  ;;  %v13961_v46 = vld [vmem:[%s14685_s7 + $0x44] ss:$8 sps:$4 sm:$0xff]  }
 0x857   :  { %11449 = vmatprep.subr.bf16.mxu0 %v13262_v62 }
 0x85a   :  { %11450 = vmatpush3.bf16.msra.mxu0 %v12163_v47  ;;  %v13967_v47 = vld [vmem:[%s14685_s7 + $0x40] ss:$8 sps:$4 sm:$0xff]  }
 0x85b   :  { %11451 = vmatprep.subr.bf16.mxu0 %v13262_v62  ;;  %v12167_v62 = vld [vmem:[%s14736_s18 + $0xc8] sm:$0xff]  }
 0x85e   :  { %11452 = vmatpush3.bf16.msra.mxu0 %v12164_v48  ;;  %v13973_v48 = vld [vmem:[%s14685_s7 + $0x54] ss:$8 sps:$4 sm:$0xff]  }
 0x85f   :  { %11453 = vmatprep.subr.bf16.mxu0 %v13747_v50 }
 0x862   :  { %11454 = vmatpush3.bf16.msra.mxu0 %v12165_v21  ;;  %v13979_v21 = vld [vmem:[%s14685_s7 + $0x50] ss:$8 sps:$4 sm:$0xff]  }
 0x863   :  { %11459 = vmatprep.subr.bf16.mxu0 %v13747_v50 }
 0x865   :  { %11456 = vmatmul.mubr.msk.bf16.vlgmr.msra.gmra.mrb[8].mxu0 %vm2964_vm13, %v5703_v51  ;;  %v13991_v51 = vld [vmem:[%s14685_s7 + $0x60] ss:$8 sps:$4 sm:$0xff]  }
 0x866   :  { %11460 = vmatpush3.bf16.msra.mxu0 %v12166_v52  ;;  %11467 = vmatprep.mubr.msk.bf16.mxu0 %vm12384_vm14, %v13747_v50  ;;  %v13997_v52 = vld [vmem:[%s14685_s7 + $0x74] ss:$8 sps:$4 sm:$0xff]  }
 0x867   :  { %11461 = vmatprep.subr.bf16.mxu0 %v13747_v50 }
 0x86a   :  { %11462 = vmatpush3.bf16.msra.mxu0 %v12167_v62  ;;  %v14003_v62 = vld [vmem:[%s14685_s7 + $0x70] ss:$8 sps:$4 sm:$0xff]  }
 0x86b   :  { %11463 = vmatprep.subr.bf16.mxu0 %v13747_v50 }
 0x86e   :  { %11464 = vmatpush3.bf16.msra.mxu0 %v12168_v53  ;;  %v14009_v53 = vld [vmem:[%s14685_s7 + $0x104] ss:$8 sps:$4 sm:$0xff]  }
 0x86f   :  { %11465 = vmatprep.subr.bf16.mxu0 %v13747_v50 }
 0x872   :  { %11466 = vmatpush3.bf16.msra.mxu0 %v12169_v15  ;;  %v6090_v15 = vld [vmem:[#allocation4] sm:$0x7] }
 0x873   :  { %11471 = vmatprep.subr.bf16.mxu0 %v13747_v50 }
 0x875   :  { %11468 = vmatmul.mubr.msk.bf16.vlgmr.msra.gmra.mrb[8].mxu0 %vm2964_vm13, %v5781_v19  ;;  %v6091_v19 = vpack.c.bf16 %v6090_v15, %v6090_v15  ;;  %v14143_v15 = vld [vmem:[%s14685_s7 + $0x1b4] ss:$8 sps:$4 sm:$0xff]  }
 0x876   :  { %11472 = vmatpush3.bf16.msra.mxu0 %v12170_v56  ;;  %11479 = vmatprep.mubr.msk.bf16.mxu0 %vm12384_vm14, %v13747_v50  ;;  %v14021_v56 = vld [vmem:[%s14685_s7 + $0x114] ss:$8 sps:$4 sm:$0xff]   ;;  %14742 = vst [vmem:[#allocation13_spill] sm:$0xff] %v14143_v15 }
 0x877   :  { %11473 = vmatprep.subr.bf16.mxu0 %v13747_v50 }
 0x87a   :  { %11474 = vmatpush3.bf16.msra.mxu0 %v12171_v2  ;;  %v14027_v2 = vld [vmem:[%s14685_s7 + $0x110] ss:$8 sps:$4 sm:$0xff]  }
 0x87b   :  { %11475 = vmatprep.subr.bf16.mxu0 %v13747_v50 }
 0x87e   :  { %11476 = vmatpush3.bf16.msra.mxu0 %v12172_v13  ;;  %v14034_v13 = vld [vmem:[%s14685_s7 + $0x124] ss:$8 sps:$4 sm:$0xff]  }
 0x87f   :  { %11477 = vmatprep.subr.bf16.mxu0 %v13747_v50 }
 0x882   :  { %11478 = vmatpush3.bf16.msra.mxu0 %v12173_v57  ;;  %v14040_v57 = vld [vmem:[%s14685_s7 + $0x120] ss:$8 sps:$4 sm:$0xff]  }
 0x883   :  { %11483 = vmatprep.subr.bf16.mxu0 %v13747_v50 }
 0x885   :  { %11480 = vmatmul.mubr.msk.bf16.vlgmr.msra.gmra.mrb[8].mxu0 %vm2964_vm13, %v5859_v59  ;;  %v14052_v59 = vld [vmem:[%s14685_s7 + $0x130] ss:$8 sps:$4 sm:$0xff]  }
 0x886   :  { %11484 = vmatpush3.bf16.msra.mxu0 %v12174_v60  ;;  %11491 = vmatprep.mubr.msk.bf16.mxu0 %vm12384_vm14, %v13747_v50  ;;  %v14058_v60 = vld [vmem:[%s14685_s7 + $0x144] ss:$8 sps:$4 sm:$0xff]  }
 0x887   :  { %11485 = vmatprep.subr.bf16.mxu0 %v13747_v50 }
 0x88a   :  { %11486 = vmatpush3.bf16.msra.mxu0 %v12175_v61  ;;  %v14064_v61 = vld [vmem:[%s14685_s7 + $0x140] ss:$8 sps:$4 sm:$0xff]  }
 0x88b   :  { %11487 = vmatprep.subr.bf16.mxu0 %v13747_v50 }
 0x88e   :  { %11488 = vmatpush3.bf16.msra.mxu0 %v12176_v63  ;;  %v14070_v63 = vld [vmem:[%s14685_s7 + $0x154] ss:$8 sps:$4 sm:$0xff]  }
 0x88f   :  { %11489 = vmatprep.subr.bf16.mxu0 %v13747_v50 }
 0x892   :  { %11490 = vmatpush3.bf16.msra.mxu0 %v12177_v10  ;;  %v14076_v10 = vld [vmem:[%s14685_s7 + $0x150] ss:$8 sps:$4 sm:$0xff]  }
 0x895   :  { %11492 = vmatmul.mubr.msk.bf16.vlgmr.msra.gmra.mrb[8].mxu0 %vm2964_vm13, %v5937_v1  ;;  %v14088_v1 = vld [vmem:[%s14685_s7 + $0x160] ss:$8 sps:$4 sm:$0xff]  }
 0x896   :  { %6738 = vmatprep.mubr.f32.mxu0 %v13747_v50 }
 0x8d8   :  { %v5308_v5 = vpop.f32.mrb[6].mxu0 }
 0x8d9   :  { %v5309_v6 = vadd.f32 %v13525_v29, %v5308_v5  ;;  %v11386_v7 = vpop.f32.mrb[7].mxu0  ;;  %v14094_v5 = vld [vmem:[%s14685_s7 + $0x174] ss:$8 sps:$4 sm:$0xff]  }
 0x8da   :  { %v14106_v7 = vld [vmem:[%s14685_s7 + $0x184] ss:$8 sps:$4 sm:$0xff]  }
 0x8db   :  { %v5312_v12 = vmax.f32 %v5309_v6, 0.0  ;;  %v14100_v6 = vld [vmem:[%s14685_s7 + $0x170] ss:$8 sps:$4 sm:$0xff]  }
 0x8dd   :  { %5313 = vst [vmem:[#allocation4 + $0x8] sm:$0xf] %v5312_v12  ;;  %v6369_v12 = vld [vmem:[#allocation4 + $0x4] sm:$0x7] }
 0x968   :  { %v6007_v9 = vpop.f32.mrb[8].mxu0 }
 0x969   :  { %v11493_v16 = vpop.f32.mrb[9].mxu0  ;;  %11496 = vmatpush3.msk.msra.mxu1 %vm1473_vm7, %v6007_v9  ;;  %v14112_v9 = vld [vmem:[%s14685_s7 + $0x180] ss:$8 sps:$4 sm:$0xff]   ;;  %vm8587_vm7 = vcmask 15360  }
 0x96a   :  { %v6010_v17 = vpop.f32.mrb[10].mxu0  ;;  %11498 = vmatmul.mubr.msk.f32.vlgmr.msra.gmra.mrb[2].mxu1 %vm3684_vm15, %v12526_v11  ;;  %6207 = vmatprep.subr.bf16.mxu1 %v13813_v55  ;;  %v6370_v16 = vpack.c.bf16 %v6369_v12, %v6369_v12  ;;  %v14155_v12 = vld [vmem:[%s14685_s7 + $0x1c4] ss:$8 sps:$4 sm:$0xff]  }
 0x96b   :  { %v11494_v18 = vpop.f32.mrb[11].mxu0  ;;  %6208 = vmatpush1.bf16.msra.mxu1 %v13818_v8  ;;  %6239 = vmatprep.mubr.bf16.mxu1 %v14704_v22  ;;  %v14118_v17 = vld [vmem:[%s14685_s7 + $0x194] ss:$8 sps:$4 sm:$0xff]   ;;  %14744 = vst [vmem:[#allocation15_spill] sm:$0xff] %v14155_v12 }
 0x96c   :  { %6209 = vmatprep.subr.bf16.mxu1 %v13823_v14  ;;  %14738 = vst [vmem:[#allocation9_spill] sm:$0xff] %v14118_v17  ;;  %v14124_v18 = vld [vmem:[%s14685_s7 + $0x190] ss:$8 sps:$4 sm:$0xff]  }
 0x96d   :  { %14739 = vst [vmem:[#allocation10_spill] sm:$0xff] %v14124_v18 }
 0x96f   :  { %6210 = vmatpush1.bf16.msra.mxu1 %v13833_v20 }
 0x970   :  { %6211 = vmatprep.subr.bf16.mxu1 %v13840_v23 }
 0x973   :  { %6212 = vmatpush1.bf16.msra.mxu1 %v13846_v24 }
 0x974   :  { %6213 = vmatprep.subr.bf16.mxu1 %v13852_v25 }
 0x977   :  { %6214 = vmatpush1.bf16.msra.mxu1 %v13858_v26 }
 0x978   :  { %6215 = vmatprep.subr.bf16.mxu1 %v13864_v27 }
 0x97b   :  { %6216 = vmatpush1.bf16.msra.mxu1 %v13870_v28 }
 0x97c   :  { %6217 = vmatprep.subr.bf16.mxu1 %v13876_v30 }
 0x97f   :  { %6218 = vmatpush1.bf16.msra.mxu1 %v13882_v31 }
 0x980   :  { %6219 = vmatprep.subr.bf16.mxu1 %v13888_v32 }
 0x983   :  { %6220 = vmatpush1.bf16.msra.mxu1 %v13894_v33 }
 0x984   :  { %6221 = vmatprep.subr.bf16.mxu1 %v13900_v34 }
 0x987   :  { %6222 = vmatpush1.bf16.msra.mxu1 %v13906_v35 }
 0x988   :  { %6328 = vmatprep.subr.bf16.mxu1 %v13912_v36 }
 0x98a   :  { %6240 = vmatmul.mubr.bf16.vlgmr.msra.gmra.mrb[12].mxu1 %v6109_v39  ;;  %v14137_v39 = vld [vmem:[%s14685_s7 + $0x1a0] ss:$8 sps:$4 sm:$0xff]  }
 0x98b   :  { %6329 = vmatpush1.bf16.msra.mxu1 %v13918_v38  ;;  %6360 = vmatprep.mubr.bf16.mxu1 %v14704_v22  ;;  %14741 = vst [vmem:[#allocation12_spill] sm:$0xff] %v14137_v39 }
 0x98c   :  { %6330 = vmatprep.subr.bf16.mxu1 %v13924_v40 }
 0x98f   :  { %6331 = vmatpush1.bf16.msra.mxu1 %v13930_v41 }
 0x990   :  { %6332 = vmatprep.subr.bf16.mxu1 %v13937_v42 }
 0x993   :  { %6333 = vmatpush1.bf16.msra.mxu1 %v13943_v43 }
 0x994   :  { %6334 = vmatprep.subr.bf16.mxu1 %v13949_v44 }
 0x997   :  { %6335 = vmatpush1.bf16.msra.mxu1 %v13955_v45 }
 0x998   :  { %6336 = vmatprep.subr.bf16.mxu1 %v13961_v46 }
 0x99b   :  { %6337 = vmatpush1.bf16.msra.mxu1 %v13967_v47 }
 0x99c   :  { %6338 = vmatprep.subr.bf16.mxu1 %v13973_v48 }
 0x99f   :  { %6339 = vmatpush1.bf16.msra.mxu1 %v13979_v21 }
 0x9a0   :  { %6340 = vmatprep.subr.bf16.mxu1 %v13985_v49 }
 0x9a3   :  { %6341 = vmatpush1.bf16.msra.mxu1 %v13991_v51 }
 0x9a4   :  { %6342 = vmatprep.subr.bf16.mxu1 %v13997_v52 }
 0x9a7   :  { %6343 = vmatpush1.bf16.msra.mxu1 %v14003_v62 }
 0x9a8   :  { %6468 = vmatprep.subr.bf16.mxu1 %v14009_v53 }
 0x9aa   :  { %6361 = vmatmul.mubr.bf16.vlgmr.msra.gmra.mrb[12].mxu1 %v6091_v19  ;;  %v14149_v19 = vld [vmem:[%s14685_s7 + $0x1b0] ss:$8 sps:$4 sm:$0xff]  }
 0x9ab   :  { %6469 = vmatpush1.bf16.msra.mxu1 %v14015_v54  ;;  %6500 = vmatprep.mubr.bf16.mxu1 %v14704_v22  ;;  %14743 = vst [vmem:[#allocation14_spill] sm:$0xff] %v14149_v19 }
 0x9ac   :  { %6470 = vmatprep.subr.bf16.mxu1 %v14021_v56 }
 0x9af   :  { %6471 = vmatpush1.bf16.msra.mxu1 %v14027_v2 }
 0x9b0   :  { %6472 = vmatprep.subr.bf16.mxu1 %v14034_v13 }
 0x9b3   :  { %6473 = vmatpush1.bf16.msra.mxu1 %v14040_v57 }
 0x9b4   :  { %6474 = vmatprep.subr.bf16.mxu1 %v14046_v58 }
 0x9b7   :  { %6475 = vmatpush1.bf16.msra.mxu1 %v14052_v59 }
 0x9b8   :  { %6476 = vmatprep.subr.bf16.mxu1 %v14058_v60 }
 0x9bb   :  { %6477 = vmatpush1.bf16.msra.mxu1 %v14064_v61 }
 0x9bc   :  { %6478 = vmatprep.subr.bf16.mxu1 %v14070_v63 }
 0x9bf   :  { %6479 = vmatpush1.bf16.msra.mxu1 %v14076_v10 }
 0x9c0   :  { %6480 = vmatprep.subr.bf16.mxu1 %v14082_v0 }
 0x9c3   :  { %6481 = vmatpush1.bf16.msra.mxu1 %v14088_v1 }
 0x9c4   :  { %6482 = vmatprep.subr.bf16.mxu1 %v14094_v5 }
 0x9c7   :  { %6483 = vmatpush1.bf16.msra.mxu1 %v14100_v6 }
 0x9c8   :  { %6610 = vmatprep.subr.bf16.mxu1 %v14106_v7 }
 0x9ca   :  { %6501 = vmatmul.mubr.bf16.vlgmr.msra.gmra.mrb[12].mxu1 %v6370_v16  ;;  %v14161_v16 = vld [vmem:[%s14685_s7 + $0x1c0] ss:$8 sps:$4 sm:$0xff]  }
 0x9cb   :  { %6611 = vmatpush1.bf16.msra.mxu1 %v14112_v9  ;;  %6642 = vmatprep.mubr.bf16.mxu1 %v14704_v22  ;;  %14745 = vst [vmem:[#allocation16_spill] sm:$0xff] %v14161_v16  ;;  %v14167_v22 = vld [vmem:[%s14685_s7 + $0x1d4] ss:$8 sps:$4 sm:$0xff]  }
 0x9cc   :  { %6612 = vmatprep.subr.bf16.mxu1 %v14118_v17  ;;  %14746 = vst [vmem:[#allocation17_spill] sm:$0xff] %v14167_v22 }
 0x9cf   :  { %6613 = vmatpush1.bf16.msra.mxu1 %v14124_v18 }
 0x9d0   :  { %6614 = vmatprep.subr.bf16.mxu1 %v14131_v37 }
 0x9d3   :  { %6615 = vmatpush1.bf16.msra.mxu1 %v14137_v39 }
 0x9d4   :  { %6616 = vmatprep.subr.bf16.mxu1 %v14143_v15 }
 0x9d7   :  { %6617 = vmatpush1.bf16.msra.mxu1 %v14149_v19 }
 0x9d8   :  { %6618 = vmatprep.subr.bf16.mxu1 %v14155_v12  ;;  %v14185_v12 = vld [vmem:[%s14685_s7 + $0x1e0] ss:$8 sps:$4 sm:$0xff]  }
 0x9d9   :  { %14749 = vst [vmem:[#allocation20_spill] sm:$0xff] %v14185_v12 }
 0x9db   :  { %6619 = vmatpush1.bf16.msra.mxu1 %v14161_v16  ;;  %v14191_v16 = vld [vmem:[%s14685_s7 + $0x1f4] ss:$8 sps:$4 sm:$0xff]  }
 0x9dc   :  { %6620 = vmatprep.subr.bf16.mxu1 %v14167_v22  ;;  %14750 = vst [vmem:[#allocation21_spill] sm:$0xff] %v14191_v16  ;;  %v14197_v22 = vld [vmem:[%s14685_s7 + $0x1f0] ss:$8 sps:$4 sm:$0xff]  }
 0x9df   :  { %6621 = vmatpush1.bf16.msra.mxu1 %v14173_v4  ;;  %v6511_v4 = vld [vmem:[#allocation4 + $0x5] sm:$0x7] }
 0x9e0   :  { %6622 = vmatprep.subr.bf16.mxu1 %v14179_v3  ;;  %v6512_v19 = vpack.c.bf16 %v6511_v4, %v6511_v4  ;;  %v6770_v4 = vld [vmem:[#allocation4 + $0x9] sm:$0x7] }
 0x9e3   :  { %6623 = vmatpush1.bf16.msra.mxu1 %v14185_v12 }
 0x9e4   :  { %6624 = vmatprep.subr.bf16.mxu1 %v14191_v16 }
 0x9e7   :  { %6625 = vmatpush1.bf16.msra.mxu1 %v14197_v22 }
 0x9ea   :  { %6643 = vmatmul.mubr.bf16.vlgmr.msra.gmra.mrb[12].mxu1 %v6512_v19  ;;  %v12313_v19 = vld [vmem:[%s14687_s9 + $0x188] sm:$0xff]  }
 0x9eb   :  { %7382 = vmatprep.mubr.f32.mxu1 %v13747_v50 }
 0xa3d   :  { %v6083_v3 = vpop.f32.mrb[2].mxu1 }
 0xa3e   :  { %v6084_v15 = vadd.f32 %v13525_v29, %v6083_v3  ;;  %v11499_v39 = vpop.f32.mrb[3].mxu1  ;;  %v14751_v3 = vmov 0   ;;  %v6771_v29 = vpack.c.bf16 %v6770_v4, %v6770_v4  ;;  %v12290_v4 = vld [vmem:[%s14687_s9 + $0x40] sm:$0xff]  }
 0xa3f   :  { %v12309_v39 = vld [vmem:[%s14687_s9 + $0x180] sm:$0xff]  }
 0xa40   :  { %v6087_v37 = vmax.f32 %v6084_v15, 0.0  ;;  %v12312_v15 = vld [vmem:[%s14687_s9 + $0x1c8] sm:$0xff]  }
 0xa42   :  { %6088 = vst [vmem:[#allocation4 + $0xc] sm:$0xf] %v6087_v37  ;;  %v12308_v37 = vld [vmem:[%s14687_s9 + $0x1c0] sm:$0xff]  }
 0xabd   :  { %v6644_v12 = vpop.f32.mrb[12].mxu1 }
 0xabe   :  { %v6646_v18 = vpop.f32.mrb[13].mxu1 }
 0xabf   :  { %v6648_v17 = vpop.f32.mrb[14].mxu1  ;;  %9938 = vmatprep.subr.msk.mxu0 %vm6667_vm0, %v6646_v18 }
 0xac0   :  { %v6649_v16 = vpop.f32.mrb[15].mxu1  ;;  %9939 = vmatpush1.msk.msra.mxu0 %vm6667_vm0, %v6644_v12 }
 0xac1   :  { %9940 = vmatmul.mubr.msk.f32.vlgmr.msra.gmra.mrb[12].mxu0 %vm122_vm6, %v12526_v11  ;;  %6868 = vmatprep.subr.bf16.mxu0 %v13813_v55  ;;  %v6752_v55 = vld [vmem:[#allocation4 + $0x8] sm:$0x7] }
 0xac2   :  { %6869 = vmatpush1.bf16.msra.mxu0 %v13818_v8  ;;  %6900 = vmatprep.mubr.bf16.mxu0 %v14751_v3  ;;  %v6753_v8 = vpack.c.bf16 %v6752_v55, %v6752_v55  ;;  %v12291_v55 = vld [vmem:[%s14687_s9] sm:$0xff]  }
 0xac3   :  { %6870 = vmatprep.subr.bf16.mxu0 %v13823_v14  ;;  %v7030_v14 = vld [vmem:[#allocation4 + $0xc] sm:$0x7] }
 0xac6   :  { %6871 = vmatpush1.bf16.msra.mxu0 %v13833_v20  ;;  %v7031_v20 = vpack.c.bf16 %v7030_v14, %v7030_v14  ;;  %v12292_v14 = vld [vmem:[%s14687_s9 + $0x48] sm:$0xff]  }
 0xac7   :  { %6872 = vmatprep.subr.bf16.mxu0 %v13840_v23  ;;  %v14752_v23 = vld [vmem:[#allocation9_spill] sm:$0xff] }
 0xaca   :  { %6873 = vmatpush1.bf16.msra.mxu0 %v13846_v24  ;;  %v14753_v24 = vld [vmem:[#allocation10_spill] sm:$0xff] }
 0xacb   :  { %6874 = vmatprep.subr.bf16.mxu0 %v13852_v25  ;;  %v14754_v25 = vld [vmem:[#allocation11_spill] sm:$0xff] }
 0xace   :  { %6875 = vmatpush1.bf16.msra.mxu0 %v13858_v26  ;;  %v14755_v26 = vld [vmem:[#allocation12_spill] sm:$0xff] }
 0xacf   :  { %6876 = vmatprep.subr.bf16.mxu0 %v13864_v27  ;;  %v14756_v27 = vld [vmem:[#allocation13_spill] sm:$0xff] }
 0xad2   :  { %6877 = vmatpush1.bf16.msra.mxu0 %v13870_v28  ;;  %v14757_v28 = vld [vmem:[#allocation14_spill] sm:$0xff] }
 0xad3   :  { %6878 = vmatprep.subr.bf16.mxu0 %v13876_v30  ;;  %v14758_v30 = vld [vmem:[#allocation15_spill] sm:$0xff] }
 0xad6   :  { %6879 = vmatpush1.bf16.msra.mxu0 %v13882_v31  ;;  %v14759_v31 = vld [vmem:[#allocation16_spill] sm:$0xff] }
 0xad7   :  { %6880 = vmatprep.subr.bf16.mxu0 %v13888_v32  ;;  %v14760_v32 = vld [vmem:[#allocation17_spill] sm:$0xff] }
 0xada   :  { %6881 = vmatpush1.bf16.msra.mxu0 %v13894_v33  ;;  %v14761_v33 = vld [vmem:[#allocation18_spill] sm:$0xff] }
 0xadb   :  { %6882 = vmatprep.subr.bf16.mxu0 %v13900_v34  ;;  %v14762_v34 = vld [vmem:[#allocation19_spill] sm:$0xff] }
 0xade   :  { %6883 = vmatpush1.bf16.msra.mxu0 %v13906_v35  ;;  %v14763_v35 = vld [vmem:[#allocation20_spill] sm:$0xff] }
 0xadf   :  { %6989 = vmatprep.subr.bf16.mxu0 %v13912_v36  ;;  %v14764_v36 = vld [vmem:[#allocation21_spill] sm:$0xff] }
 0xae1   :  { %6901 = vmatmul.mubr.bf16.vlgmr.msra.gmra.mrb[16].mxu0 %v6771_v29 }
 0xae2   :  { %6990 = vmatpush1.bf16.msra.mxu0 %v13918_v38  ;;  %7021 = vmatprep.mubr.bf16.mxu0 %v14751_v3  ;;  %v12274_v38 = vld [vmem:[%s14687_s9 + $0xc0] sm:$0xff]  }
 0xae3   :  { %6991 = vmatprep.subr.bf16.mxu0 %v13924_v40  ;;  %v7171_v40 = vld [vmem:[#allocation4 + $0xd] sm:$0x7] }
 0xae6   :  { %6992 = vmatpush1.bf16.msra.mxu0 %v13930_v41  ;;  %v12275_v41 = vld [vmem:[%s14687_s9 + $0x80] sm:$0xff]  }
 0xae7   :  { %6993 = vmatprep.subr.bf16.mxu0 %v13937_v42  ;;  %v7172_v42 = vpack.c.bf16 %v7171_v40, %v7171_v40  ;;  %v12306_v40 = vld [vmem:[%s14687_s9 + $0x140] sm:$0xff]  }
 0xaea   :  { %6994 = vmatpush1.bf16.msra.mxu0 %v13943_v43  ;;  %v12276_v43 = vld [vmem:[%s14687_s9 + $0xc8] sm:$0xff]  }
 0xaeb   :  { %6995 = vmatprep.subr.bf16.mxu0 %v13949_v44  ;;  %v12277_v44 = vld [vmem:[%s14687_s9 + $0x88] sm:$0xff]  }
 0xaee   :  { %6996 = vmatpush1.bf16.msra.mxu0 %v13955_v45  ;;  %v12279_v45 = vld [vmem:[%s14687_s9 + $0x90] sm:$0xff]  }
 0xaef   :  { %6997 = vmatprep.subr.bf16.mxu0 %v13961_v46  ;;  %v12280_v46 = vld [vmem:[%s14687_s9 + $0xd8] sm:$0xff]  }
 0xaf2   :  { %6998 = vmatpush1.bf16.msra.mxu0 %v13967_v47  ;;  %v12281_v47 = vld [vmem:[%s14687_s9 + $0x98] sm:$0xff]  }
 0xaf3   :  { %6999 = vmatprep.subr.bf16.mxu0 %v13973_v48  ;;  %v12282_v48 = vld [vmem:[%s14687_s9 + $0xe0] sm:$0xff]  }
 0xaf6   :  { %7000 = vmatpush1.bf16.msra.mxu0 %v13979_v21  ;;  %v12283_v21 = vld [vmem:[%s14687_s9 + $0xa0] sm:$0xff]  }
 0xaf7   :  { %7001 = vmatprep.subr.bf16.mxu0 %v13985_v49  ;;  %v12284_v49 = vld [vmem:[%s14687_s9 + $0xe8] sm:$0xff]  }
 0xafa   :  { %7002 = vmatpush1.bf16.msra.mxu0 %v13991_v51  ;;  %v12285_v51 = vld [vmem:[%s14687_s9 + $0xa8] sm:$0xff]  }
 0xafb   :  { %7003 = vmatprep.subr.bf16.mxu0 %v13997_v52  ;;  %v12286_v52 = vld [vmem:[%s14687_s9 + $0xf0] sm:$0xff]  }
 0xafe   :  { %7004 = vmatpush1.bf16.msra.mxu0 %v14003_v62  ;;  %v12287_v62 = vld [vmem:[%s14687_s9 + $0xb0] sm:$0xff]  }
 0xaff   :  { %7128 = vmatprep.subr.bf16.mxu0 %v14009_v53  ;;  %v12288_v53 = vld [vmem:[%s14687_s9 + $0xf8] sm:$0xff]  }
 0xb01   :  { %7022 = vmatmul.mubr.bf16.vlgmr.msra.gmra.mrb[16].mxu0 %v6753_v8 }
 0xb02   :  { %7129 = vmatpush1.bf16.msra.mxu0 %v14015_v54  ;;  %7160 = vmatprep.mubr.bf16.mxu0 %v14751_v3  ;;  %v12289_v54 = vld [vmem:[%s14687_s9 + $0xb8] sm:$0xff]  }
 0xb03   :  { %7130 = vmatprep.subr.bf16.mxu0 %v14021_v56  ;;  %v14765_v56 = vld [vmem:[#allocation7_spill] sm:$0xff] }
 0xb06   :  { %7131 = vmatpush1.bf16.msra.mxu0 %v14027_v2  ;;  %v14324_v2 = vsub.s32 0, %v14765_v56 }
 0xb07   :  { %7132 = vmatprep.subr.bf16.mxu0 %v14034_v13  ;;  %v6089_v13 = vld [vmem:[%s14686_s8] sm:$0x3] }
 0xb0a   :  { %7133 = vmatpush1.bf16.msra.mxu0 %v14040_v57  ;;  %v14330_v57 = vsub.s32 1, %v14765_v56  ;;  %v12326_v56 = vld [vmem:[%s14687_s9 + $0x168] sm:$0xff]  }
 0xb0b   :  { %7134 = vmatprep.subr.bf16.mxu0 %v14046_v58  ;;  %v14333_v58 = vrot.slane %v6089_v13, %v14324_v2 }
 0xb0e   :  { %7135 = vmatpush1.bf16.msra.mxu0 %v14052_v59  ;;  %v14336_v59 = vrot.slane %v6089_v13, %v14330_v57  ;;  %v12328_v13 = vld [vmem:[%s14687_s9 + $0x1e8] sm:$0xff]  }
 0xb0f   :  { %7136 = vmatprep.subr.bf16.mxu0 %v14058_v60 }
 0xb12   :  { %7137 = vmatpush1.bf16.msra.mxu0 %v14064_v61 }
 0xb13   :  { %7138 = vmatprep.subr.bf16.mxu0 %v14070_v63 }
 0xb16   :  { %7139 = vmatpush1.bf16.msra.mxu0 %v14076_v10 }
 0xb17   :  { %7140 = vmatprep.subr.bf16.mxu0 %v14082_v0 }
 0xb1a   :  { %7141 = vmatpush1.bf16.msra.mxu0 %v14088_v1 }
 0xb1b   :  { %7142 = vmatprep.subr.bf16.mxu0 %v14094_v5 }
 0xb1e   :  { %7143 = vmatpush1.bf16.msra.mxu0 %v14100_v6 }
 0xb1f   :  { %7269 = vmatprep.subr.bf16.mxu0 %v14106_v7 }
 0xb21   :  { %7161 = vmatmul.mubr.bf16.vlgmr.msra.gmra.mrb[16].mxu0 %v7031_v20 }
 0xb22   :  { %7270 = vmatpush1.bf16.msra.mxu0 %v14112_v9  ;;  %7301 = vmatprep.mubr.bf16.mxu0 %v14751_v3 }
 0xb23   :  { %7271 = vmatprep.subr.bf16.mxu0 %v14752_v23 }
 0xb26   :  { %7272 = vmatpush1.bf16.msra.mxu0 %v14753_v24  ;;  %v12293_v24 = vld [vmem:[%s14687_s9 + $0x8] sm:$0xff]  }
 0xb27   :  { %7273 = vmatprep.subr.bf16.mxu0 %v14754_v25  ;;  %v12294_v25 = vld [vmem:[%s14687_s9 + $0x50] sm:$0xff]  }
 0xb2a   :  { %7274 = vmatpush1.bf16.msra.mxu0 %v14755_v26  ;;  %v12295_v26 = vld [vmem:[%s14687_s9 + $0x10] sm:$0xff]  }
 0xb2b   :  { %7275 = vmatprep.subr.bf16.mxu0 %v14756_v27  ;;  %v12297_v27 = vld [vmem:[%s14687_s9 + $0x18] sm:$0xff]  }
 0xb2e   :  { %7276 = vmatpush1.bf16.msra.mxu0 %v14757_v28  ;;  %v12298_v28 = vld [vmem:[%s14687_s9 + $0x60] sm:$0xff]  }
 0xb2f   :  { %7277 = vmatprep.subr.bf16.mxu0 %v14758_v30  ;;  %v12299_v30 = vld [vmem:[%s14687_s9 + $0x20] sm:$0xff]  }
 0xb32   :  { %7278 = vmatpush1.bf16.msra.mxu0 %v14759_v31  ;;  %v12300_v31 = vld [vmem:[%s14687_s9 + $0x68] sm:$0xff]  }
 0xb33   :  { %7279 = vmatprep.subr.bf16.mxu0 %v14760_v32  ;;  %v12301_v32 = vld [vmem:[%s14687_s9 + $0x28] sm:$0xff]  }
 0xb36   :  { %7280 = vmatpush1.bf16.msra.mxu0 %v14761_v33  ;;  %v12302_v33 = vld [vmem:[%s14687_s9 + $0x70] sm:$0xff]  }
 0xb37   :  { %7281 = vmatprep.subr.bf16.mxu0 %v14762_v34  ;;  %v12303_v34 = vld [vmem:[%s14687_s9 + $0x30] sm:$0xff]  }
 0xb3a   :  { %7282 = vmatpush1.bf16.msra.mxu0 %v14763_v35  ;;  %v12304_v35 = vld [vmem:[%s14687_s9 + $0x78] sm:$0xff]  }
 0xb3b   :  { %7283 = vmatprep.subr.bf16.mxu0 %v14764_v36  ;;  %v12305_v36 = vld [vmem:[%s14687_s9 + $0x38] sm:$0xff]  }
 0xb3e   :  { %7284 = vmatpush1.bf16.msra.mxu0 %v14197_v22  ;;  %v12278_v22 = vld [vmem:[%s14687_s9 + $0xd0] sm:$0xff]  }
 0xb3f   :  { %10579 = vmatprep.subr.bf16.mxu0 %v12274_v38 }
 0xb41   :  { %7302 = vmatmul.mubr.bf16.vlgmr.msra.gmra.mrb[16].mxu0 %v7172_v42 }
 0xb42   :  { %10580 = vmatpush3.bf16.msra.mxu0 %v12275_v41  ;;  %v12307_v41 = vld [vmem:[%s14687_s9 + $0x100] sm:$0xff]  }
 0xb43   :  { %10581 = vmatprep.subr.bf16.mxu0 %v12276_v43  ;;  %v12310_v43 = vld [vmem:[%s14687_s9 + $0x148] sm:$0xff]  }
 0xb46   :  { %10582 = vmatpush3.bf16.msra.mxu0 %v12277_v44  ;;  %v12311_v44 = vld [vmem:[%s14687_s9 + $0x108] sm:$0xff]  }
 0xb47   :  { %10583 = vmatprep.subr.bf16.mxu0 %v12278_v22  ;;  %v12314_v22 = vld [vmem:[%s14687_s9 + $0x150] sm:$0xff]  }
 0xb4a   :  { %10584 = vmatpush3.bf16.msra.mxu0 %v12279_v45  ;;  %v12316_v45 = vld [vmem:[%s14687_s9 + $0x1d0] sm:$0xff]  }
 0xb4b   :  { %10585 = vmatprep.subr.bf16.mxu0 %v12280_v46  ;;  %v12315_v46 = vld [vmem:[%s14687_s9 + $0x110] sm:$0xff]  }
 0xb4e   :  { %10586 = vmatpush3.bf16.msra.mxu0 %v12281_v47  ;;  %v12317_v47 = vld [vmem:[%s14687_s9 + $0x190] sm:$0xff]  }
 0xb4f   :  { %10587 = vmatprep.subr.bf16.mxu0 %v12282_v48  ;;  %v12318_v48 = vld [vmem:[%s14687_s9 + $0x158] sm:$0xff]  }
 0xb52   :  { %10588 = vmatpush3.bf16.msra.mxu0 %v12283_v21  ;;  %v12320_v21 = vld [vmem:[%s14687_s9 + $0x1d8] sm:$0xff]  }
 0xb53   :  { %10589 = vmatprep.subr.bf16.mxu0 %v12284_v49  ;;  %v12319_v49 = vld [vmem:[%s14687_s9 + $0x118] sm:$0xff]  }
 0xb56   :  { %10590 = vmatpush3.bf16.msra.mxu0 %v12285_v51  ;;  %v12321_v51 = vld [vmem:[%s14687_s9 + $0x198] sm:$0xff]  }
 0xb57   :  { %10591 = vmatprep.subr.bf16.mxu0 %v12286_v52  ;;  %v12322_v52 = vld [vmem:[%s14687_s9 + $0x160] sm:$0xff]  }
 0xb5a   :  { %10592 = vmatpush3.bf16.msra.mxu0 %v12287_v62  ;;  %v12324_v62 = vld [vmem:[%s14687_s9 + $0x1e0] sm:$0xff]  }
 0xb5b   :  { %10593 = vmatprep.subr.bf16.mxu0 %v12288_v53  ;;  %v12323_v53 = vld [vmem:[%s14687_s9 + $0x120] sm:$0xff]  }
 0xb5e   :  { %10594 = vmatpush3.bf16.msra.mxu0 %v12289_v54  ;;  %v12325_v54 = vld [vmem:[%s14687_s9 + $0x1a0] sm:$0xff]  }
 0xb5f   :  { %10623 = vmatprep.subr.bf16.mxu0 %v12308_v37 }
 0xb94   :  { %v6740_v60 = vpop.f32.mrb[12].mxu0 }
 0xb95   :  { %v6741_v61 = vadd.f32 %v6740_v60, %v14333_v58  ;;  %v6742_v63 = vpop.f32.mrb[13].mxu0  ;;  %v12327_v60 = vld [vmem:[%s14687_s9 + $0x128] sm:$0xff]  }
 0xb96   :  { %v6743_v10 = vadd.f32 %v6742_v63, %v14336_v59  ;;  %v12330_v63 = vld [vmem:[%s14687_s9 + $0x170] sm:$0xff]  }
 0xb97   :  { %v6745_v0 = vmax.f32 %v6741_v61, 0.0  ;;  %v12329_v61 = vld [vmem:[%s14687_s9 + $0x1a8] sm:$0xff]  }
 0xb98   :  { %v6746_v1 = vmax.f32 %v6743_v10, 0.0  ;;  %v12332_v10 = vld [vmem:[%s14687_s9 + $0x1f0] sm:$0xff]  }
 0xb9a   :  { %v6749_v5 = vcombine.low %v6745_v0, %v6746_v1  ;;  %v12331_v0 = vld [vmem:[%s14687_s9 + $0x130] sm:$0xff]  }
 0xb9b   :  { %v12333_v1 = vld [vmem:[%s14687_s9 + $0x1b0] sm:$0xff]  }
 0xb9c   :  { %6751 = vst [vmem:[#allocation5] sm:$0x33] %v6749_v5  ;;  %v12334_v5 = vld [vmem:[%s14687_s9 + $0x178] sm:$0xff]  }
 0xba3   :  { %v7582_v6 = vld [vmem:[#allocation5 + $0x1] ss:$4 sm:$0x3]  ;;  %v7398_v12 = vld [vmem:[#allocation5] ss:$4 sm:$0x3] }
 0xba4   :  { %v7587_v7 = vrot.slane %v7582_v6, %v14324_v2  ;;  %v7591_v9 = vrot.slane %v7582_v6, %v14330_v57  ;;  %v7407_v16 = vrot.slane %v7398_v12, %v14330_v57  ;;  %v7403_v38 = vrot.slane %v7398_v12, %v14324_v2  ;;  %v12336_v6 = vld [vmem:[%s14687_s9 + $0x1f8] sm:$0xff]  }
 0xba6   :  { %v7594_v17 = vpack.c.bf16 %v7587_v7, %v7587_v7  ;;  %v7595_v18 = vpack.c.bf16 %v7591_v9, %v7591_v9  ;;  %v7411_v23 = vpack.c.bf16 %v7407_v16, %v7407_v16  ;;  %v7410_v42 = vpack.c.bf16 %v7403_v38, %v7403_v38  ;;  %v12335_v7 = vld [vmem:[%s14687_s9 + $0x138] sm:$0xff]  }
 0xba7   :  { %v12386_v38 = vmov 0.0|0.0  }
 0xba8   :  { %7757 = vmatprep.mubr.bf16.mxu0 %v7595_v18  ;;  %v12337_v18 = vld [vmem:[%s14687_s9 + $0x1b8] sm:$0xff]  }
 0xba9   :  { %7758 = vmatmul.mubr.bf16.vlgmr.msra.gmra.mrb[20].mxu0 %v7594_v17 }
 0xbaa   :  { %10624 = vmatpush3.bf16.msra.mxu0 %v12309_v39 }
 0xbab   :  { %10625 = vmatprep.subr.bf16.mxu0 %v12312_v15 }
 0xbae   :  { %10626 = vmatpush3.bf16.msra.mxu0 %v12313_v19 }
 0xbaf   :  { %10627 = vmatprep.subr.bf16.mxu0 %v12316_v45 }
 0xbb2   :  { %10628 = vmatpush3.bf16.msra.mxu0 %v12317_v47  ;;  %v8136_v47 = vld [vmem:[%s14699_s21] sm:$0x1] }
 0xbb3   :  { %10629 = vmatprep.subr.bf16.mxu0 %v12320_v21 }
 0xbb6   :  { %10630 = vmatpush3.bf16.msra.mxu0 %v12321_v51 }
 0xbb7   :  { %10631 = vmatprep.subr.bf16.mxu0 %v12324_v62 }
 0xbba   :  { %10632 = vmatpush3.bf16.msra.mxu0 %v12325_v54 }
 0xbbb   :  { %10633 = vmatprep.subr.bf16.mxu0 %v12328_v13 }
 0xbbe   :  { %10634 = vmatpush3.bf16.msra.mxu0 %v12329_v61 }
 0xbbf   :  { %10635 = vmatprep.subr.bf16.mxu0 %v12332_v10 }
 0xbc2   :  { %10636 = vmatpush3.bf16.msra.mxu0 %v12333_v1 }
 0xbc3   :  { %10637 = vmatprep.subr.bf16.mxu0 %v12336_v6 }
 0xbc6   :  { %10638 = vmatpush3.bf16.msra.mxu0 %v12337_v18 }
 0xbc7   :  { %11567 = vmatprep.subr.bf16.mxu0 %v12386_v38 }
 0xc14   :  { %v7303_v3 = vpop.f32.mrb[16].mxu0 }
 0xc15   :  { %v7305_v29 = vpop.f32.mrb[17].mxu0 }
 0xc16   :  { %v7307_v8 = vpop.f32.mrb[18].mxu0  ;;  %10053 = vmatprep.subr.msk.mxu1 %vm6667_vm0, %v7305_v29 }
 0xc17   :  { %v7308_v20 = vpop.f32.mrb[19].mxu0  ;;  %10054 = vmatpush1.msk.msra.mxu1 %vm6667_vm0, %v7303_v3 }
 0xc18   :  { %10055 = vmatmul.mubr.msk.f32.vlgmr.msra.gmra.mrb[16].mxu1 %vm122_vm6, %v12526_v11  ;;  %10557 = vmatprep.subr.bf16.mxu1 %v12290_v4  ;;  %v12296_v11 = vld [vmem:[%s14687_s9 + $0x58] sm:$0xff]  }
 0xc19   :  { %10558 = vmatpush3.bf16.msra.mxu1 %v12291_v55  ;;  %7572 = vmatprep.mubr.bf16.mxu1 %v7411_v23 }
 0xc1a   :  { %10559 = vmatprep.subr.bf16.mxu1 %v12292_v14 }
 0xc1d   :  { %10560 = vmatpush3.bf16.msra.mxu1 %v12293_v24 }
 0xc1e   :  { %10561 = vmatprep.subr.bf16.mxu1 %v12294_v25 }
 0xc21   :  { %10562 = vmatpush3.bf16.msra.mxu1 %v12295_v26 }
 0xc22   :  { %10563 = vmatprep.subr.bf16.mxu1 %v12296_v11 }
 0xc25   :  { %10564 = vmatpush3.bf16.msra.mxu1 %v12297_v27 }
 0xc26   :  { %10565 = vmatprep.subr.bf16.mxu1 %v12298_v28 }
 0xc29   :  { %10566 = vmatpush3.bf16.msra.mxu1 %v12299_v30 }
 0xc2a   :  { %10567 = vmatprep.subr.bf16.mxu1 %v12300_v31 }
 0xc2d   :  { %10568 = vmatpush3.bf16.msra.mxu1 %v12301_v32 }
 0xc2e   :  { %10569 = vmatprep.subr.bf16.mxu1 %v12302_v33 }
 0xc31   :  { %10570 = vmatpush3.bf16.msra.mxu1 %v12303_v34 }
 0xc32   :  { %10571 = vmatprep.subr.bf16.mxu1 %v12304_v35  ;;  %v8142_v35 = vld [vmem:[%s14689_s11 + $0x10] sm:$0xff] }
 0xc35   :  { %10572 = vmatpush3.bf16.msra.mxu1 %v12305_v36  ;;  %v8143_v36 = vld [vmem:[%s14689_s11 + $0x18] sm:$0xff] }
 0xc36   :  { %10601 = vmatprep.subr.bf16.mxu1 %v12306_v40  ;;  %v8140_v40 = vld [vmem:[%s14689_s11] sm:$0xff] }
 0xc38   :  { %7573 = vmatmul.mubr.bf16.vlgmr.msra.gmra.mrb[20].mxu1 %v7410_v42 }
 0xc39   :  { %10602 = vmatpush3.bf16.msra.mxu1 %v12307_v41  ;;  %v8141_v41 = vld [vmem:[%s14689_s11 + $0x8] sm:$0xff] }
 0xc3a   :  { %10603 = vmatprep.subr.bf16.mxu1 %v12310_v43  ;;  %v11568_v42 = vpack.c.bf16 %v8141_v41, %v8140_v40  ;;  %v8291_v43 = vld [vmem:[%s14690_s12] sm:$0xff] }
 0xc3d   :  { %10604 = vmatpush3.bf16.msra.mxu1 %v12311_v44  ;;  %v8292_v44 = vld [vmem:[%s14690_s12 + $0x8] sm:$0xff] }
 0xc3e   :  { %10605 = vmatprep.subr.bf16.mxu1 %v12314_v22  ;;  %v14529_v22 = vld [vmem:[%s14699_s21 + $0x2] sm:$0x1]  ;;  %v11571_v45 = vpack.c.bf16 %v8292_v44, %v8291_v43 }
 0xc41   :  { %10606 = vmatpush3.bf16.msra.mxu1 %v12315_v46  ;;  %v14536_v46 = vld [vmem:[%s14700_s22] sm:$0xff] }
 0xc42   :  { %10607 = vmatprep.subr.bf16.mxu1 %v12318_v48 }
 0xc45   :  { %10608 = vmatpush3.bf16.msra.mxu1 %v12319_v49 }
 0xc46   :  { %10609 = vmatprep.subr.bf16.mxu1 %v12322_v52 }
 0xc49   :  { %10610 = vmatpush3.bf16.msra.mxu1 %v12323_v53 }
 0xc4a   :  { %10611 = vmatprep.subr.bf16.mxu1 %v12326_v56 }
 0xc4d   :  { %10612 = vmatpush3.bf16.msra.mxu1 %v12327_v60 }
 0xc4e   :  { %10613 = vmatprep.subr.bf16.mxu1 %v12330_v63 }
 0xc51   :  { %10614 = vmatpush3.bf16.msra.mxu1 %v12331_v0 }
 0xc52   :  { %10615 = vmatprep.subr.bf16.mxu1 %v12334_v5 }
 0xc55   :  { %10616 = vmatpush3.bf16.msra.mxu1 %v12335_v7 }
 0xc56   :  { %11564 = vmatprep.subr.bf16.mxu1 %v12386_v38 }
 0xc7c   :  { %v10595_v9 = vpop.f32.mrb[20].mxu0 }
 0xc7d   :  { %v10596_v17 = vpop.f32.mrb[21].mxu0 }
 0xc7e   :  { %v10597_v37 = vadd.f32 %v10596_v17, %v10595_v9  ;;  %v10598_v39 = vpop.f32.mrb[22].mxu0  ;;  %v8367_v9 = vld [vmem:[%s14691_s13] sm:$0x1] }
 0xc7f   :  { %v10599_v15 = vpop.f32.mrb[23].mxu0  ;;  %v8137_v39 = vld [vmem:[%s14699_s21 + $0x1] sm:$0x1] }
 0xceb   :  { %v7384_v19 = vpop.f32.mrb[16].mxu1 }
 0xcec   :  { %v7385_v12 = vadd.f32 %v7384_v19, %v14333_v58  ;;  %v7386_v16 = vpop.f32.mrb[17].mxu1 }
 0xced   :  { %v7387_v3 = vadd.f32 %v7386_v16, %v14336_v59 }
 0xcee   :  { %v7389_v4 = vmax.f32 %v7385_v12, 0.0 }
 0xcef   :  { %v7390_v29 = vmax.f32 %v7387_v3, 0.0 }
 0xcf1   :  { %v7393_v55 = vcombine.low %v7389_v4, %v7390_v29 }
 0xcf3   :  { %v7394_v8 = vrot.slane %v7393_v55, 6 }
 0xcf5   :  { %7396 = vst [vmem:[#allocation5] sm:$0xcc] %v7394_v8 }
 0xcfc   :  { %v7767_v14 = vld [vmem:[#allocation5 + $0x2] ss:$4 sm:$0x3]  ;;  %v7952_v20 = vld [vmem:[#allocation5 + $0x3] ss:$4 sm:$0x3] }
 0xcfd   :  { %v7772_v23 = vrot.slane %v7767_v14, %v14324_v2  ;;  %v7776_v24 = vrot.slane %v7767_v14, %v14330_v57  ;;  %v7957_v25 = vrot.slane %v7952_v20, %v14324_v2  ;;  %v7961_v26 = vrot.slane %v7952_v20, %v14330_v57  ;;  %v7397_v2 = vld [vmem:[%s14688_s10] sm:$0x1] }
 0xcfe   :  { %v8397_v20 = vld [vmem:[%s14695_s17] sm:$0xff] }
 0xcff   :  { %v7779_v11 = vpack.c.bf16 %v7772_v23, %v7772_v23  ;;  %v7780_v58 = vpack.c.bf16 %v7776_v24, %v7776_v24  ;;  %v7964_v27 = vpack.c.bf16 %v7957_v25, %v7957_v25  ;;  %v7965_v28 = vpack.c.bf16 %v7961_v26, %v7961_v26  ;;  %v8398_v23 = vld [vmem:[%s14695_s17 + $0x8] sm:$0xff]  ;;  %v8475_v24 = vld [vmem:[%s14697_s19] sm:$0xff]  ;;  %s12390_s17 = smov 80  }
 0xd00   :  { %v11574_v25 = vpack.c.bf16 %v8398_v23, %v8397_v20  ;;  %v8476_v26 = vld [vmem:[%s14697_s19 + $0x8] sm:$0xff] }
 0xd01   :  { %7942 = vmatprep.mubr.bf16.mxu1 %v7780_v58  ;;  %8127 = vmatprep.mubr.bf16.mxu0 %v7965_v28 }
 0xd02   :  { %7943 = vmatmul.mubr.bf16.vlgmr.msra.gmra.mrb[24].mxu1 %v7779_v11  ;;  %8128 = vmatmul.mubr.bf16.vlgmr.msra.gmra.mrb[24].mxu0 %v7964_v27  ;;  %v11577_v11 = vpack.c.bf16 %v8476_v26, %v8475_v24 }
 0xd03   :  { %11504 = vmatprep.mubr.msk.f32.mxu1 %vm12384_vm14, %v13747_v50  ;;  %11511 = vmatprep.mubr.msk.f32.mxu0 %vm12384_vm14, %v13747_v50  ;;  %v11565_v50 = vpack.c.bf16 %v8143_v36, %v8142_v35 }
 0xd04   :  { %11569 = vmatpush3.bf16.msra.mxu0 %v11568_v42 }
 0xd05   :  { %11566 = vmatpush3.bf16.msra.mxu1 %v11565_v50  ;;  %11573 = vmatprep.subr.bf16.mxu0 %v12386_v38 }
 0xd06   :  { %11570 = vmatprep.subr.bf16.mxu1 %v12386_v38 }
 0xd0a   :  { %11505 = vmatmul.mubr.msk.f32.vlgmr.msra.gmra.mrb[18].mxu1 %vm8144_vm1, %v14529_v22 }
 0xd0b   :  { %v10573_v59 = vpop.f32.mrb[20].mxu1  ;;  %11572 = vmatpush3.bf16.msra.mxu1 %v11571_v45  ;;  %11518 = vmatprep.mubr.msk.f32.mxu1 %vm12384_vm14, %v14536_v46 }
 0xd0c   :  { %v10574_v57 = vpop.f32.mrb[21].mxu1  ;;  %11576 = vmatprep.subr.bf16.mxu1 %v12386_v38 }
 0xd0d   :  { %v10575_v30 = vadd.f32 %v10574_v57, %v10573_v59  ;;  %v10576_v31 = vpop.f32.mrb[22].mxu1  ;;  %v8584_v59 = vld [vmem:[%s14692_s14] sm:$0xff] }
 0xd0e   :  { %v10577_v32 = vpop.f32.mrb[23].mxu1  ;;  %11519 = vmatmul.mubr.msk.f32.vlgmr.msra.gmra.mrb[28].mxu1 %vm8144_vm1, %v8136_v47  ;;  %v8399_v31 = vld [vmem:[#allocation6] sm:$0x1] }
 0xd0f   :  { %v7580_v33 = vadd.f32 %v10575_v30, %v7397_v2  ;;  %11532 = vmatprep.mubr.msk.f32.mxu1 %vm12384_vm14, %v14536_v46  ;;  %11578 = vmatpush3.bf16.msra.mxu1 %v11577_v11  ;;  %v8585_v2 = vld [vmem:[%s14692_s14 + $0x8] sm:$0xff]  ;;  %v8477_v32 = vld [vmem:[%s14698_s20] sm:$0x1] }
 0xd10   :  { %11579 = vmatprep.subr.bf16.mxu1 %v12386_v38  ;;  %v11580_v57 = vpack.c.bf16 %v8585_v2, %v8584_v59 }
 0xd11   :  { %v7765_v34 = vadd.f32 %v10597_v37, %v7580_v33 }
 0xdd5   :  { %v10617_v48 = vpop.f32.mrb[24].mxu1  ;;  %v10639_v21 = vpop.f32.mrb[24].mxu0 }
 0xdd6   :  { %v10618_v49 = vpop.f32.mrb[25].mxu1  ;;  %v10640_v51 = vpop.f32.mrb[25].mxu0 }
 0xdd7   :  { %v10619_v52 = vadd.f32 %v10618_v49, %v10617_v48  ;;  %v10641_v62 = vadd.f32 %v10640_v51, %v10639_v21  ;;  %v10620_v53 = vpop.f32.mrb[26].mxu1  ;;  %v10642_v54 = vpop.f32.mrb[26].mxu0 }
 0xdd8   :  { %v10621_v56 = vpop.f32.mrb[27].mxu1  ;;  %v10643_v13 = vpop.f32.mrb[27].mxu0  ;;  %v14766_v53 = vld [vmem:[#allocation8_spill] sm:$0xff] }
 0xdd9   :  { %v7950_v60 = vadd.f32 %v10619_v52, %v7765_v34  ;;  %v8568_v54 = vcvt.s32.f32 %v14766_v53 }
 0xddb   :  { %v8135_v61 = vadd.f32 %v10641_v62, %v7950_v60 }
 0xddd   :  { %8840 = vst.msk [vmem:[%s14700_s22] sm:$0x1] %vm8839_vm2, %v8135_v61  ;;  %11512 = vmatmul.mubr.msk.f32.vlgmr.msra.gmra.mrb[14].mxu0 %vm8144_vm1, %v8135_v61  ;;  %v8214_v63 = vpop.f32.mrb[18].mxu1 }
 0xdde   :  { %11525 = vmatprep.mubr.msk.f32.mxu0 %vm12384_vm14, %v14536_v46  ;;  %v11506_v10 = vpop.f32.mrb[19].mxu1  ;;  %11575 = vmatpush3.bf16.msra.mxu0 %v11574_v25 }
 0xddf   :  { %11535 = vmatprep.subr.mxu0 %v14536_v46  ;;  %v8735_v10 = vld [vmem:[%s14693_s15] sm:$0xff] }
 0xde1   :  { %v8362_v0 = vpop.f32.mrb[28].mxu1 }
 0xde2   :  { %v11520_v1 = vpop.f32.mrb[29].mxu1 }
 0xeb0   :  { %v8287_v5 = vpop.f32.mrb[14].mxu0 }
 0xeb1   :  { %v8288_v6 = vadd.f32 %v8287_v5, %v8214_v63  ;;  %v11513_v7 = vpop.f32.mrb[15].mxu0  ;;  %v8139_v63 = vld [vmem:[%s14699_s21 + $0x3] sm:$0x1] }
 0xeb3   :  { %v8366_v17 = vadd.f32 %v8362_v0, %v8288_v6  ;;  %v8736_v0 = vld [vmem:[%s14693_s15 + $0x8] sm:$0xff] }
 0xeb4   :  { %v11583_v5 = vpack.c.bf16 %v8736_v0, %v8735_v10 }
 0xeb5   :  { %v8368_v18 = vadd.f32 %v8367_v9, %v8366_v17 }
 0xeb7   :  { %12338 = vtanh.f32 %v8368_v18  ;;  %v10219_v15 = vmul.f32 -1.442695, %v8368_v18  ;;  %v8808_v18 = vld [vmem:[%s14694_s16] sm:$0x1]  ;;  %s12391_s16 = smov 112  }
 0xeb9   :  { %12340 = vpow2.f32 %v10219_v15 }
 0xec1   :  { %v12339_v37 = vpop.eup %12338 }
 0xec2   :  { %8382 = vrot.lane.b32.xlu0 %v12339_v37, %s12387_s25 }
 0xec3   :  { %v12341_v19 = vpop.eup %12340 }
 0xec4   :  { %v8372_v12 = vadd.f32 1.0, %v12341_v19 }
 0xec6   :  { %8377 = vrot.lane.b32.xlu0 %v8137_v39, %s12388_s23  ;;  %12342 = vrcp.f32 %v8372_v12 }
 0xed0   :  { %v12343_v16 = vpop.eup %12342 }
 0xf34   :  { %v8383_v3 = vpop.permute.xlu0 %8382 }
 0xf35   :  { %v8385_v4 = vmul.f32 %v12343_v16, %v8383_v3 }
 0xf37   :  { %8387 = vrot.lane.b32.xlu1 %v8385_v4, %s12388_s23 }
 0xf38   :  { %v8378_v29 = vpop.permute.xlu0 %8377 }
 0xf39   :  { %v8380_v55 = vmul.f32 %v12343_v16, %v8378_v29 }
 0xfa9   :  { %v8388_v8 = vpop.permute.xlu1 %8387 }
 0xfaa   :  { %v14564_v14 = vadd.f32 %v8388_v8, %v8380_v55 }
 0xfac   :  { %12344 = vtanh.f32 %v14564_v14 }
 0xfb6   :  { %v12345_v58 = vpop.eup %12344 }
 0xfb7   :  { %8393 = vrot.lane.b32.xlu1 %v12345_v58, %s12389_s4 }
0x1029   :  { %v8394_v27 = vpop.permute.xlu1 %8393 }
0x102a   :  { %v8396_v28 = vmul.f32 %v12343_v16, %v8394_v27 }
0x102c   :  { %8401 = vrot.lane.b32.xlu0 %v8396_v28, %s12390_s17 }
0x109e   :  { %v8402_v30 = vpop.permute.xlu0 %8401 }
0x109f   :  { %8842 = vst.msk [vmem:[%s14700_s22 + $0x1] sm:$0x1] %vm8839_vm2, %v8402_v30  ;;  %11526 = vmatmul.mubr.msk.f32.vlgmr.msra.gmra.mrb[28].mxu0 %vm8144_vm1, %v8402_v30  ;;  %11533 = vmatmul.mubr.msk.f32.vlgmr.msra.gmra.mrb[30].mxu1 %vm8144_vm1, %v8402_v30 }
0x10a0   :  { %11581 = vmatpush3.bf16.msra.mxu1 %v11580_v57  ;;  %11544 = vmatprep.mubr.msk.f32.mxu1 %vm12384_vm14, %v14536_v46 }
0x10a1   :  { %11537 = vmatprep.mubr.msk.f32.mxu0 %vm12384_vm14, %v14536_v46 }
0x10a3   :  { %11545 = vmatmul.mubr.msk.f32.vlgmr.msra.gmra.mrb[32].mxu1 %vm8144_vm1, %v8135_v61  ;;  %v8586_v61 = vld [vmem:[%s14692_s14 + $0x10] sm:$0x3] }
0x10a4   :  { %11536 = vmatpush3.msk.msra.mxu0 %vm133_vm4, %v8586_v61 }
0x10a5   :  { %11582 = vmatprep.subr.bf16.mxu0 %v12386_v38 }
0x1172   :  { %v8471_v33 = vpop.f32.mrb[28].mxu0  ;;  %v8544_v34 = vpop.f32.mrb[30].mxu1 }
0x1173   :  { %v8472_v35 = vadd.f32 %v8471_v33, %v8399_v31  ;;  %v8545_v36 = vadd.f32 %v8544_v34, %v8477_v32  ;;  %v11527_v50 = vpop.f32.mrb[29].mxu0  ;;  %v11534_v40 = vpop.f32.mrb[31].mxu1 }
0x1175   :  { %8859 = vst.msk [vmem:[%s14700_s22 + $0x5] sm:$0x1] %vm8858_vm3, %v8472_v35  ;;  %v8549_v41 = vsel %vm8548_vm5, %v8545_v36, -inf }
0x1176   :  { %8550 = vmax.xlane.f32.xlu1 %v8549_v41  ;;  %v8731_v42 = vpop.f32.mrb[32].mxu1 }
0x1177   :  { %v11546_v43 = vpop.f32.mrb[33].mxu1 }
0x1203   :  { %v8551_v44 = vpop.xlane.xlu1 %8550 }
0x1204   :  { %v8552_v45 = vsub.f32 %v8545_v36, %v8551_v44 }
0x1206   :  { %v8553_v47 = vmul.f32 1.442695, %v8552_v45 }
0x1208   :  { %12346 = vpow2.f32 %v8553_v47 }
0x1212   :  { %v12347_v48 = vpop.eup %12346 }
0x1213   :  { %v8555_v21 = vsel %vm8548_vm5, %v12347_v48, 0.0 }
0x1214   :  { %8556 = vadd.xlane.f32.xlu0 %v8555_v21 }
0x12a1   :  { %v8557_v49 = vpop.xlane.xlu0 %8556 }
0x12a2   :  { %12348 = vrcp.f32 %v8557_v49 }
0x12ac   :  { %v12349_v51 = vpop.eup %12348 }
0x12ad   :  { %v14608_v52 = vmul.f32 %v12349_v51, %v12347_v48 }
0x12af   :  { %v8569_v62 = vsel %vm8548_vm5, %v14608_v52, -inf }
0x12b0   :  { %8570 = vmax.xlane.f32.xlu0 %v8569_v62 }
0x133d   :  { %v8571_v56 = vpop.xlane.xlu0 %8570 }
0x133e   :  { %vm8572_vm6 = vcmp.ge.f32.partialorder %v14608_v52, %v8571_v56 }
0x133f   :  { %v8573_v13 = vsel %vm8572_vm6, %v8568_v54, 2.0 }
0x1340   :  { %v8574_v60 = vsel %vm8548_vm5, %v8573_v13, inf }
0x1341   :  { %8575 = vmin.xlane.f32.xlu1 %v8574_v60 }
0x1352   :  { %8818 = vrot.lane.b32.xlu1 %v8139_v63, %s12388_s23 }
0x13ce   :  { %v14630_v1 = vpop.xlane.xlu1 %8575 }
0x13cf   :  { %vm8577_vm4 = vcmp.eq.f32.partialorder %v8568_v54, %v14630_v1 }
0x13d0   :  { %v10222_v38 = vsel %vm8577_vm4, 1.0, %v14536_v46 }
0x13d1   :  { %11538 = vmatmul.mubr.msk.f32.vlgmr.msra.gmra.mrb[30].mxu0 %vm8587_vm7, %v10222_v38 }
0x13d2   :  { %11584 = vmatpush3.bf16.msra.mxu0 %v11583_v5  ;;  %11551 = vmatprep.mubr.msk.f32.mxu0 %vm12384_vm14, %v14536_v46  ;;  %v8819_v24 = vpop.permute.xlu1 %8818 }
0x13d5   :  { %11552 = vmatmul.mubr.msk.f32.vlgmr.msra.gmra.mrb[32].mxu0 %vm8144_vm1, %v14529_v22 }
0x14a4   :  { %v8661_v6 = vpop.f32.mrb[30].mxu0 }
0x14a5   :  { %v8732_v7 = vadd.f32 %v8731_v42, %v8661_v6  ;;  %v11539_v9 = vpop.f32.mrb[31].mxu0 }
0x14a8   :  { %v8803_v17 = vpop.f32.mrb[32].mxu0 }
0x14a9   :  { %v8807_v37 = vadd.f32 %v8803_v17, %v8732_v7  ;;  %v11553_v39 = vpop.f32.mrb[33].mxu0 }
0x14ab   :  { %v8809_v15 = vadd.f32 %v8808_v18, %v8807_v37 }
0x14ad   :  { %12350 = vtanh.f32 %v8809_v15  ;;  %v10227_v12 = vmul.f32 -1.442695, %v8809_v15 }
0x14af   :  { %12352 = vpow2.f32 %v10227_v12 }
0x14b7   :  { %v12351_v19 = vpop.eup %12350 }
0x14b8   :  { %8823 = vrot.lane.b32.xlu0 %v12351_v19, %s12387_s25 }
0x14b9   :  { %v12353_v46 = vpop.eup %12352 }
0x14ba   :  { %v8813_v16 = vadd.f32 1.0, %v12353_v46 }
0x14bc   :  { %12354 = vrcp.f32 %v8813_v16 }
0x14bd   :  { %12356 = vlog2.f32 %v8557_v49 }
0x14c6   :  { %v12355_v22 = vpop.eup %12354 }
0x14c7   :  { %v12357_v29 = vpop.eup %12356  ;;  %v8821_v25 = vmul.f32 %v12355_v22, %v8819_v24 }
0x14c8   :  { %v8561_v55 = vmul.f32 0.6931472, %v12357_v29 }
0x14ca   :  { %v8562_v8 = vsub.f32 %v8552_v45, %v8561_v55 }
0x14cc   :  { %v8563_v20 = vmul.f32 %v8562_v8, %v14608_v52  ;;  %v8580_v27 = vmul.f32 %v10222_v38, %v8562_v8 }
0x14ce   :  { %v8564_v23 = vsel %vm8548_vm5, %v8563_v20, 0.0  ;;  %v8581_v28 = vsel %vm8548_vm5, %v8580_v27, 0.0 }
0x152a   :  { %v8824_v3 = vpop.permute.xlu0 %8823 }
0x152b   :  { %v8826_v4 = vmul.f32 %v12355_v22, %v8824_v3 }
0x152d   :  { %8828 = vrot.lane.b32.xlu1 %v8826_v4, %s12388_s23  ;;  %s12392_s23 = smov 4  }
0x1551   :  { %8565 = vadd.xlane.f32.xlu1 %v8564_v23 }
0x1562   :  { %8844 = vrot.lane.b32.xlu1 %v14564_v14, %s12391_s16 }
0x159f   :  { %v8829_v26 = vpop.permute.xlu1 %8828 }
0x15a0   :  { %v8831_v11 = vadd.f32 %v8829_v26, %v8821_v25 }
0x15a2   :  { %12358 = vtanh.f32 %v8831_v11 }
0x15ac   :  { %v12359_v58 = vpop.eup %12358 }
0x15ad   :  { %8834 = vrot.lane.b32.xlu0 %v12359_v58, %s12389_s4 }
0x15cc   :  { %8582 = vadd.xlane.f32.xlu0 %v8581_v28 }
0x15de   :  { %v8566_v59 = vpop.xlane.xlu1 %8565 }
0x15df   :  { %v8567_v2 = vsub.f32 0.0, %v8566_v59 }
0x15e1   :  { %8861 = vst.msk [vmem:[%s14700_s22 + $0x5] sm:$0x1] %vm8860_vm8, %v8567_v2 }
0x15e2   :  { %v8845_v14 = vpop.permute.xlu1 %8844  ;;  %8867 = vrot.lane.b32.xlu0 %v14608_v52, %s12392_s23 }
0x15e3   :  { %8847 = vst.msk [vmem:[%s14700_s22 + $0x2] sm:$0x1] %vm8839_vm2, %v8845_v14 }
0x15e6   :  { %8854 = vrot.lane.b32.xlu0 %v8831_v11, %s12391_s16 }
0x161f   :  { %v8835_v57 = vpop.permute.xlu0 %8834 }
0x1620   :  { %v8837_v30 = vmul.f32 %v12355_v22, %v8835_v57 }
0x1622   :  { %8849 = vrot.lane.b32.xlu1 %v8837_v30, %s12390_s17 }
0x1626   :  { %8873 = vrot.lane.b32.xlu1 %v8562_v8, %s12393_s28 }
0x1659   :  { %v8583_v31 = vpop.xlane.xlu0 %8582 }
0x165a   :  { %8863 = vst.msk [vmem:[%s14700_s22 + $0x5] sm:$0x1] %vm8862_vm9, %v8583_v31 }
0x165b   :  { %8865 = vst.msk [vmem:[%s14700_s22 + $0x5] sm:$0x1] %vm8864_vm10, %v14630_v1 }
0x165d   :  { %v8868_v32 = vpop.permute.xlu0 %8867 }
0x165e   :  { %8871 = vst.msk [vmem:[%s14700_s22 + $0x5] sm:$0x1] %vm8870_vm11, %v8868_v32 }
0x1661   :  { %v8855_v33 = vpop.permute.xlu0 %8854 }
0x1662   :  { %8857 = vst.msk [vmem:[%s14700_s22 + $0x4] sm:$0x1] %vm8839_vm2, %v8855_v33 }
0x1694   :  { %v8850_v34 = vpop.permute.xlu1 %8849 }
0x1695   :  { %8852 = vst.msk [vmem:[%s14700_s22 + $0x3] sm:$0x1] %vm8839_vm2, %v8850_v34 }
0x1698   :  { %v8874_v35 = vpop.permute.xlu1 %8873 }
0x1699   :  { %8877 = vst.msk [vmem:[%s14700_s22 + $0x5] sm:$0x1] %vm8876_vm12, %v8874_v35 }

</bundles_post_ra>
